<compile_context>
chip_gen: v6e
topology: v6e:2x2x1
jax: 0.10.0
libtpu: 0.0.40
codegen_flags: <defaults>
</compile_context>

<pallas_src>
import numpy as np
import jax
import jax.numpy as jnp
from jax.experimental import pallas as pl
from jax.experimental.pallas import tpu as pltpu


# MXU operand dtype; accumulation is always float32 via preferred_element_type.
COMPUTE_DTYPE = jnp.bfloat16

# Architecture constants of ModelNN's conv stack.
CONV1_K, CONV1_S, CONV1_O = 8, 4, 32
CONV2_K, CONV2_S, CONV2_O = 4, 2, 64
CONV3_K, CONV3_S, CONV3_O = 3, 1, 64
FC1_O = 512


def _out_dim(size, k, s):
    return (size - k) // s + 1


# ---------------------------------------------------------------------------
# Host-side one-time preparation: weight permutation + constant gather /
# selection matrices used for the in-kernel im2col (gather-by-matmul).
# ---------------------------------------------------------------------------

def _gather_matrices(n, ih, iw, kh, kw, stride):
    """0/1 matrices G[k] so that (G[k] @ act2d)[row, :] is the activation row
    at kernel offset k for output position `row`.

    act2d rows are ordered (n, ih, iw), columns = channels. Output rows are
    ordered (n, oh, ow). One matrix per kernel offset k = ki*kw + kj.
    """
    oh, ow = _out_dim(ih, kh, stride), _out_dim(iw, kw, stride)
    g = np.zeros((kh * kw, n * oh * ow, n * ih * iw), np.float32)
    for ki in range(kh):
        for kj in range(kw):
            k = ki * kw + kj
            for b in range(n):
                for a in range(oh):
                    for c in range(ow):
                        row = b * oh * ow + a * ow + c
                        src = b * ih * iw + (a * stride + ki) * iw + (c * stride + kj)
                        g[k, row, src] = 1.0
    return g


def _fc1_select_matrices(batch, n_pos):
    """0/1 matrices S[p] of shape (batch, batch*n_pos) selecting, for every
    batch member n, the activation row (n, p) of the conv3 output."""
    s = np.zeros((n_pos, batch, batch * n_pos), np.float32)
    for p in range(n_pos):
        for n in range(batch):
            s[p, n, n * n_pos + p] = 1.0
    return s


def _conv_weight_blocks(w_oihw):
    """OIHW -> (KH*KW, Cin, O): one (Cin, O) matmul block per kernel offset."""
    o, ci, kh, kw = w_oihw.shape
    return jnp.transpose(w_oihw, (2, 3, 1, 0)).reshape(kh * kw, ci, o)


def _conv_weight_matrix(w_oihw):
    """OIHW -> (KH*KW*Cin, O); row-block order (ki, kj, c_in)."""
    o, ci, kh, kw = w_oihw.shape
    return jnp.transpose(w_oihw, (2, 3, 1, 0)).reshape(kh * kw * ci, o)


def pack_params(params, batch, height, width):
    """Pre-permute PyTorch-layout params and build gather constants (once)."""
    oh1, ow1 = _out_dim(height, CONV1_K, CONV1_S), _out_dim(width, CONV1_K, CONV1_S)
    oh2, ow2 = _out_dim(oh1, CONV2_K, CONV2_S), _out_dim(ow1, CONV2_K, CONV2_S)
    oh3, ow3 = _out_dim(oh2, CONV3_K, CONV3_S), _out_dim(ow2, CON3_K := CONV3_K, CONV3_S)

    c3 = params["conv3_w"].shape[0]
    fc1_w = params["fc1_w"]                       # (512, C3*OH3*OW3), NCHW flatten
    f1_out = fc1_w.shape[0]
    # (512, C3, P) -> (P, C3, 512) so wf1[p][c, j] == fc1_w[j, c*P + p].
    wf1 = jnp.transpose(fc1_w.reshape(f1_out, c3, oh3 * ow3), (2, 1, 0))

    cd, f32 = COMPUTE_DTYPE, jnp.float32
    return {
        "w1": _conv_weight_matrix(params["conv1_w"]).astype(cd),
        "b1": params["conv1_b"].reshape(1, -1).astype(f32),
        "g2": jnp.asarray(_gather_matrices(batch, oh1, ow1, CONV2_K, CONV2_K, CONV2_S), cd),
        "w2": _conv_weight_blocks(params["conv2_w"]).astype(cd),
        "b2": params["conv2_b"].reshape(1, -1).astype(f32),
        "g3": jnp.asarray(_gather_matrices(batch, oh2, ow2, CONV3_K, CONV3_K, CONV3_S), cd),
        "w3": _conv_weight_blocks(params["conv3_w"]).astype(cd),
        "b3": params["conv3_b"].reshape(1, -1).astype(f32),
        "sel3": jnp.asarray(_fc1_select_matrices(batch, oh3 * ow3), cd),
        "wf1": wf1.astype(cd),
        "bf1": params["fc1_b"].reshape(1, -1).astype(f32),
        "wf2": jnp.transpose(params["fc2_w"], (1, 0)).astype(cd),
        "bf2": params["fc2_b"].reshape(1, -1).astype(f32),
    }


# ---------------------------------------------------------------------------
# The single fused Pallas kernel.
# ---------------------------------------------------------------------------

def _fused_kernel(p1_ref, w1_ref, b1_ref, g2_ref, w2_ref, b2_ref,
                  g3_ref, w3_ref, b3_ref, sel3_ref, wf1_ref, bf1_ref,
                  wf2_ref, bf2_ref, out_ref):
    cd, f32 = COMPUTE_DTYPE, jnp.float32

    def mm(a, b):
        return jnp.dot(a, b, preferred_element_type=f32)

    def conv_via_gather(act, g_ref, w_ref, b_ref):
        """sum_k (G_k @ act) @ W_k  + bias, ReLU.  No concatenates."""
        acc = None
        for k in range(g_ref.shape[0]):
            rows = mm(g_ref[k], act).astype(cd)          # (M_out, Cin) gather on MXU
            term = mm(rows, w_ref[k])                    # (M_out, Cout) f32
            acc = term if acc is None else acc + term
        return jnp.maximum(acc + b_ref[...], 0.0).astype(cd)

    # conv1 + ReLU: host-built patch matrix (M1, K1*K1*Cin) @ (K1*K1*Cin, 32).
    a1 = jnp.maximum(mm(p1_ref[...], w1_ref[...]) + b1_ref[...], 0.0).astype(cd)

    # conv2 / conv3: in-kernel im2col via gather-by-matmul + per-offset matmul.
    a2 = conv_via_gather(a1, g2_ref, w2_ref, b2_ref)
    a3 = conv_via_gather(a2, g3_ref, w3_ref, b3_ref)

    # fc1: PyTorch NCHW flatten folded into the host-permuted wf1.
    #   h = sum_p (S_p @ a3) @ wf1[p]
    h = None
    for p in range(sel3_ref.shape[0]):
        rows = mm(sel3_ref[p], a3).astype(cd)            # (batch, C3)
        term = mm(rows, wf1_ref[p])                      # (batch, 512) f32
        h = term if h is None else h + term
    h = jnp.maximum(h + bf1_ref[...], 0.0).astype(cd)

    # fc2: Q-values (the only HBM store of the kernel; tiny write).
    out_ref[...] = (mm(h, wf2_ref[...]) + bf2_ref[...]).astype(out_ref.dtype)


# ---------------------------------------------------------------------------
# Forward pass wrapper.
# ---------------------------------------------------------------------------

def model_nn_forward(x_nchw, packed):
    n, c, height, width = x_nchw.shape
    oh1, ow1 = _out_dim(height, CONV1_K, CONV1_S), _out_dim(width, CONV1_K, CONV1_S)
    oh2, ow2 = _out_dim(oh1, CONV2_K, CONV2_S), _out_dim(ow1, CONV2_K, CONV2_S)
    n_actions = packed["wf2"].shape[1]
    assert packed["g2"].shape[1] == n * oh2 * ow2, "packed params built for different batch/shape"
    assert packed["g2"].shape[2] == n * oh1 * ow1, "packed params built for different batch/shape"

    # conv1 im2col in XLA: the only HBM-resident intermediate (~100 KiB bf16),
    # built NHWC-style with a single lane concat (no 5-D transposes).
    xh = jnp.transpose(x_nchw, (0, 2, 3, 1))
    cols = []
    for ki in range(CONV1_K):
        for kj in range(CONV1_K):
            cols.append(xh[:, ki: ki + CONV1_S * (oh1 - 1) + 1: CONV1_S,
                            kj: kj + CONV1_S * (ow1 - 1) + 1: CONV1_S, :])
    p1 = jnp.concatenate(cols, axis=-1).reshape(
        n * oh1 * ow1, CONV1_K * CONV1_K * c).astype(COMPUTE_DTYPE)

    operands = (p1, packed["w1"], packed["b1"],
                packed["g2"], packed["w2"], packed["b2"],
                packed["g3"], packed["w3"], packed["b3"],
                packed["sel3"], packed["wf1"], packed["bf1"],
                packed["wf2"], packed["bf2"])

    return pl.pallas_call(
        _fused_kernel,
        out_shape=jax.ShapeDtypeStruct((n, n_actions), jnp.float32),
        grid=(1,),
        in_specs=[pl.BlockSpec(t.shape, lambda i, nd=t.ndim: (0,) * nd)
                  for t in operands],
        out_specs=pl.BlockSpec((n, n_actions), lambda i: (0, 0)),
        compiler_params=pltpu.CompilerParams(
            dimension_semantics=("arbitrary",)),
    )(*operands)


# ---------------------------------------------------------------------------
# Param init (PyTorch layouts) + pure-JAX reference for validation.
# ---------------------------------------------------------------------------

def init_params(key, in_channels, conv_out_size, n_actions):
    ks = jax.random.split(key, 10)
    def w(k, shape, scale=0.05):
        return (scale * jax.random.normal(k, shape)).astype(jnp.float32)
    return {
        "conv1_w": w(ks[0], (CONV1_O, in_channels, CONV1_K, CONV1_K)),
        "conv1_b": w(ks[1], (CONV1_O,)),
        "conv2_w": w(ks[2], (CONV2_O, CONV1_O, CONV2_K, CONV2_K)),
        "conv2_b": w(ks[3], (CONV2_O,)),
        "conv3_w": w(ks[4], (CONV3_O, CONV2_O, CONV3_K, CONV3_K)),
        "conv3_b": w(ks[5], (CONV3_O,)),
        "fc1_w":   w(ks[6], (FC1_O, conv_out_size)),
        "fc1_b":   w(ks[7], (FC1_O,)),
        "fc2_w":   w(ks[8], (n_actions, FC1_O)),
        "fc2_b":   w(ks[9], (n_actions,)),
    }


def _reference_forward(x_nchw, params):
    """Plain-JAX (im2col) reference with PyTorch semantics, for validation."""
    def conv(x, wgt, b, s):
        n, c, hh, ww = x.shape
        o, _, kh, kw = wgt.shape
        oh, ow = _out_dim(hh, kh, s), _out_dim(ww, kw, s)
        cols = []
        for ki in range(kh):
            for kj in range(kw):
                cols.append(x[:, :, ki:ki + s * (oh - 1) + 1:s,
                                    kj:kj + s * (ow - 1) + 1:s])
        pat = jnp.stack(cols, axis=2).transpose(0, 3, 4, 1, 2)
        pat = pat.reshape(n * oh * ow, c * kh * kw)
        y = pat @ wgt.reshape(o, c * kh * kw).T + b
        return jnp.maximum(y, 0.0).reshape(n, oh, ow, o).transpose(0, 3, 1, 2)

    h = conv(x_nchw, params["conv1_w"], params["conv1_b"], CONV1_S)
    h = conv(h, params["conv2_w"], params["conv2_b"], CONV2_S)
    h = conv(h, params["conv3_w"], params["conv3_b"], CONV3_S)
    h = h.reshape(h.shape[0], -1)
    h = jnp.maximum(h @ params["fc1_w"].T + params["fc1_b"], 0.0)
    return h @ params["fc2_w"].T + params["fc2_b"]


if __name__ == "__main__":
    # Small shapes consistent with the module: input_shape=(4, 44, 44), batch=2.
    #   44 -(8,s4)-> 10 -(4,s2)-> 4 -(3,s1)-> 2  => conv_out = 64*2*2 = 256
    N, C, H, W = 2, 4, 44, 44
    n_actions = 6
    oh3 = _out_dim(_out_dim(_out_dim(H, CONV1_K, CONV1_S), CONV2_K, CONV2_S), CONV3_K, CONV3_S)
    ow3 = _out_dim(_out_dim(_out_dim(W, CONV1_K, CONV1_S), CONV2_K, CONV2_S), CONV3_K, CONV3_S)
    conv_out_size = CONV3_O * oh3 * ow3

    key = jax.random.PRNGKey(0)
    k_x, k_p = jax.random.split(key)
    x = jax.random.normal(k_x, (N, C, H, W), dtype=jnp.float32)
    params = init_params(k_p, C, conv_out_size, n_actions)
    packed = pack_params(params, N, H, W)

    fwd = jax.jit(model_nn_forward)
    out = fwd(x, packed)
    jax.block_until_ready(out)

    assert out.shape == (N, n_actions), out.shape
    assert out.dtype == jnp.float32

    # Validate against the pure-JAX reference (tolerance covers bf16 operands).
    ref = _reference_forward(x, params)
    max_err = float(jnp.max(jnp.abs(out - ref)))
    scale = float(jnp.max(jnp.abs(ref)))
    assert max_err <= 5e-2 + 5e-2 * scale, (max_err, scale)

    print("KERNEL_OK")
</pallas_src>

<mosaic_0001>
module attributes {stable_mosaic.version = 11 : i64} {
  func.func @_fused_kernel(%arg0: i32, %arg1: memref<200x256xbf16, #tpu.memory_space<vmem>>, %arg2: memref<256x32xbf16, #tpu.memory_space<vmem>>, %arg3: memref<1x32xf32, #tpu.memory_space<vmem>>, %arg4: memref<16x32x200xbf16, #tpu.memory_space<vmem>>, %arg5: memref<16x32x64xbf16, #tpu.memory_space<vmem>>, %arg6: memref<1x64xf32, #tpu.memory_space<vmem>>, %arg7: memref<9x8x32xbf16, #tpu.memory_space<vmem>>, %arg8: memref<9x64x64xbf16, #tpu.memory_space<vmem>>, %arg9: memref<1x64xf32, #tpu.memory_space<vmem>>, %arg10: memref<4x2x8xbf16, #tpu.memory_space<vmem>>, %arg11: memref<4x64x512xbf16, #tpu.memory_space<vmem>>, %arg12: memref<1x512xf32, #tpu.memory_space<vmem>>, %arg13: memref<512x6xbf16, #tpu.memory_space<vmem>>, %arg14: memref<1x6xf32, #tpu.memory_space<vmem>>, %arg15: memref<2x6xf32, #tpu.memory_space<vmem>>) attributes {dimension_semantics = [#tpu.dimension_semantics<arbitrary>], iteration_bounds = array<i64: 1>, scalar_prefetch = 0 : i64, scratch_operands = 0 : i64, tpu.core_type = #tpu.core_type<tc>, window_params = [{pipeline_mode = #tpu.pipeline_mode<synchronous>, transform_indices = @transform_0, window_bounds = array<i64: 200, 256>}, {pipeline_mode = #tpu.pipeline_mode<synchronous>, transform_indices = @transform_1, window_bounds = array<i64: 256, 32>}, {pipeline_mode = #tpu.pipeline_mode<synchronous>, transform_indices = @transform_2, window_bounds = array<i64: 1, 32>}, {pipeline_mode = #tpu.pipeline_mode<synchronous>, transform_indices = @transform_3, window_bounds = array<i64: 16, 32, 200>}, {pipeline_mode = #tpu.pipeline_mode<synchronous>, transform_indices = @transform_4, window_bounds = array<i64: 16, 32, 64>}, {pipeline_mode = #tpu.pipeline_mode<synchronous>, transform_indices = @transform_5, window_bounds = array<i64: 1, 64>}, {pipeline_mode = #tpu.pipeline_mode<synchronous>, transform_indices = @transform_6, window_bounds = array<i64: 9, 8, 32>}, {pipeline_mode = #tpu.pipeline_mode<synchronous>, transform_indices = @transform_7, window_bounds = array<i64: 9, 64, 64>}, {pipeline_mode = #tpu.pipeline_mode<synchronous>, transform_indices = @transform_8, window_bounds = array<i64: 1, 64>}, {pipeline_mode = #tpu.pipeline_mode<synchronous>, transform_indices = @transform_9, window_bounds = array<i64: 4, 2, 8>}, {pipeline_mode = #tpu.pipeline_mode<synchronous>, transform_indices = @transform_10, window_bounds = array<i64: 4, 64, 512>}, {pipeline_mode = #tpu.pipeline_mode<synchronous>, transform_indices = @transform_11, window_bounds = array<i64: 1, 512>}, {pipeline_mode = #tpu.pipeline_mode<synchronous>, transform_indices = @transform_12, window_bounds = array<i64: 512, 6>}, {pipeline_mode = #tpu.pipeline_mode<synchronous>, transform_indices = @transform_13, window_bounds = array<i64: 1, 6>}, {pipeline_mode = #tpu.pipeline_mode<synchronous>, transform_indices = @transform_14, window_bounds = array<i64: 2, 6>}]} {
    %c0 = arith.constant 0 : index
    %c0_0 = arith.constant 0 : index
    %0 = vector.load %arg1[%c0, %c0_0] : memref<200x256xbf16, #tpu.memory_space<vmem>>, vector<200x256xbf16>
    %c0_1 = arith.constant 0 : index
    %c0_2 = arith.constant 0 : index
    %1 = vector.load %arg2[%c0_1, %c0_2] : memref<256x32xbf16, #tpu.memory_space<vmem>>, vector<256x32xbf16>
    %cst = arith.constant dense<0.000000e+00> : vector<200x32xf32>
    %2 = tpu.matmul %0, %1, %cst {dimension_numbers = #tpu.dot_dimension_numbers<[1], [0], [0], [1], [0, 0, 1, 1], [], []>} : vector<200x256xbf16>, vector<256x32xbf16>, vector<200x32xf32> -> vector<200x32xf32>
    %c0_3 = arith.constant 0 : index
    %c0_4 = arith.constant 0 : index
    %3 = vector.load %arg3[%c0_3, %c0_4] : memref<1x32xf32, #tpu.memory_space<vmem>>, vector<1x32xf32>
    %4 = vector.broadcast %3 : vector<1x32xf32> to vector<200x32xf32>
    %5 = arith.addf %2, %4 : vector<200x32xf32>
    %cst_5 = arith.constant 0.000000e+00 : f32
    %6 = vector.broadcast %cst_5 : f32 to vector<200x32xf32>
    %7 = arith.maximumf %5, %6 : vector<200x32xf32>
    %8 = arith.truncf %7 : vector<200x32xf32> to vector<200x32xbf16>
    %c0_6 = arith.constant 0 : index
    %c0_7 = arith.constant 0 : index
    %c0_8 = arith.constant 0 : index
    %9 = vector.load %arg4[%c0_6, %c0_7, %c0_8] : memref<16x32x200xbf16, #tpu.memory_space<vmem>>, vector<1x32x200xbf16>
    %10 = vector.shape_cast %9 : vector<1x32x200xbf16> to vector<32x200xbf16>
    %cst_9 = arith.constant dense<0.000000e+00> : vector<32x32xf32>
    %11 = tpu.matmul %10, %8, %cst_9 {dimension_numbers = #tpu.dot_dimension_numbers<[1], [0], [0], [1], [0, 0, 1, 1], [], []>} : vector<32x200xbf16>, vector<200x32xbf16>, vector<32x32xf32> -> vector<32x32xf32>
    %12 = arith.truncf %11 : vector<32x32xf32> to vector<32x32xbf16>
    %c0_10 = arith.constant 0 : index
    %c0_11 = arith.constant 0 : index
    %c0_12 = arith.constant 0 : index
    %13 = vector.load %arg5[%c0_10, %c0_11, %c0_12] : memref<16x32x64xbf16, #tpu.memory_space<vmem>>, vector<1x32x64xbf16>
    %14 = vector.shape_cast %13 : vector<1x32x64xbf16> to vector<32x64xbf16>
    %cst_13 = arith.constant dense<0.000000e+00> : vector<32x64xf32>
    %15 = tpu.matmul %12, %14, %cst_13 {dimension_numbers = #tpu.dot_dimension_numbers<[1], [0], [0], [1], [0, 0, 1, 1], [], []>} : vector<32x32xbf16>, vector<32x64xbf16>, vector<32x64xf32> -> vector<32x64xf32>
    %c1 = arith.constant 1 : index
    %c0_14 = arith.constant 0 : index
    %c0_15 = arith.constant 0 : index
    %16 = vector.load %arg4[%c1, %c0_14, %c0_15] : memref<16x32x200xbf16, #tpu.memory_space<vmem>>, vector<1x32x200xbf16>
    %17 = vector.shape_cast %16 : vector<1x32x200xbf16> to vector<32x200xbf16>
    %cst_16 = arith.constant dense<0.000000e+00> : vector<32x32xf32>
    %18 = tpu.matmul %17, %8, %cst_16 {dimension_numbers = #tpu.dot_dimension_numbers<[1], [0], [0], [1], [0, 0, 1, 1], [], []>} : vector<32x200xbf16>, vector<200x32xbf16>, vector<32x32xf32> -> vector<32x32xf32>
    %19 = arith.truncf %18 : vector<32x32xf32> to vector<32x32xbf16>
    %c1_17 = arith.constant 1 : index
    %c0_18 = arith.constant 0 : index
    %c0_19 = arith.constant 0 : index
    %20 = vector.load %arg5[%c1_17, %c0_18, %c0_19] : memref<16x32x64xbf16, #tpu.memory_space<vmem>>, vector<1x32x64xbf16>
    %21 = vector.shape_cast %20 : vector<1x32x64xbf16> to vector<32x64xbf16>
    %cst_20 = arith.constant dense<0.000000e+00> : vector<32x64xf32>
    %22 = tpu.matmul %19, %21, %cst_20 {dimension_numbers = #tpu.dot_dimension_numbers<[1], [0], [0], [1], [0, 0, 1, 1], [], []>} : vector<32x32xbf16>, vector<32x64xbf16>, vector<32x64xf32> -> vector<32x64xf32>
    %23 = arith.addf %15, %22 : vector<32x64xf32>
    %c2 = arith.constant 2 : index
    %c0_21 = arith.constant 0 : index
    %c0_22 = arith.constant 0 : index
    %24 = vector.load %arg4[%c2, %c0_21, %c0_22] : memref<16x32x200xbf16, #tpu.memory_space<vmem>>, vector<1x32x200xbf16>
    %25 = vector.shape_cast %24 : vector<1x32x200xbf16> to vector<32x200xbf16>
    %cst_23 = arith.constant dense<0.000000e+00> : vector<32x32xf32>
    %26 = tpu.matmul %25, %8, %cst_23 {dimension_numbers = #tpu.dot_dimension_numbers<[1], [0], [0], [1], [0, 0, 1, 1], [], []>} : vector<32x200xbf16>, vector<200x32xbf16>, vector<32x32xf32> -> vector<32x32xf32>
    %27 = arith.truncf %26 : vector<32x32xf32> to vector<32x32xbf16>
    %c2_24 = arith.constant 2 : index
    %c0_25 = arith.constant 0 : index
    %c0_26 = arith.constant 0 : index
    %28 = vector.load %arg5[%c2_24, %c0_25, %c0_26] : memref<16x32x64xbf16, #tpu.memory_space<vmem>>, vector<1x32x64xbf16>
    %29 = vector.shape_cast %28 : vector<1x32x64xbf16> to vector<32x64xbf16>
    %cst_27 = arith.constant dense<0.000000e+00> : vector<32x64xf32>
    %30 = tpu.matmul %27, %29, %cst_27 {dimension_numbers = #tpu.dot_dimension_numbers<[1], [0], [0], [1], [0, 0, 1, 1], [], []>} : vector<32x32xbf16>, vector<32x64xbf16>, vector<32x64xf32> -> vector<32x64xf32>
    %31 = arith.addf %23, %30 : vector<32x64xf32>
    %c3 = arith.constant 3 : index
    %c0_28 = arith.constant 0 : index
    %c0_29 = arith.constant 0 : index
    %32 = vector.load %arg4[%c3, %c0_28, %c0_29] : memref<16x32x200xbf16, #tpu.memory_space<vmem>>, vector<1x32x200xbf16>
    %33 = vector.shape_cast %32 : vector<1x32x200xbf16> to vector<32x200xbf16>
    %cst_30 = arith.constant dense<0.000000e+00> : vector<32x32xf32>
    %34 = tpu.matmul %33, %8, %cst_30 {dimension_numbers = #tpu.dot_dimension_numbers<[1], [0], [0], [1], [0, 0, 1, 1], [], []>} : vector<32x200xbf16>, vector<200x32xbf16>, vector<32x32xf32> -> vector<32x32xf32>
    %35 = arith.truncf %34 : vector<32x32xf32> to vector<32x32xbf16>
    %c3_31 = arith.constant 3 : index
    %c0_32 = arith.constant 0 : index
    %c0_33 = arith.constant 0 : index
    %36 = vector.load %arg5[%c3_31, %c0_32, %c0_33] : memref<16x32x64xbf16, #tpu.memory_space<vmem>>, vector<1x32x64xbf16>
    %37 = vector.shape_cast %36 : vector<1x32x64xbf16> to vector<32x64xbf16>
    %cst_34 = arith.constant dense<0.000000e+00> : vector<32x64xf32>
    %38 = tpu.matmul %35, %37, %cst_34 {dimension_numbers = #tpu.dot_dimension_numbers<[1], [0], [0], [1], [0, 0, 1, 1], [], []>} : vector<32x32xbf16>, vector<32x64xbf16>, vector<32x64xf32> -> vector<32x64xf32>
    %39 = arith.addf %31, %38 : vector<32x64xf32>
    %c4 = arith.constant 4 : index
    %c0_35 = arith.constant 0 : index
    %c0_36 = arith.constant 0 : index
    %40 = vector.load %arg4[%c4, %c0_35, %c0_36] : memref<16x32x200xbf16, #tpu.memory_space<vmem>>, vector<1x32x200xbf16>
    %41 = vector.shape_cast %40 : vector<1x32x200xbf16> to vector<32x200xbf16>
    %cst_37 = arith.constant dense<0.000000e+00> : vector<32x32xf32>
    %42 = tpu.matmul %41, %8, %cst_37 {dimension_numbers = #tpu.dot_dimension_numbers<[1], [0], [0], [1], [0, 0, 1, 1], [], []>} : vector<32x200xbf16>, vector<200x32xbf16>, vector<32x32xf32> -> vector<32x32xf32>
    %43 = arith.truncf %42 : vector<32x32xf32> to vector<32x32xbf16>
    %c4_38 = arith.constant 4 : index
    %c0_39 = arith.constant 0 : index
    %c0_40 = arith.constant 0 : index
    %44 = vector.load %arg5[%c4_38, %c0_39, %c0_40] : memref<16x32x64xbf16, #tpu.memory_space<vmem>>, vector<1x32x64xbf16>
    %45 = vector.shape_cast %44 : vector<1x32x64xbf16> to vector<32x64xbf16>
    %cst_41 = arith.constant dense<0.000000e+00> : vector<32x64xf32>
    %46 = tpu.matmul %43, %45, %cst_41 {dimension_numbers = #tpu.dot_dimension_numbers<[1], [0], [0], [1], [0, 0, 1, 1], [], []>} : vector<32x32xbf16>, vector<32x64xbf16>, vector<32x64xf32> -> vector<32x64xf32>
    %47 = arith.addf %39, %46 : vector<32x64xf32>
    %c5 = arith.constant 5 : index
    %c0_42 = arith.constant 0 : index
    %c0_43 = arith.constant 0 : index
    %48 = vector.load %arg4[%c5, %c0_42, %c0_43] : memref<16x32x200xbf16, #tpu.memory_space<vmem>>, vector<1x32x200xbf16>
    %49 = vector.shape_cast %48 : vector<1x32x200xbf16> to vector<32x200xbf16>
    %cst_44 = arith.constant dense<0.000000e+00> : vector<32x32xf32>
    %50 = tpu.matmul %49, %8, %cst_44 {dimension_numbers = #tpu.dot_dimension_numbers<[1], [0], [0], [1], [0, 0, 1, 1], [], []>} : vector<32x200xbf16>, vector<200x32xbf16>, vector<32x32xf32> -> vector<32x32xf32>
    %51 = arith.truncf %50 : vector<32x32xf32> to vector<32x32xbf16>
    %c5_45 = arith.constant 5 : index
    %c0_46 = arith.constant 0 : index
    %c0_47 = arith.constant 0 : index
    %52 = vector.load %arg5[%c5_45, %c0_46, %c0_47] : memref<16x32x64xbf16, #tpu.memory_space<vmem>>, vector<1x32x64xbf16>
    %53 = vector.shape_cast %52 : vector<1x32x64xbf16> to vector<32x64xbf16>
    %cst_48 = arith.constant dense<0.000000e+00> : vector<32x64xf32>
    %54 = tpu.matmul %51, %53, %cst_48 {dimension_numbers = #tpu.dot_dimension_numbers<[1], [0], [0], [1], [0, 0, 1, 1], [], []>} : vector<32x32xbf16>, vector<32x64xbf16>, vector<32x64xf32> -> vector<32x64xf32>
    %55 = arith.addf %47, %54 : vector<32x64xf32>
    %c6 = arith.constant 6 : index
    %c0_49 = arith.constant 0 : index
    %c0_50 = arith.constant 0 : index
    %56 = vector.load %arg4[%c6, %c0_49, %c0_50] : memref<16x32x200xbf16, #tpu.memory_space<vmem>>, vector<1x32x200xbf16>
    %57 = vector.shape_cast %56 : vector<1x32x200xbf16> to vector<32x200xbf16>
    %cst_51 = arith.constant dense<0.000000e+00> : vector<32x32xf32>
    %58 = tpu.matmul %57, %8, %cst_51 {dimension_numbers = #tpu.dot_dimension_numbers<[1], [0], [0], [1], [0, 0, 1, 1], [], []>} : vector<32x200xbf16>, vector<200x32xbf16>, vector<32x32xf32> -> vector<32x32xf32>
    %59 = arith.truncf %58 : vector<32x32xf32> to vector<32x32xbf16>
    %c6_52 = arith.constant 6 : index
    %c0_53 = arith.constant 0 : index
    %c0_54 = arith.constant 0 : index
    %60 = vector.load %arg5[%c6_52, %c0_53, %c0_54] : memref<16x32x64xbf16, #tpu.memory_space<vmem>>, vector<1x32x64xbf16>
    %61 = vector.shape_cast %60 : vector<1x32x64xbf16> to vector<32x64xbf16>
    %cst_55 = arith.constant dense<0.000000e+00> : vector<32x64xf32>
    %62 = tpu.matmul %59, %61, %cst_55 {dimension_numbers = #tpu.dot_dimension_numbers<[1], [0], [0], [1], [0, 0, 1, 1], [], []>} : vector<32x32xbf16>, vector<32x64xbf16>, vector<32x64xf32> -> vector<32x64xf32>
    %63 = arith.addf %55, %62 : vector<32x64xf32>
    %c7 = arith.constant 7 : index
    %c0_56 = arith.constant 0 : index
    %c0_57 = arith.constant 0 : index
    %64 = vector.load %arg4[%c7, %c0_56, %c0_57] : memref<16x32x200xbf16, #tpu.memory_space<vmem>>, vector<1x32x200xbf16>
    %65 = vector.shape_cast %64 : vector<1x32x200xbf16> to vector<32x200xbf16>
    %cst_58 = arith.constant dense<0.000000e+00> : vector<32x32xf32>
    %66 = tpu.matmul %65, %8, %cst_58 {dimension_numbers = #tpu.dot_dimension_numbers<[1], [0], [0], [1], [0, 0, 1, 1], [], []>} : vector<32x200xbf16>, vector<200x32xbf16>, vector<32x32xf32> -> vector<32x32xf32>
    %67 = arith.truncf %66 : vector<32x32xf32> to vector<32x32xbf16>
    %c7_59 = arith.constant 7 : index
    %c0_60 = arith.constant 0 : index
    %c0_61 = arith.constant 0 : index
    %68 = vector.load %arg5[%c7_59, %c0_60, %c0_61] : memref<16x32x64xbf16, #tpu.memory_space<vmem>>, vector<1x32x64xbf16>
    %69 = vector.shape_cast %68 : vector<1x32x64xbf16> to vector<32x64xbf16>
    %cst_62 = arith.constant dense<0.000000e+00> : vector<32x64xf32>
    %70 = tpu.matmul %67, %69, %cst_62 {dimension_numbers = #tpu.dot_dimension_numbers<[1], [0], [0], [1], [0, 0, 1, 1], [], []>} : vector<32x32xbf16>, vector<32x64xbf16>, vector<32x64xf32> -> vector<32x64xf32>
    %71 = arith.addf %63, %70 : vector<32x64xf32>
    %c8 = arith.constant 8 : index
    %c0_63 = arith.constant 0 : index
    %c0_64 = arith.constant 0 : index
    %72 = vector.load %arg4[%c8, %c0_63, %c0_64] : memref<16x32x200xbf16, #tpu.memory_space<vmem>>, vector<1x32x200xbf16>
    %73 = vector.shape_cast %72 : vector<1x32x200xbf16> to vector<32x200xbf16>
    %cst_65 = arith.constant dense<0.000000e+00> : vector<32x32xf32>
    %74 = tpu.matmul %73, %8, %cst_65 {dimension_numbers = #tpu.dot_dimension_numbers<[1], [0], [0], [1], [0, 0, 1, 1], [], []>} : vector<32x200xbf16>, vector<200x32xbf16>, vector<32x32xf32> -> vector<32x32xf32>
    %75 = arith.truncf %74 : vector<32x32xf32> to vector<32x32xbf16>
    %c8_66 = arith.constant 8 : index
    %c0_67 = arith.constant 0 : index
    %c0_68 = arith.constant 0 : index
    %76 = vector.load %arg5[%c8_66, %c0_67, %c0_68] : memref<16x32x64xbf16, #tpu.memory_space<vmem>>, vector<1x32x64xbf16>
    %77 = vector.shape_cast %76 : vector<1x32x64xbf16> to vector<32x64xbf16>
    %cst_69 = arith.constant dense<0.000000e+00> : vector<32x64xf32>
    %78 = tpu.matmul %75, %77, %cst_69 {dimension_numbers = #tpu.dot_dimension_numbers<[1], [0], [0], [1], [0, 0, 1, 1], [], []>} : vector<32x32xbf16>, vector<32x64xbf16>, vector<32x64xf32> -> vector<32x64xf32>
    %79 = arith.addf %71, %78 : vector<32x64xf32>
    %c9 = arith.constant 9 : index
    %c0_70 = arith.constant 0 : index
    %c0_71 = arith.constant 0 : index
    %80 = vector.load %arg4[%c9, %c0_70, %c0_71] : memref<16x32x200xbf16, #tpu.memory_space<vmem>>, vector<1x32x200xbf16>
    %81 = vector.shape_cast %80 : vector<1x32x200xbf16> to vector<32x200xbf16>
    %cst_72 = arith.constant dense<0.000000e+00> : vector<32x32xf32>
    %82 = tpu.matmul %81, %8, %cst_72 {dimension_numbers = #tpu.dot_dimension_numbers<[1], [0], [0], [1], [0, 0, 1, 1], [], []>} : vector<32x200xbf16>, vector<200x32xbf16>, vector<32x32xf32> -> vector<32x32xf32>
    %83 = arith.truncf %82 : vector<32x32xf32> to vector<32x32xbf16>
    %c9_73 = arith.constant 9 : index
    %c0_74 = arith.constant 0 : index
    %c0_75 = arith.constant 0 : index
    %84 = vector.load %arg5[%c9_73, %c0_74, %c0_75] : memref<16x32x64xbf16, #tpu.memory_space<vmem>>, vector<1x32x64xbf16>
    %85 = vector.shape_cast %84 : vector<1x32x64xbf16> to vector<32x64xbf16>
    %cst_76 = arith.constant dense<0.000000e+00> : vector<32x64xf32>
    %86 = tpu.matmul %83, %85, %cst_76 {dimension_numbers = #tpu.dot_dimension_numbers<[1], [0], [0], [1], [0, 0, 1, 1], [], []>} : vector<32x32xbf16>, vector<32x64xbf16>, vector<32x64xf32> -> vector<32x64xf32>
    %87 = arith.addf %79, %86 : vector<32x64xf32>
    %c10 = arith.constant 10 : index
    %c0_77 = arith.constant 0 : index
    %c0_78 = arith.constant 0 : index
    %88 = vector.load %arg4[%c10, %c0_77, %c0_78] : memref<16x32x200xbf16, #tpu.memory_space<vmem>>, vector<1x32x200xbf16>
    %89 = vector.shape_cast %88 : vector<1x32x200xbf16> to vector<32x200xbf16>
    %cst_79 = arith.constant dense<0.000000e+00> : vector<32x32xf32>
    %90 = tpu.matmul %89, %8, %cst_79 {dimension_numbers = #tpu.dot_dimension_numbers<[1], [0], [0], [1], [0, 0, 1, 1], [], []>} : vector<32x200xbf16>, vector<200x32xbf16>, vector<32x32xf32> -> vector<32x32xf32>
    %91 = arith.truncf %90 : vector<32x32xf32> to vector<32x32xbf16>
    %c10_80 = arith.constant 10 : index
    %c0_81 = arith.constant 0 : index
    %c0_82 = arith.constant 0 : index
    %92 = vector.load %arg5[%c10_80, %c0_81, %c0_82] : memref<16x32x64xbf16, #tpu.memory_space<vmem>>, vector<1x32x64xbf16>
    %93 = vector.shape_cast %92 : vector<1x32x64xbf16> to vector<32x64xbf16>
    %cst_83 = arith.constant dense<0.000000e+00> : vector<32x64xf32>
    %94 = tpu.matmul %91, %93, %cst_83 {dimension_numbers = #tpu.dot_dimension_numbers<[1], [0], [0], [1], [0, 0, 1, 1], [], []>} : vector<32x32xbf16>, vector<32x64xbf16>, vector<32x64xf32> -> vector<32x64xf32>
    %95 = arith.addf %87, %94 : vector<32x64xf32>
    %c11 = arith.constant 11 : index
    %c0_84 = arith.constant 0 : index
    %c0_85 = arith.constant 0 : index
    %96 = vector.load %arg4[%c11, %c0_84, %c0_85] : memref<16x32x200xbf16, #tpu.memory_space<vmem>>, vector<1x32x200xbf16>
    %97 = vector.shape_cast %96 : vector<1x32x200xbf16> to vector<32x200xbf16>
    %cst_86 = arith.constant dense<0.000000e+00> : vector<32x32xf32>
    %98 = tpu.matmul %97, %8, %cst_86 {dimension_numbers = #tpu.dot_dimension_numbers<[1], [0], [0], [1], [0, 0, 1, 1], [], []>} : vector<32x200xbf16>, vector<200x32xbf16>, vector<32x32xf32> -> vector<32x32xf32>
    %99 = arith.truncf %98 : vector<32x32xf32> to vector<32x32xbf16>
    %c11_87 = arith.constant 11 : index
    %c0_88 = arith.constant 0 : index
    %c0_89 = arith.constant 0 : index
    %100 = vector.load %arg5[%c11_87, %c0_88, %c0_89] : memref<16x32x64xbf16, #tpu.memory_space<vmem>>, vector<1x32x64xbf16>
    %101 = vector.shape_cast %100 : vector<1x32x64xbf16> to vector<32x64xbf16>
    %cst_90 = arith.constant dense<0.000000e+00> : vector<32x64xf32>
    %102 = tpu.matmul %99, %101, %cst_90 {dimension_numbers = #tpu.dot_dimension_numbers<[1], [0], [0], [1], [0, 0, 1, 1], [], []>} : vector<32x32xbf16>, vector<32x64xbf16>, vector<32x64xf32> -> vector<32x64xf32>
    %103 = arith.addf %95, %102 : vector<32x64xf32>
    %c12 = arith.constant 12 : index
    %c0_91 = arith.constant 0 : index
    %c0_92 = arith.constant 0 : index
    %104 = vector.load %arg4[%c12, %c0_91, %c0_92] : memref<16x32x200xbf16, #tpu.memory_space<vmem>>, vector<1x32x200xbf16>
    %105 = vector.shape_cast %104 : vector<1x32x200xbf16> to vector<32x200xbf16>
    %cst_93 = arith.constant dense<0.000000e+00> : vector<32x32xf32>
    %106 = tpu.matmul %105, %8, %cst_93 {dimension_numbers = #tpu.dot_dimension_numbers<[1], [0], [0], [1], [0, 0, 1, 1], [], []>} : vector<32x200xbf16>, vector<200x32xbf16>, vector<32x32xf32> -> vector<32x32xf32>
    %107 = arith.truncf %106 : vector<32x32xf32> to vector<32x32xbf16>
    %c12_94 = arith.constant 12 : index
    %c0_95 = arith.constant 0 : index
    %c0_96 = arith.constant 0 : index
    %108 = vector.load %arg5[%c12_94, %c0_95, %c0_96] : memref<16x32x64xbf16, #tpu.memory_space<vmem>>, vector<1x32x64xbf16>
    %109 = vector.shape_cast %108 : vector<1x32x64xbf16> to vector<32x64xbf16>
    %cst_97 = arith.constant dense<0.000000e+00> : vector<32x64xf32>
    %110 = tpu.matmul %107, %109, %cst_97 {dimension_numbers = #tpu.dot_dimension_numbers<[1], [0], [0], [1], [0, 0, 1, 1], [], []>} : vector<32x32xbf16>, vector<32x64xbf16>, vector<32x64xf32> -> vector<32x64xf32>
    %111 = arith.addf %103, %110 : vector<32x64xf32>
    %c13 = arith.constant 13 : index
    %c0_98 = arith.constant 0 : index
    %c0_99 = arith.constant 0 : index
    %112 = vector.load %arg4[%c13, %c0_98, %c0_99] : memref<16x32x200xbf16, #tpu.memory_space<vmem>>, vector<1x32x200xbf16>
    %113 = vector.shape_cast %112 : vector<1x32x200xbf16> to vector<32x200xbf16>
    %cst_100 = arith.constant dense<0.000000e+00> : vector<32x32xf32>
    %114 = tpu.matmul %113, %8, %cst_100 {dimension_numbers = #tpu.dot_dimension_numbers<[1], [0], [0], [1], [0, 0, 1, 1], [], []>} : vector<32x200xbf16>, vector<200x32xbf16>, vector<32x32xf32> -> vector<32x32xf32>
    %115 = arith.truncf %114 : vector<32x32xf32> to vector<32x32xbf16>
    %c13_101 = arith.constant 13 : index
    %c0_102 = arith.constant 0 : index
    %c0_103 = arith.constant 0 : index
    %116 = vector.load %arg5[%c13_101, %c0_102, %c0_103] : memref<16x32x64xbf16, #tpu.memory_space<vmem>>, vector<1x32x64xbf16>
    %117 = vector.shape_cast %116 : vector<1x32x64xbf16> to vector<32x64xbf16>
    %cst_104 = arith.constant dense<0.000000e+00> : vector<32x64xf32>
    %118 = tpu.matmul %115, %117, %cst_104 {dimension_numbers = #tpu.dot_dimension_numbers<[1], [0], [0], [1], [0, 0, 1, 1], [], []>} : vector<32x32xbf16>, vector<32x64xbf16>, vector<32x64xf32> -> vector<32x64xf32>
    %119 = arith.addf %111, %118 : vector<32x64xf32>
    %c14 = arith.constant 14 : index
    %c0_105 = arith.constant 0 : index
    %c0_106 = arith.constant 0 : index
    %120 = vector.load %arg4[%c14, %c0_105, %c0_106] : memref<16x32x200xbf16, #tpu.memory_space<vmem>>, vector<1x32x200xbf16>
    %121 = vector.shape_cast %120 : vector<1x32x200xbf16> to vector<32x200xbf16>
    %cst_107 = arith.constant dense<0.000000e+00> : vector<32x32xf32>
    %122 = tpu.matmul %121, %8, %cst_107 {dimension_numbers = #tpu.dot_dimension_numbers<[1], [0], [0], [1], [0, 0, 1, 1], [], []>} : vector<32x200xbf16>, vector<200x32xbf16>, vector<32x32xf32> -> vector<32x32xf32>
    %123 = arith.truncf %122 : vector<32x32xf32> to vector<32x32xbf16>
    %c14_108 = arith.constant 14 : index
    %c0_109 = arith.constant 0 : index
    %c0_110 = arith.constant 0 : index
    %124 = vector.load %arg5[%c14_108, %c0_109, %c0_110] : memref<16x32x64xbf16, #tpu.memory_space<vmem>>, vector<1x32x64xbf16>
    %125 = vector.shape_cast %124 : vector<1x32x64xbf16> to vector<32x64xbf16>
    %cst_111 = arith.constant dense<0.000000e+00> : vector<32x64xf32>
    %126 = tpu.matmul %123, %125, %cst_111 {dimension_numbers = #tpu.dot_dimension_numbers<[1], [0], [0], [1], [0, 0, 1, 1], [], []>} : vector<32x32xbf16>, vector<32x64xbf16>, vector<32x64xf32> -> vector<32x64xf32>
    %127 = arith.addf %119, %126 : vector<32x64xf32>
    %c15 = arith.constant 15 : index
    %c0_112 = arith.constant 0 : index
    %c0_113 = arith.constant 0 : index
    %128 = vector.load %arg4[%c15, %c0_112, %c0_113] : memref<16x32x200xbf16, #tpu.memory_space<vmem>>, vector<1x32x200xbf16>
    %129 = vector.shape_cast %128 : vector<1x32x200xbf16> to vector<32x200xbf16>
    %cst_114 = arith.constant dense<0.000000e+00> : vector<32x32xf32>
    %130 = tpu.matmul %129, %8, %cst_114 {dimension_numbers = #tpu.dot_dimension_numbers<[1], [0], [0], [1], [0, 0, 1, 1], [], []>} : vector<32x200xbf16>, vector<200x32xbf16>, vector<32x32xf32> -> vector<32x32xf32>
    %131 = arith.truncf %130 : vector<32x32xf32> to vector<32x32xbf16>
    %c15_115 = arith.constant 15 : index
    %c0_116 = arith.constant 0 : index
    %c0_117 = arith.constant 0 : index
    %132 = vector.load %arg5[%c15_115, %c0_116, %c0_117] : memref<16x32x64xbf16, #tpu.memory_space<vmem>>, vector<1x32x64xbf16>
    %133 = vector.shape_cast %132 : vector<1x32x64xbf16> to vector<32x64xbf16>
    %cst_118 = arith.constant dense<0.000000e+00> : vector<32x64xf32>
    %134 = tpu.matmul %131, %133, %cst_118 {dimension_numbers = #tpu.dot_dimension_numbers<[1], [0], [0], [1], [0, 0, 1, 1], [], []>} : vector<32x32xbf16>, vector<32x64xbf16>, vector<32x64xf32> -> vector<32x64xf32>
    %135 = arith.addf %127, %134 : vector<32x64xf32>
    %c0_119 = arith.constant 0 : index
    %c0_120 = arith.constant 0 : index
    %136 = vector.load %arg6[%c0_119, %c0_120] : memref<1x64xf32, #tpu.memory_space<vmem>>, vector<1x64xf32>
    %137 = vector.broadcast %136 : vector<1x64xf32> to vector<32x64xf32>
    %138 = arith.addf %135, %137 : vector<32x64xf32>
    %cst_121 = arith.constant 0.000000e+00 : f32
    %139 = vector.broadcast %cst_121 : f32 to vector<32x64xf32>
    %140 = arith.maximumf %138, %139 : vector<32x64xf32>
    %141 = arith.truncf %140 : vector<32x64xf32> to vector<32x64xbf16>
    %c0_122 = arith.constant 0 : index
    %c0_123 = arith.constant 0 : index
    %c0_124 = arith.constant 0 : index
    %142 = vector.load %arg7[%c0_122, %c0_123, %c0_124] : memref<9x8x32xbf16, #tpu.memory_space<vmem>>, vector<1x8x32xbf16>
    %143 = vector.shape_cast %142 : vector<1x8x32xbf16> to vector<8x32xbf16>
    %cst_125 = arith.constant dense<0.000000e+00> : vector<8x64xf32>
    %144 = tpu.matmul %143, %141, %cst_125 {dimension_numbers = #tpu.dot_dimension_numbers<[1], [0], [0], [1], [0, 0, 1, 1], [], []>} : vector<8x32xbf16>, vector<32x64xbf16>, vector<8x64xf32> -> vector<8x64xf32>
    %145 = arith.truncf %144 : vector<8x64xf32> to vector<8x64xbf16>
    %c0_126 = arith.constant 0 : index
    %c0_127 = arith.constant 0 : index
    %c0_128 = arith.constant 0 : index
    %146 = vector.load %arg8[%c0_126, %c0_127, %c0_128] : memref<9x64x64xbf16, #tpu.memory_space<vmem>>, vector<1x64x64xbf16>
    %147 = vector.shape_cast %146 : vector<1x64x64xbf16> to vector<64x64xbf16>
    %cst_129 = arith.constant dense<0.000000e+00> : vector<8x64xf32>
    %148 = tpu.matmul %145, %147, %cst_129 {dimension_numbers = #tpu.dot_dimension_numbers<[1], [0], [0], [1], [0, 0, 1, 1], [], []>} : vector<8x64xbf16>, vector<64x64xbf16>, vector<8x64xf32> -> vector<8x64xf32>
    %c1_130 = arith.constant 1 : index
    %c0_131 = arith.constant 0 : index
    %c0_132 = arith.constant 0 : index
    %149 = vector.load %arg7[%c1_130, %c0_131, %c0_132] : memref<9x8x32xbf16, #tpu.memory_space<vmem>>, vector<1x8x32xbf16>
    %150 = vector.shape_cast %149 : vector<1x8x32xbf16> to vector<8x32xbf16>
    %cst_133 = arith.constant dense<0.000000e+00> : vector<8x64xf32>
    %151 = tpu.matmul %150, %141, %cst_133 {dimension_numbers = #tpu.dot_dimension_numbers<[1], [0], [0], [1], [0, 0, 1, 1], [], []>} : vector<8x32xbf16>, vector<32x64xbf16>, vector<8x64xf32> -> vector<8x64xf32>
    %152 = arith.truncf %151 : vector<8x64xf32> to vector<8x64xbf16>
    %c1_134 = arith.constant 1 : index
    %c0_135 = arith.constant 0 : index
    %c0_136 = arith.constant 0 : index
    %153 = vector.load %arg8[%c1_134, %c0_135, %c0_136] : memref<9x64x64xbf16, #tpu.memory_space<vmem>>, vector<1x64x64xbf16>
    %154 = vector.shape_cast %153 : vector<1x64x64xbf16> to vector<64x64xbf16>
    %cst_137 = arith.constant dense<0.000000e+00> : vector<8x64xf32>
    %155 = tpu.matmul %152, %154, %cst_137 {dimension_numbers = #tpu.dot_dimension_numbers<[1], [0], [0], [1], [0, 0, 1, 1], [], []>} : vector<8x64xbf16>, vector<64x64xbf16>, vector<8x64xf32> -> vector<8x64xf32>
    %156 = arith.addf %148, %155 : vector<8x64xf32>
    %c2_138 = arith.constant 2 : index
    %c0_139 = arith.constant 0 : index
    %c0_140 = arith.constant 0 : index
    %157 = vector.load %arg7[%c2_138, %c0_139, %c0_140] : memref<9x8x32xbf16, #tpu.memory_space<vmem>>, vector<1x8x32xbf16>
    %158 = vector.shape_cast %157 : vector<1x8x32xbf16> to vector<8x32xbf16>
    %cst_141 = arith.constant dense<0.000000e+00> : vector<8x64xf32>
    %159 = tpu.matmul %158, %141, %cst_141 {dimension_numbers = #tpu.dot_dimension_numbers<[1], [0], [0], [1], [0, 0, 1, 1], [], []>} : vector<8x32xbf16>, vector<32x64xbf16>, vector<8x64xf32> -> vector<8x64xf32>
    %160 = arith.truncf %159 : vector<8x64xf32> to vector<8x64xbf16>
    %c2_142 = arith.constant 2 : index
    %c0_143 = arith.constant 0 : index
    %c0_144 = arith.constant 0 : index
    %161 = vector.load %arg8[%c2_142, %c0_143, %c0_144] : memref<9x64x64xbf16, #tpu.memory_space<vmem>>, vector<1x64x64xbf16>
    %162 = vector.shape_cast %161 : vector<1x64x64xbf16> to vector<64x64xbf16>
    %cst_145 = arith.constant dense<0.000000e+00> : vector<8x64xf32>
    %163 = tpu.matmul %160, %162, %cst_145 {dimension_numbers = #tpu.dot_dimension_numbers<[1], [0], [0], [1], [0, 0, 1, 1], [], []>} : vector<8x64xbf16>, vector<64x64xbf16>, vector<8x64xf32> -> vector<8x64xf32>
    %164 = arith.addf %156, %163 : vector<8x64xf32>
    %c3_146 = arith.constant 3 : index
    %c0_147 = arith.constant 0 : index
    %c0_148 = arith.constant 0 : index
    %165 = vector.load %arg7[%c3_146, %c0_147, %c0_148] : memref<9x8x32xbf16, #tpu.memory_space<vmem>>, vector<1x8x32xbf16>
    %166 = vector.shape_cast %165 : vector<1x8x32xbf16> to vector<8x32xbf16>
    %cst_149 = arith.constant dense<0.000000e+00> : vector<8x64xf32>
    %167 = tpu.matmul %166, %141, %cst_149 {dimension_numbers = #tpu.dot_dimension_numbers<[1], [0], [0], [1], [0, 0, 1, 1], [], []>} : vector<8x32xbf16>, vector<32x64xbf16>, vector<8x64xf32> -> vector<8x64xf32>
    %168 = arith.truncf %167 : vector<8x64xf32> to vector<8x64xbf16>
    %c3_150 = arith.constant 3 : index
    %c0_151 = arith.constant 0 : index
    %c0_152 = arith.constant 0 : index
    %169 = vector.load %arg8[%c3_150, %c0_151, %c0_152] : memref<9x64x64xbf16, #tpu.memory_space<vmem>>, vector<1x64x64xbf16>
    %170 = vector.shape_cast %169 : vector<1x64x64xbf16> to vector<64x64xbf16>
    %cst_153 = arith.constant dense<0.000000e+00> : vector<8x64xf32>
    %171 = tpu.matmul %168, %170, %cst_153 {dimension_numbers = #tpu.dot_dimension_numbers<[1], [0], [0], [1], [0, 0, 1, 1], [], []>} : vector<8x64xbf16>, vector<64x64xbf16>, vector<8x64xf32> -> vector<8x64xf32>
    %172 = arith.addf %164, %171 : vector<8x64xf32>
    %c4_154 = arith.constant 4 : index
    %c0_155 = arith.constant 0 : index
    %c0_156 = arith.constant 0 : index
    %173 = vector.load %arg7[%c4_154, %c0_155, %c0_156] : memref<9x8x32xbf16, #tpu.memory_space<vmem>>, vector<1x8x32xbf16>
    %174 = vector.shape_cast %173 : vector<1x8x32xbf16> to vector<8x32xbf16>
    %cst_157 = arith.constant dense<0.000000e+00> : vector<8x64xf32>
    %175 = tpu.matmul %174, %141, %cst_157 {dimension_numbers = #tpu.dot_dimension_numbers<[1], [0], [0], [1], [0, 0, 1, 1], [], []>} : vector<8x32xbf16>, vector<32x64xbf16>, vector<8x64xf32> -> vector<8x64xf32>
    %176 = arith.truncf %175 : vector<8x64xf32> to vector<8x64xbf16>
    %c4_158 = arith.constant 4 : index
    %c0_159 = arith.constant 0 : index
    %c0_160 = arith.constant 0 : index
    %177 = vector.load %arg8[%c4_158, %c0_159, %c0_160] : memref<9x64x64xbf16, #tpu.memory_space<vmem>>, vector<1x64x64xbf16>
    %178 = vector.shape_cast %177 : vector<1x64x64xbf16> to vector<64x64xbf16>
    %cst_161 = arith.constant dense<0.000000e+00> : vector<8x64xf32>
    %179 = tpu.matmul %176, %178, %cst_161 {dimension_numbers = #tpu.dot_dimension_numbers<[1], [0], [0], [1], [0, 0, 1, 1], [], []>} : vector<8x64xbf16>, vector<64x64xbf16>, vector<8x64xf32> -> vector<8x64xf32>
    %180 = arith.addf %172, %179 : vector<8x64xf32>
    %c5_162 = arith.constant 5 : index
    %c0_163 = arith.constant 0 : index
    %c0_164 = arith.constant 0 : index
    %181 = vector.load %arg7[%c5_162, %c0_163, %c0_164] : memref<9x8x32xbf16, #tpu.memory_space<vmem>>, vector<1x8x32xbf16>
    %182 = vector.shape_cast %181 : vector<1x8x32xbf16> to vector<8x32xbf16>
    %cst_165 = arith.constant dense<0.000000e+00> : vector<8x64xf32>
    %183 = tpu.matmul %182, %141, %cst_165 {dimension_numbers = #tpu.dot_dimension_numbers<[1], [0], [0], [1], [0, 0, 1, 1], [], []>} : vector<8x32xbf16>, vector<32x64xbf16>, vector<8x64xf32> -> vector<8x64xf32>
    %184 = arith.truncf %183 : vector<8x64xf32> to vector<8x64xbf16>
    %c5_166 = arith.constant 5 : index
    %c0_167 = arith.constant 0 : index
    %c0_168 = arith.constant 0 : index
    %185 = vector.load %arg8[%c5_166, %c0_167, %c0_168] : memref<9x64x64xbf16, #tpu.memory_space<vmem>>, vector<1x64x64xbf16>
    %186 = vector.shape_cast %185 : vector<1x64x64xbf16> to vector<64x64xbf16>
    %cst_169 = arith.constant dense<0.000000e+00> : vector<8x64xf32>
    %187 = tpu.matmul %184, %186, %cst_169 {dimension_numbers = #tpu.dot_dimension_numbers<[1], [0], [0], [1], [0, 0, 1, 1], [], []>} : vector<8x64xbf16>, vector<64x64xbf16>, vector<8x64xf32> -> vector<8x64xf32>
    %188 = arith.addf %180, %187 : vector<8x64xf32>
    %c6_170 = arith.constant 6 : index
    %c0_171 = arith.constant 0 : index
    %c0_172 = arith.constant 0 : index
    %189 = vector.load %arg7[%c6_170, %c0_171, %c0_172] : memref<9x8x32xbf16, #tpu.memory_space<vmem>>, vector<1x8x32xbf16>
    %190 = vector.shape_cast %189 : vector<1x8x32xbf16> to vector<8x32xbf16>
    %cst_173 = arith.constant dense<0.000000e+00> : vector<8x64xf32>
    %191 = tpu.matmul %190, %141, %cst_173 {dimension_numbers = #tpu.dot_dimension_numbers<[1], [0], [0], [1], [0, 0, 1, 1], [], []>} : vector<8x32xbf16>, vector<32x64xbf16>, vector<8x64xf32> -> vector<8x64xf32>
    %192 = arith.truncf %191 : vector<8x64xf32> to vector<8x64xbf16>
    %c6_174 = arith.constant 6 : index
    %c0_175 = arith.constant 0 : index
    %c0_176 = arith.constant 0 : index
    %193 = vector.load %arg8[%c6_174, %c0_175, %c0_176] : memref<9x64x64xbf16, #tpu.memory_space<vmem>>, vector<1x64x64xbf16>
    %194 = vector.shape_cast %193 : vector<1x64x64xbf16> to vector<64x64xbf16>
    %cst_177 = arith.constant dense<0.000000e+00> : vector<8x64xf32>
    %195 = tpu.matmul %192, %194, %cst_177 {dimension_numbers = #tpu.dot_dimension_numbers<[1], [0], [0], [1], [0, 0, 1, 1], [], []>} : vector<8x64xbf16>, vector<64x64xbf16>, vector<8x64xf32> -> vector<8x64xf32>
    %196 = arith.addf %188, %195 : vector<8x64xf32>
    %c7_178 = arith.constant 7 : index
    %c0_179 = arith.constant 0 : index
    %c0_180 = arith.constant 0 : index
    %197 = vector.load %arg7[%c7_178, %c0_179, %c0_180] : memref<9x8x32xbf16, #tpu.memory_space<vmem>>, vector<1x8x32xbf16>
    %198 = vector.shape_cast %197 : vector<1x8x32xbf16> to vector<8x32xbf16>
    %cst_181 = arith.constant dense<0.000000e+00> : vector<8x64xf32>
    %199 = tpu.matmul %198, %141, %cst_181 {dimension_numbers = #tpu.dot_dimension_numbers<[1], [0], [0], [1], [0, 0, 1, 1], [], []>} : vector<8x32xbf16>, vector<32x64xbf16>, vector<8x64xf32> -> vector<8x64xf32>
    %200 = arith.truncf %199 : vector<8x64xf32> to vector<8x64xbf16>
    %c7_182 = arith.constant 7 : index
    %c0_183 = arith.constant 0 : index
    %c0_184 = arith.constant 0 : index
    %201 = vector.load %arg8[%c7_182, %c0_183, %c0_184] : memref<9x64x64xbf16, #tpu.memory_space<vmem>>, vector<1x64x64xbf16>
    %202 = vector.shape_cast %201 : vector<1x64x64xbf16> to vector<64x64xbf16>
    %cst_185 = arith.constant dense<0.000000e+00> : vector<8x64xf32>
    %203 = tpu.matmul %200, %202, %cst_185 {dimension_numbers = #tpu.dot_dimension_numbers<[1], [0], [0], [1], [0, 0, 1, 1], [], []>} : vector<8x64xbf16>, vector<64x64xbf16>, vector<8x64xf32> -> vector<8x64xf32>
    %204 = arith.addf %196, %203 : vector<8x64xf32>
    %c8_186 = arith.constant 8 : index
    %c0_187 = arith.constant 0 : index
    %c0_188 = arith.constant 0 : index
    %205 = vector.load %arg7[%c8_186, %c0_187, %c0_188] : memref<9x8x32xbf16, #tpu.memory_space<vmem>>, vector<1x8x32xbf16>
    %206 = vector.shape_cast %205 : vector<1x8x32xbf16> to vector<8x32xbf16>
    %cst_189 = arith.constant dense<0.000000e+00> : vector<8x64xf32>
    %207 = tpu.matmul %206, %141, %cst_189 {dimension_numbers = #tpu.dot_dimension_numbers<[1], [0], [0], [1], [0, 0, 1, 1], [], []>} : vector<8x32xbf16>, vector<32x64xbf16>, vector<8x64xf32> -> vector<8x64xf32>
    %208 = arith.truncf %207 : vector<8x64xf32> to vector<8x64xbf16>
    %c8_190 = arith.constant 8 : index
    %c0_191 = arith.constant 0 : index
    %c0_192 = arith.constant 0 : index
    %209 = vector.load %arg8[%c8_190, %c0_191, %c0_192] : memref<9x64x64xbf16, #tpu.memory_space<vmem>>, vector<1x64x64xbf16>
    %210 = vector.shape_cast %209 : vector<1x64x64xbf16> to vector<64x64xbf16>
    %cst_193 = arith.constant dense<0.000000e+00> : vector<8x64xf32>
    %211 = tpu.matmul %208, %210, %cst_193 {dimension_numbers = #tpu.dot_dimension_numbers<[1], [0], [0], [1], [0, 0, 1, 1], [], []>} : vector<8x64xbf16>, vector<64x64xbf16>, vector<8x64xf32> -> vector<8x64xf32>
    %212 = arith.addf %204, %211 : vector<8x64xf32>
    %c0_194 = arith.constant 0 : index
    %c0_195 = arith.constant 0 : index
    %213 = vector.load %arg9[%c0_194, %c0_195] : memref<1x64xf32, #tpu.memory_space<vmem>>, vector<1x64xf32>
    %214 = vector.broadcast %213 : vector<1x64xf32> to vector<8x64xf32>
    %215 = arith.addf %212, %214 : vector<8x64xf32>
    %cst_196 = arith.constant 0.000000e+00 : f32
    %216 = vector.broadcast %cst_196 : f32 to vector<8x64xf32>
    %217 = arith.maximumf %215, %216 : vector<8x64xf32>
    %218 = arith.truncf %217 : vector<8x64xf32> to vector<8x64xbf16>
    %c0_197 = arith.constant 0 : index
    %c0_198 = arith.constant 0 : index
    %c0_199 = arith.constant 0 : index
    %219 = vector.load %arg10[%c0_197, %c0_198, %c0_199] : memref<4x2x8xbf16, #tpu.memory_space<vmem>>, vector<1x2x8xbf16>
    %220 = vector.shape_cast %219 : vector<1x2x8xbf16> to vector<2x8xbf16>
    %cst_200 = arith.constant dense<0.000000e+00> : vector<2x64xf32>
    %221 = tpu.matmul %220, %218, %cst_200 {dimension_numbers = #tpu.dot_dimension_numbers<[1], [0], [0], [1], [0, 0, 1, 1], [], []>} : vector<2x8xbf16>, vector<8x64xbf16>, vector<2x64xf32> -> vector<2x64xf32>
    %222 = arith.truncf %221 : vector<2x64xf32> to vector<2x64xbf16>
    %c0_201 = arith.constant 0 : index
    %c0_202 = arith.constant 0 : index
    %c0_203 = arith.constant 0 : index
    %223 = vector.load %arg11[%c0_201, %c0_202, %c0_203] : memref<4x64x512xbf16, #tpu.memory_space<vmem>>, vector<1x64x512xbf16>
    %224 = vector.shape_cast %223 : vector<1x64x512xbf16> to vector<64x512xbf16>
    %cst_204 = arith.constant dense<0.000000e+00> : vector<2x512xf32>
    %225 = tpu.matmul %222, %224, %cst_204 {dimension_numbers = #tpu.dot_dimension_numbers<[1], [0], [0], [1], [0, 0, 1, 1], [], []>} : vector<2x64xbf16>, vector<64x512xbf16>, vector<2x512xf32> -> vector<2x512xf32>
    %c1_205 = arith.constant 1 : index
    %c0_206 = arith.constant 0 : index
    %c0_207 = arith.constant 0 : index
    %226 = vector.load %arg10[%c1_205, %c0_206, %c0_207] : memref<4x2x8xbf16, #tpu.memory_space<vmem>>, vector<1x2x8xbf16>
    %227 = vector.shape_cast %226 : vector<1x2x8xbf16> to vector<2x8xbf16>
    %cst_208 = arith.constant dense<0.000000e+00> : vector<2x64xf32>
    %228 = tpu.matmul %227, %218, %cst_208 {dimension_numbers = #tpu.dot_dimension_numbers<[1], [0], [0], [1], [0, 0, 1, 1], [], []>} : vector<2x8xbf16>, vector<8x64xbf16>, vector<2x64xf32> -> vector<2x64xf32>
    %229 = arith.truncf %228 : vector<2x64xf32> to vector<2x64xbf16>
    %c1_209 = arith.constant 1 : index
    %c0_210 = arith.constant 0 : index
    %c0_211 = arith.constant 0 : index
    %230 = vector.load %arg11[%c1_209, %c0_210, %c0_211] : memref<4x64x512xbf16, #tpu.memory_space<vmem>>, vector<1x64x512xbf16>
    %231 = vector.shape_cast %230 : vector<1x64x512xbf16> to vector<64x512xbf16>
    %cst_212 = arith.constant dense<0.000000e+00> : vector<2x512xf32>
    %232 = tpu.matmul %229, %231, %cst_212 {dimension_numbers = #tpu.dot_dimension_numbers<[1], [0], [0], [1], [0, 0, 1, 1], [], []>} : vector<2x64xbf16>, vector<64x512xbf16>, vector<2x512xf32> -> vector<2x512xf32>
    %233 = arith.addf %225, %232 : vector<2x512xf32>
    %c2_213 = arith.constant 2 : index
    %c0_214 = arith.constant 0 : index
    %c0_215 = arith.constant 0 : index
    %234 = vector.load %arg10[%c2_213, %c0_214, %c0_215] : memref<4x2x8xbf16, #tpu.memory_space<vmem>>, vector<1x2x8xbf16>
    %235 = vector.shape_cast %234 : vector<1x2x8xbf16> to vector<2x8xbf16>
    %cst_216 = arith.constant dense<0.000000e+00> : vector<2x64xf32>
    %236 = tpu.matmul %235, %218, %cst_216 {dimension_numbers = #tpu.dot_dimension_numbers<[1], [0], [0], [1], [0, 0, 1, 1], [], []>} : vector<2x8xbf16>, vector<8x64xbf16>, vector<2x64xf32> -> vector<2x64xf32>
    %237 = arith.truncf %236 : vector<2x64xf32> to vector<2x64xbf16>
    %c2_217 = arith.constant 2 : index
    %c0_218 = arith.constant 0 : index
    %c0_219 = arith.constant 0 : index
    %238 = vector.load %arg11[%c2_217, %c0_218, %c0_219] : memref<4x64x512xbf16, #tpu.memory_space<vmem>>, vector<1x64x512xbf16>
    %239 = vector.shape_cast %238 : vector<1x64x512xbf16> to vector<64x512xbf16>
    %cst_220 = arith.constant dense<0.000000e+00> : vector<2x512xf32>
    %240 = tpu.matmul %237, %239, %cst_220 {dimension_numbers = #tpu.dot_dimension_numbers<[1], [0], [0], [1], [0, 0, 1, 1], [], []>} : vector<2x64xbf16>, vector<64x512xbf16>, vector<2x512xf32> -> vector<2x512xf32>
    %241 = arith.addf %233, %240 : vector<2x512xf32>
    %c3_221 = arith.constant 3 : index
    %c0_222 = arith.constant 0 : index
    %c0_223 = arith.constant 0 : index
    %242 = vector.load %arg10[%c3_221, %c0_222, %c0_223] : memref<4x2x8xbf16, #tpu.memory_space<vmem>>, vector<1x2x8xbf16>
    %243 = vector.shape_cast %242 : vector<1x2x8xbf16> to vector<2x8xbf16>
    %cst_224 = arith.constant dense<0.000000e+00> : vector<2x64xf32>
    %244 = tpu.matmul %243, %218, %cst_224 {dimension_numbers = #tpu.dot_dimension_numbers<[1], [0], [0], [1], [0, 0, 1, 1], [], []>} : vector<2x8xbf16>, vector<8x64xbf16>, vector<2x64xf32> -> vector<2x64xf32>
    %245 = arith.truncf %244 : vector<2x64xf32> to vector<2x64xbf16>
    %c3_225 = arith.constant 3 : index
    %c0_226 = arith.constant 0 : index
    %c0_227 = arith.constant 0 : index
    %246 = vector.load %arg11[%c3_225, %c0_226, %c0_227] : memref<4x64x512xbf16, #tpu.memory_space<vmem>>, vector<1x64x512xbf16>
    %247 = vector.shape_cast %246 : vector<1x64x512xbf16> to vector<64x512xbf16>
    %cst_228 = arith.constant dense<0.000000e+00> : vector<2x512xf32>
    %248 = tpu.matmul %245, %247, %cst_228 {dimension_numbers = #tpu.dot_dimension_numbers<[1], [0], [0], [1], [0, 0, 1, 1], [], []>} : vector<2x64xbf16>, vector<64x512xbf16>, vector<2x512xf32> -> vector<2x512xf32>
    %249 = arith.addf %241, %248 : vector<2x512xf32>
    %c0_229 = arith.constant 0 : index
    %c0_230 = arith.constant 0 : index
    %250 = vector.load %arg12[%c0_229, %c0_230] : memref<1x512xf32, #tpu.memory_space<vmem>>, vector<1x512xf32>
    %251 = vector.broadcast %250 : vector<1x512xf32> to vector<2x512xf32>
    %252 = arith.addf %249, %251 : vector<2x512xf32>
    %cst_231 = arith.constant 0.000000e+00 : f32
    %253 = vector.broadcast %cst_231 : f32 to vector<2x512xf32>
    %254 = arith.maximumf %252, %253 : vector<2x512xf32>
    %255 = arith.truncf %254 : vector<2x512xf32> to vector<2x512xbf16>
    %c0_232 = arith.constant 0 : index
    %c0_233 = arith.constant 0 : index
    %256 = vector.load %arg13[%c0_232, %c0_233] : memref<512x6xbf16, #tpu.memory_space<vmem>>, vector<512x6xbf16>
    %cst_234 = arith.constant dense<0.000000e+00> : vector<2x6xf32>
    %257 = tpu.matmul %255, %256, %cst_234 {dimension_numbers = #tpu.dot_dimension_numbers<[1], [0], [0], [1], [0, 0, 1, 1], [], []>} : vector<2x512xbf16>, vector<512x6xbf16>, vector<2x6xf32> -> vector<2x6xf32>
    %c0_235 = arith.constant 0 : index
    %c0_236 = arith.constant 0 : index
    %258 = vector.load %arg14[%c0_235, %c0_236] : memref<1x6xf32, #tpu.memory_space<vmem>>, vector<1x6xf32>
    %259 = vector.broadcast %258 : vector<1x6xf32> to vector<2x6xf32>
    %260 = arith.addf %257, %259 : vector<2x6xf32>
    %c0_237 = arith.constant 0 : index
    %c0_238 = arith.constant 0 : index
    %261 = vector.load %arg15[%c0_237, %c0_238] : memref<2x6xf32, #tpu.memory_space<vmem>>, vector<2x6xf32>
    tpu.vector_store %arg15[%c0_237, %c0_238], %260 {strides = array<i32>} : memref<2x6xf32, #tpu.memory_space<vmem>>, vector<2x6xf32>,
    return
  }
  func.func @transform_0(%arg0: i32) -> (i32, i32) {
    %c0_i32 = arith.constant 0 : i32
    %c0_i32_0 = arith.constant 0 : i32
    %c0_i32_1 = arith.constant 0 : i32
    return %c0_i32, %c0_i32_0 : i32, i32
  }
  func.func @transform_1(%arg0: i32) -> (i32, i32) {
    %c0_i32 = arith.constant 0 : i32
    %c0_i32_0 = arith.constant 0 : i32
    %c0_i32_1 = arith.constant 0 : i32
    return %c0_i32, %c0_i32_0 : i32, i32
  }
  func.func @transform_2(%arg0: i32) -> (i32, i32) {
    %c0_i32 = arith.constant 0 : i32
    %c0_i32_0 = arith.constant 0 : i32
    %c0_i32_1 = arith.constant 0 : i32
    return %c0_i32, %c0_i32_0 : i32, i32
  }
  func.func @transform_3(%arg0: i32) -> (i32, i32, i32) {
    %c0_i32 = arith.constant 0 : i32
    %c0_i32_0 = arith.constant 0 : i32
    %c0_i32_1 = arith.constant 0 : i32
    %c0_i32_2 = arith.constant 0 : i32
    return %c0_i32, %c0_i32_0, %c0_i32_1 : i32, i32, i32
  }
  func.func @transform_4(%arg0: i32) -> (i32, i32, i32) {
    %c0_i32 = arith.constant 0 : i32
    %c0_i32_0 = arith.constant 0 : i32
    %c0_i32_1 = arith.constant 0 : i32
    %c0_i32_2 = arith.constant 0 : i32
    return %c0_i32, %c0_i32_0, %c0_i32_1 : i32, i32, i32
  }
  func.func @transform_5(%arg0: i32) -> (i32, i32) {
    %c0_i32 = arith.constant 0 : i32
    %c0_i32_0 = arith.constant 0 : i32
    %c0_i32_1 = arith.constant 0 : i32
    return %c0_i32, %c0_i32_0 : i32, i32
  }
  func.func @transform_6(%arg0: i32) -> (i32, i32, i32) {
    %c0_i32 = arith.constant 0 : i32
    %c0_i32_0 = arith.constant 0 : i32
    %c0_i32_1 = arith.constant 0 : i32
    %c0_i32_2 = arith.constant 0 : i32
    return %c0_i32, %c0_i32_0, %c0_i32_1 : i32, i32, i32
  }
  func.func @transform_7(%arg0: i32) -> (i32, i32, i32) {
    %c0_i32 = arith.constant 0 : i32
    %c0_i32_0 = arith.constant 0 : i32
    %c0_i32_1 = arith.constant 0 : i32
    %c0_i32_2 = arith.constant 0 : i32
    return %c0_i32, %c0_i32_0, %c0_i32_1 : i32, i32, i32
  }
  func.func @transform_8(%arg0: i32) -> (i32, i32) {
    %c0_i32 = arith.constant 0 : i32
    %c0_i32_0 = arith.constant 0 : i32
    %c0_i32_1 = arith.constant 0 : i32
    return %c0_i32, %c0_i32_0 : i32, i32
  }
  func.func @transform_9(%arg0: i32) -> (i32, i32, i32) {
    %c0_i32 = arith.constant 0 : i32
    %c0_i32_0 = arith.constant 0 : i32
    %c0_i32_1 = arith.constant 0 : i32
    %c0_i32_2 = arith.constant 0 : i32
    return %c0_i32, %c0_i32_0, %c0_i32_1 : i32, i32, i32
  }
  func.func @transform_10(%arg0: i32) -> (i32, i32, i32) {
    %c0_i32 = arith.constant 0 : i32
    %c0_i32_0 = arith.constant 0 : i32
    %c0_i32_1 = arith.constant 0 : i32
    %c0_i32_2 = arith.constant 0 : i32
    return %c0_i32, %c0_i32_0, %c0_i32_1 : i32, i32, i32
  }
  func.func @transform_11(%arg0: i32) -> (i32, i32) {
    %c0_i32 = arith.constant 0 : i32
    %c0_i32_0 = arith.constant 0 : i32
    %c0_i32_1 = arith.constant 0 : i32
    return %c0_i32, %c0_i32_0 : i32, i32
  }
  func.func @transform_12(%arg0: i32) -> (i32, i32) {
    %c0_i32 = arith.constant 0 : i32
    %c0_i32_0 = arith.constant 0 : i32
    %c0_i32_1 = arith.constant 0 : i32
    return %c0_i32, %c0_i32_0 : i32, i32
  }
  func.func @transform_13(%arg0: i32) -> (i32, i32) {
    %c0_i32 = arith.constant 0 : i32
    %c0_i32_0 = arith.constant 0 : i32
    %c0_i32_1 = arith.constant 0 : i32
    return %c0_i32, %c0_i32_0 : i32, i32
  }
  func.func @transform_14(%arg0: i32) -> (i32, i32) {
    %c0_i32 = arith.constant 0 : i32
    %c0_i32_0 = arith.constant 0 : i32
    %c0_i32_1 = arith.constant 0 : i32
    return %c0_i32, %c0_i32_0 : i32, i32
  }
}

</mosaic_0001>

<bundles_post_ra>
// kernel: model_nn_forward.1
= control target key start
LH: loop header
LB: loop body
LE: loop exit
PB: predicated region body
PF: predicated region fallthrough
CT: control target
= control target key end

     0   :  { %s8808_s0 = inlined_call_operand.vmem [shape: bf16[200,256], index: 0, kind: input, shape index: {}]   ;;  %s8809_s1 = inlined_call_operand.vmem [shape: bf16[256,32], index: 1, kind: input, shape index: {}]   ;;  %s8810_s2 = inlined_call_operand.vmem [shape: f32[1,32], index: 2, kind: input, shape index: {}]   ;;  %s8811_s3 = inlined_call_operand.vmem [shape: bf16[16,32,200], index: 3, kind: input, shape index: {}]   ;;  %s8812_s4 = inlined_call_operand.vmem [shape: bf16[16,32,64], index: 4, kind: input, shape index: {}]   ;;  %s8813_s5 = inlined_call_operand.vmem [shape: f32[1,64], index: 5, kind: input, shape index: {}]   ;;  %s8814_s6 = inlined_call_operand.vmem [shape: bf16[9,8,32], index: 6, kind: input, shape index: {}]   ;;  %s8815_s7 = inlined_call_operand.vmem [shape: bf16[9,64,64], index: 7, kind: input, shape index: {}]   ;;  %s8816_s8 = inlined_call_operand.vmem [shape: f32[1,64], index: 8, kind: input, shape index: {}]   ;;  %s8817_s9 = inlined_call_operand.vmem [shape: bf16[4,2,8], index: 9, kind: input, shape index: {}]   ;;  %s8818_s10 = inlined_call_operand.vmem [shape: bf16[4,64,512], index: 10, kind: input, shape index: {}]   ;;  %s8819_s11 = inlined_call_operand.vmem [shape: f32[1,512], index: 11, kind: input, shape index: {}]   ;;  %s8820_s12 = inlined_call_operand.vmem [shape: bf16[512,6], index: 12, kind: input, shape index: {}]   ;;  %s8821_s13 = inlined_call_operand.vmem [shape: f32[1,6], index: 13, kind: input, shape index: {}]   ;;  %s8822_s14 = inlined_call_operand.hbm [shape: f32[2,6], index: 14, kind: output, shape index: {}]  }
   0x1   :  { %v6677_v0 = vld [vmem:[%s8809_s1 + $0x78] sm:$0xff]   ;;  %v6679_v2 = vld [vmem:[%s8809_s1 + $0x70] sm:$0xff]   ;;  %v6681_v4 = vld [vmem:[%s8809_s1 + $0x68] sm:$0xff]  }
   0x2   :  { %v6678_v1 = vld [vmem:[%s8809_s1 + $0x38] sm:$0xff]   ;;  %6059 = vmatprep.subr.bf16.mxu0 %v6677_v0  ;;  %v6680_v3 = vld [vmem:[%s8809_s1 + $0x30] sm:$0xff]   ;;  %v6682_v5 = vld [vmem:[%s8809_s1 + $0x28] sm:$0xff]  }
   0x3   :  { %6060 = vmatpush3.bf16.msra.mxu0 %v6678_v1  ;;  %v6683_v6 = vld [vmem:[%s8809_s1 + $0x60] sm:$0xff]   ;;  %v6685_v8 = vld [vmem:[%s8809_s1 + $0x58] sm:$0xff]   ;;  %v6687_v10 = vld [vmem:[%s8809_s1 + $0x50] sm:$0xff]  }
   0x4   :  { %6061 = vmatprep.subr.bf16.mxu0 %v6679_v2  ;;  %v6684_v7 = vld [vmem:[%s8809_s1 + $0x20] sm:$0xff]   ;;  %v6686_v9 = vld [vmem:[%s8809_s1 + $0x18] sm:$0xff]   ;;  %v6688_v12 = vld [vmem:[%s8809_s1 + $0x10] sm:$0xff]  }
   0x5   :  { %v6695_v11 = vld [vmem:[%s8808_s0 + $0x4] ss:$8 sps:$4 sm:$0xff]   ;;  %v6693_v17 = vld [vmem:[%s8808_s0] ss:$8 sps:$4 sm:$0xff]   ;;  %v6696_v18 = vld [vmem:[%s8808_s0 + $0x14] ss:$8 sps:$4 sm:$0xff]  }
   0x6   :  { %368 = vmatprep.mubr.bf16.mxu0 %v6695_v11  ;;  %v6689_v13 = vld [vmem:[%s8809_s1 + $0x48] sm:$0xff]   ;;  %v6691_v15 = vld [vmem:[%s8809_s1 + $0x40] sm:$0xff]   ;;  %v6698_v19 = vld [vmem:[%s8808_s0 + $0x10] ss:$8 sps:$4 sm:$0xff]  }
   0x7   :  { %6062 = vmatpush3.bf16.msra.mxu0 %v6680_v3  ;;  %v6690_v14 = vld [vmem:[%s8809_s1 + $0x8] sm:$0xff]   ;;  %v6692_v16 = vld [vmem:[%s8809_s1] sm:$0xff]   ;;  %v6702_v22 = vld [vmem:[%s8808_s0 + $0x34] ss:$8 sps:$4 sm:$0xff]  }
   0x8   :  { %6063 = vmatprep.subr.bf16.mxu0 %v6681_v4  ;;  %v6699_v20 = vld [vmem:[%s8808_s0 + $0x24] ss:$8 sps:$4 sm:$0xff]   ;;  %v6701_v21 = vld [vmem:[%s8808_s0 + $0x20] ss:$8 sps:$4 sm:$0xff]   ;;  %v6704_v23 = vld [vmem:[%s8808_s0 + $0x30] ss:$8 sps:$4 sm:$0xff]  }
   0x9   :  { %v6705_v24 = vld [vmem:[%s8808_s0 + $0x44] ss:$8 sps:$4 sm:$0xff]   ;;  %v6707_v25 = vld [vmem:[%s8808_s0 + $0x40] ss:$8 sps:$4 sm:$0xff]   ;;  %v6708_v26 = vld [vmem:[%s8808_s0 + $0x54] ss:$8 sps:$4 sm:$0xff]  }
   0xa   :  { %v6710_v27 = vld [vmem:[%s8808_s0 + $0x50] ss:$8 sps:$4 sm:$0xff]   ;;  %v6711_v28 = vld [vmem:[%s8808_s0 + $0x64] ss:$8 sps:$4 sm:$0xff]   ;;  %v6713_v29 = vld [vmem:[%s8808_s0 + $0x60] ss:$8 sps:$4 sm:$0xff]  }
   0xb   :  { %6064 = vmatpush3.bf16.msra.mxu0 %v6682_v5  ;;  %v6714_v30 = vld [vmem:[%s8808_s0 + $0x74] ss:$8 sps:$4 sm:$0xff]   ;;  %v6716_v31 = vld [vmem:[%s8808_s0 + $0x70] ss:$8 sps:$4 sm:$0xff]   ;;  %v6717_v32 = vld [vmem:[%s8808_s0 + $0x84] ss:$8 sps:$4 sm:$0xff]  }
   0xc   :  { %6065 = vmatprep.subr.bf16.mxu0 %v6683_v6  ;;  %v6719_v33 = vld [vmem:[%s8808_s0 + $0x80] ss:$8 sps:$4 sm:$0xff]   ;;  %v6720_v34 = vld [vmem:[%s8808_s0 + $0x94] ss:$8 sps:$4 sm:$0xff]   ;;  %v6722_v35 = vld [vmem:[%s8808_s0 + $0x90] ss:$8 sps:$4 sm:$0xff]  }
   0xd   :  { %v6723_v36 = vld [vmem:[%s8808_s0 + $0xa4] ss:$8 sps:$4 sm:$0xff]   ;;  %v6725_v37 = vld [vmem:[%s8808_s0 + $0xa0] ss:$8 sps:$4 sm:$0xff]   ;;  %v6726_v38 = vld [vmem:[%s8808_s0 + $0xb4] ss:$8 sps:$4 sm:$0xff]  }
   0xe   :  { %v73_v39 = vld [vmem:[%s8808_s0 + $0xc0] sm:$0xff]  ;;  %v6728_v40 = vld [vmem:[%s8808_s0 + $0xb0] ss:$8 sps:$4 sm:$0xff]  }
   0xf   :  { %6066 = vmatpush3.bf16.msra.mxu0 %v6684_v7  ;;  %v5474_v41 = vcombine.high %v73_v39, %v73_v39  ;;  %v5473_v42 = vcombine.low %v73_v39, %v73_v39 }
  0x10   :  { %6067 = vmatprep.subr.bf16.mxu0 %v6685_v8 }
  0x13   :  { %6068 = vmatpush3.bf16.msra.mxu0 %v6686_v9 }
  0x14   :  { %6069 = vmatprep.subr.bf16.mxu0 %v6687_v10 }
  0x17   :  { %6070 = vmatpush3.bf16.msra.mxu0 %v6688_v12 }
  0x18   :  { %6071 = vmatprep.subr.bf16.mxu0 %v6689_v13 }
  0x1b   :  { %6072 = vmatpush3.bf16.msra.mxu0 %v6690_v14 }
  0x1c   :  { %6073 = vmatprep.subr.bf16.mxu0 %v6691_v15 }
  0x1f   :  { %6074 = vmatpush3.bf16.msra.mxu0 %v6692_v16 }
  0x22   :  { %369 = vmatmul.mubr.bf16.vlgmr.msra.gmra.mxu0 %v6693_v17 }
  0x23   :  { %376 = vmatprep.mubr.bf16.mxu0 %v6696_v18 }
  0x2a   :  { %377 = vmatmul.mubr.bf16.gmra.mxu0 %v6698_v19 }
  0x2b   :  { %384 = vmatprep.mubr.bf16.mxu0 %v6699_v20 }
  0x32   :  { %385 = vmatmul.mubr.bf16.gmra.mxu0 %v6701_v21 }
  0x33   :  { %392 = vmatprep.mubr.bf16.mxu0 %v6702_v22 }
  0x3a   :  { %393 = vmatmul.mubr.bf16.gmra.mxu0 %v6704_v23 }
  0x3b   :  { %400 = vmatprep.mubr.bf16.mxu0 %v6705_v24 }
  0x42   :  { %401 = vmatmul.mubr.bf16.gmra.mxu0 %v6707_v25 }
  0x43   :  { %408 = vmatprep.mubr.bf16.mxu0 %v6708_v26 }
  0x4a   :  { %409 = vmatmul.mubr.bf16.gmra.mxu0 %v6710_v27 }
  0x4b   :  { %416 = vmatprep.mubr.bf16.mxu0 %v6711_v28 }
  0x52   :  { %417 = vmatmul.mubr.bf16.gmra.mxu0 %v6713_v29 }
  0x53   :  { %424 = vmatprep.mubr.bf16.mxu0 %v6714_v30 }
  0x5a   :  { %425 = vmatmul.mubr.bf16.gmra.mxu0 %v6716_v31 }
  0x5b   :  { %432 = vmatprep.mubr.bf16.mxu0 %v6717_v32 }
  0x62   :  { %433 = vmatmul.mubr.bf16.gmra.mxu0 %v6719_v33 }
  0x63   :  { %440 = vmatprep.mubr.bf16.mxu0 %v6720_v34 }
  0x6a   :  { %441 = vmatmul.mubr.bf16.gmra.mxu0 %v6722_v35 }
  0x6b   :  { %448 = vmatprep.mubr.bf16.mxu0 %v6723_v36 }
  0x72   :  { %449 = vmatmul.mubr.bf16.gmra.mxu0 %v6725_v37 }
  0x73   :  { %456 = vmatprep.mubr.bf16.mxu0 %v6726_v38 }
  0x7a   :  { %457 = vmatmul.mubr.bf16.gmra.mxu0 %v6728_v40 }
  0x7b   :  { %464 = vmatprep.mubr.bf16.mxu0 %v5474_v41 }
  0x82   :  { %465 = vmatmul.mubr.bf16.gmra.mxu0 %v5473_v42 }
  0x83   :  { %19 = vsyncpa [#allocation3], 0  ;;  %v7045_v43 = vmov 0   ;;  %v6733_v44 = vld [vmem:[%s8811_s3 + $0x4] ss:$8 sps:$4 sm:$0xff]   ;;  %vm532_vm0 = vcmask 588800  }
  0x84   :  { %543 = vmatprep.subr.bf16.mxu1 %v7045_v43  ;;  %847 = vmatprep.subr.bf16.mxu0 %v7045_v43  ;;  %v6736_v45 = vld [vmem:[%s8811_s3 + $0x44] ss:$8 sps:$4 sm:$0xff]   ;;  %v7260_v49 = vld [vmem:[%s8810_s2] ss:$0 sm:$0xff]  ;;  %vm539_vm1 = vcmask 1043456   ;;  %vm695_vm2 = vcmask 261120  }
  0x85   :  { %5495 = vmatprep.mubr.msk.bf16.mxu1 %vm532_vm0, %v6733_v44  ;;  %5527 = vmatprep.mubr.msk.bf16.mxu0 %vm532_vm0, %v6736_v45  ;;  %vm7047_vm3 = vmmov 0   ;;  %vm3151_vm4 = vcmask 523264   ;;  %vm4134_vm5 = vcmask 64512   ;;  %vm5432_vm6 = vcmask 41984  }
  0xe2   :  { %v6075_v46 = vpop.f32.mrf.mxu0 }
  0xe4   :  { %v6076_v47 = vpop.f32.mrf.mxu0 }
  0xe5   :  { %v6077_v48 = vadd.f32 %v6076_v47, %v6075_v46 }
  0xe6   :  { %v6078_v50 = vpop.f32.mrf.mxu0 }
  0xe7   :  { %v371_v52 = vadd.f32 %v6077_v48, %v7260_v49 }
  0xe8   :  { %v6079_v51 = vpop.f32.mrf.mxu0 }
  0xe9   :  { %v6080_v53 = vadd.f32 %v6079_v51, %v6078_v50  ;;  %v472_v57 = vmax.f32 %v371_v52, 0.0 }
  0xea   :  { %v6081_v54 = vpop.f32.mrf.mxu0 }
  0xeb   :  { %v374_v55 = vadd.f32 %v6080_v53, %v7260_v49 }
  0xec   :  { %v6082_v56 = vpop.f32.mrf.mxu0 }
  0xed   :  { %v473_v58 = vmax.f32 %v374_v55, 0.0  ;;  %v6083_v59 = vadd.f32 %v6082_v56, %v6081_v54 }
  0xee   :  { %v6084_v60 = vpop.f32.mrf.mxu0 }
  0xef   :  { %v7264_v61 = vpack.c.bf16 %v473_v58, %v472_v57  ;;  %v379_v63 = vadd.f32 %v6083_v59, %v7260_v49 }
  0xf0   :  { %v6085_v62 = vpop.f32.mrf.mxu0 }
  0xf1   :  { %v6086_v0 = vadd.f32 %v6085_v62, %v6084_v60  ;;  %v474_v4 = vmax.f32 %v379_v63, 0.0 }
  0xf2   :  { %v6087_v1 = vpop.f32.mrf.mxu0 }
  0xf3   :  { %v382_v2 = vadd.f32 %v6086_v0, %v7260_v49 }
  0xf4   :  { %v6088_v3 = vpop.f32.mrf.mxu0 }
  0xf5   :  { %v475_v5 = vmax.f32 %v382_v2, 0.0  ;;  %v7268_v6 = vadd.f32 %v6088_v3, %v6087_v1 }
  0xf6   :  { %v7270_v7 = vpop.f32.mrf.mxu0 }
  0xf7   :  { %v7272_v8 = vpack.c.bf16 %v475_v5, %v474_v4 }
  0xf8   :  { %v6091_v9 = vpop.f32.mrf.mxu0 }
  0xf9   :  { %v6092_v2 = vadd.f32 %v6091_v9, %v7270_v7 }
  0xfa   :  { %v6093_v10 = vpop.f32.mrf.mxu0 }
  0xfb   :  { %v390_v7 = vadd.f32 %v6092_v2, %v7260_v49 }
  0xfc   :  { %v6094_v11 = vpop.f32.mrf.mxu0 }
  0xfd   :  { %v6095_v62 = vadd.f32 %v6094_v11, %v6093_v10 }
  0xfe   :  { %v6096_v12 = vpop.f32.mrf.mxu0 }
  0xff   :  { %v395_v11 = vadd.f32 %v6095_v62, %v7260_v49 }
 0x100   :  { %v6097_v13 = vpop.f32.mrf.mxu0 }
 0x101   :  { %v6098_v56 = vadd.f32 %v6097_v13, %v6096_v12 }
 0x102   :  { %v6099_v14 = vpop.f32.mrf.mxu0 }
 0x103   :  { %v398_v3 = vadd.f32 %v6098_v56, %v7260_v49 }
 0x104   :  { %v6100_v15 = vpop.f32.mrf.mxu0 }
 0x105   :  { %v6101_v52 = vadd.f32 %v6100_v15, %v6099_v14  ;;  %v479_v9 = vmax.f32 %v398_v3, 0.0 }
 0x106   :  { %v6102_v16 = vpop.f32.mrf.mxu0 }
 0x107   :  { %v403_v63 = vadd.f32 %v6101_v52, %v7260_v49 }
 0x108   :  { %v6103_v17 = vpop.f32.mrf.mxu0 }
 0x109   :  { %v6104_v46 = vadd.f32 %v6103_v17, %v6102_v16  ;;  %v480_v12 = vmax.f32 %v403_v63, 0.0  ;;  %v387_v16 = vadd.f32 %v7268_v6, %v7260_v49  ;;  %v478_v17 = vmax.f32 %v395_v11, 0.0  ;;  %v6737_v11 = vld [vmem:[%s8811_s3 + $0x14] ss:$8 sps:$4 sm:$0xff]  }
 0x10a   :  { %v6105_v18 = vpop.f32.mrf.mxu0 }
 0x10b   :  { %v406_v57 = vadd.f32 %v6104_v46, %v7260_v49 }
 0x10c   :  { %v6106_v19 = vpop.f32.mrf.mxu0 }
 0x10d   :  { %v6107_v40 = vadd.f32 %v6106_v19, %v6105_v18  ;;  %v481_v4 = vmax.f32 %v406_v57, 0.0  ;;  %v477_v19 = vmax.f32 %v390_v7, 0.0  ;;  %v6748_v7 = vld [vmem:[%s8811_s3 + $0x50] ss:$8 sps:$4 sm:$0xff]  }
 0x10e   :  { %v6108_v20 = vpop.f32.mrf.mxu0 }
 0x10f   :  { %v411_v53 = vadd.f32 %v6107_v40, %v7260_v49  ;;  %v7318_v14 = vpack.c.bf16 %v481_v4, %v480_v12  ;;  %v6731_v4 = vld [vmem:[%s8811_s3] ss:$8 sps:$4 sm:$0xff]   ;;  %v6746_v12 = vld [vmem:[%s8811_s3 + $0x54] ss:$8 sps:$4 sm:$0xff]  }
 0x110   :  { %v6109_v21 = vpop.f32.mrf.mxu0 }
 0x111   :  { %v6110_v36 = vadd.f32 %v6109_v21, %v6108_v20  ;;  %v482_v0 = vmax.f32 %v411_v53, 0.0  ;;  %v7326_v20 = vpack.c.bf16 %v479_v9, %v478_v17  ;;  %v6742_v9 = vld [vmem:[%s8811_s3 + $0x24] ss:$8 sps:$4 sm:$0xff]   ;;  %v6749_v17 = vld [vmem:[%s8811_s3 + $0x60] ss:$8 sps:$4 sm:$0xff]  }
 0x112   :  { %v6111_v22 = vpop.f32.mrf.mxu0 }
 0x113   :  { %v414_v47 = vadd.f32 %v6110_v36, %v7260_v49 }
 0x114   :  { %v6112_v23 = vpop.f32.mrf.mxu0 }
 0x115   :  { %v6113_v32 = vadd.f32 %v6112_v23, %v6111_v22  ;;  %v483_v58 = vmax.f32 %v414_v47, 0.0  ;;  %v476_v22 = vmax.f32 %v387_v16, 0.0  ;;  %v6740_v16 = vld [vmem:[%s8811_s3 + $0x20] ss:$8 sps:$4 sm:$0xff]  }
 0x116   :  { %v6114_v24 = vpop.f32.mrf.mxu0 }
 0x117   :  { %v419_v41 = vadd.f32 %v6113_v32, %v7260_v49  ;;  %v7310_v5 = vpack.c.bf16 %v483_v58, %v482_v0  ;;  %v7332_v23 = vpack.c.bf16 %v477_v19, %v476_v22  ;;  %v6752_v19 = vld [vmem:[%s8811_s3 + $0x74] ss:$8 sps:$4 sm:$0xff]   ;;  %v6754_v22 = vld [vmem:[%s8811_s3 + $0x70] ss:$8 sps:$4 sm:$0xff]  }
 0x118   :  { %v6115_v25 = vpop.f32.mrf.mxu0 }
 0x119   :  { %v6116_v30 = vadd.f32 %v6115_v25, %v6114_v24  ;;  %v484_v54 = vmax.f32 %v419_v41, 0.0 }
 0x11a   :  { %v6117_v26 = vpop.f32.mrf.mxu0 }
 0x11b   :  { %v422_v37 = vadd.f32 %v6116_v30, %v7260_v49 }
 0x11c   :  { %v6118_v27 = vpop.f32.mrf.mxu0 }
 0x11d   :  { %v6119_v28 = vadd.f32 %v6118_v27, %v6117_v26  ;;  %v485_v48 = vmax.f32 %v422_v37, 0.0 }
 0x11e   :  { %v6120_v29 = vpop.f32.mrf.mxu0 }
 0x11f   :  { %v427_v33 = vadd.f32 %v6119_v28, %v7260_v49  ;;  %v7297_v59 = vpack.c.bf16 %v485_v48, %v484_v54 }
 0x120   :  { %v6121_v31 = vpop.f32.mrf.mxu0 }
 0x121   :  { %v6122_v34 = vadd.f32 %v6121_v31, %v6120_v29  ;;  %v486_v42 = vmax.f32 %v427_v33, 0.0 }
 0x122   :  { %v7275_v35 = vpop.f32.mrf.mxu0 }
 0x123   :  { %v430_v38 = vadd.f32 %v6122_v34, %v7260_v49 }
 0x124   :  { %v7279_v39 = vpop.f32.mrf.mxu0 }
 0x125   :  { %v487_v44 = vmax.f32 %v430_v38, 0.0 }
 0x126   :  { %v7282_v45 = vpop.f32.mrf.mxu0 }
 0x127   :  { %v7285_v50 = vpack.c.bf16 %v487_v44, %v486_v42 }
 0x128   :  { %v7287_v51 = vpop.f32.mrf.mxu0 }
 0x129   :  { %544 = vmatpush1.bf16.msra.mxu1 %v7285_v50  ;;  %848 = vmatpush1.bf16.msra.mxu0 %v7285_v50  ;;  %v6128_v56 = vadd.f32 %v7287_v51, %v7282_v45 }
 0x12a   :  { %v7292_v55 = vpop.f32.mrf.mxu0  ;;  %545 = vmatprep.subr.bf16.mxu1 %v7045_v43  ;;  %849 = vmatprep.subr.bf16.mxu0 %v7045_v43 }
 0x12b   :  { %v438_v45 = vadd.f32 %v6128_v56, %v7260_v49 }
 0x12c   :  { %v7299_v60 = vpop.f32.mrf.mxu0 }
 0x12d   :  { %546 = vmatpush1.bf16.msra.mxu1 %v7297_v59  ;;  %850 = vmatpush1.bf16.msra.mxu0 %v7297_v59  ;;  %v6131_v52 = vadd.f32 %v7299_v60, %v7292_v55  ;;  %v6125_v55 = vadd.f32 %v7279_v39, %v7275_v35  ;;  %v489_v35 = vmax.f32 %v438_v45, 0.0 }
 0x12e   :  { %v7304_v1 = vpop.f32.mrf.mxu0  ;;  %547 = vmatprep.subr.bf16.mxu1 %v7045_v43  ;;  %851 = vmatprep.subr.bf16.mxu0 %v7045_v43 }
 0x12f   :  { %v443_v60 = vadd.f32 %v6131_v52, %v7260_v49 }
 0x130   :  { %v6133_v10 = vpop.f32.mrf.mxu0 }
 0x131   :  { %548 = vmatpush1.bf16.msra.mxu1 %v7310_v5  ;;  %852 = vmatpush1.bf16.msra.mxu0 %v7310_v5  ;;  %v6134_v44 = vadd.f32 %v6133_v10, %v7304_v1  ;;  %v435_v1 = vadd.f32 %v6125_v55, %v7260_v49  ;;  %v490_v2 = vmax.f32 %v443_v60, 0.0  ;;  %v6734_v10 = vld [vmem:[%s8811_s3 + $0x40] ss:$8 sps:$4 sm:$0xff]  }
 0x132   :  { %v6135_v13 = vpop.f32.mrf.mxu0  ;;  %549 = vmatprep.subr.bf16.mxu1 %v7045_v43  ;;  %853 = vmatprep.subr.bf16.mxu0 %v7045_v43 }
 0x133   :  { %v446_v57 = vadd.f32 %v6134_v44, %v7260_v49  ;;  %v488_v3 = vmax.f32 %v435_v1, 0.0 }
 0x134   :  { %v6136_v15 = vpop.f32.mrf.mxu0 }
 0x135   :  { %550 = vmatpush1.bf16.msra.mxu1 %v7318_v14  ;;  %854 = vmatpush1.bf16.msra.mxu0 %v7318_v14  ;;  %v6137_v40 = vadd.f32 %v6136_v15, %v6135_v13  ;;  %v491_v51 = vmax.f32 %v446_v57, 0.0  ;;  %v6739_v13 = vld [vmem:[%s8811_s3 + $0x10] ss:$8 sps:$4 sm:$0xff]   ;;  %v6751_v15 = vld [vmem:[%s8811_s3 + $0x64] ss:$8 sps:$4 sm:$0xff]  }
 0x136   :  { %v6138_v18 = vpop.f32.mrf.mxu0  ;;  %551 = vmatprep.subr.bf16.mxu1 %v7045_v43  ;;  %855 = vmatprep.subr.bf16.mxu0 %v7045_v43 }
 0x137   :  { %v451_v53 = vadd.f32 %v6137_v40, %v7260_v49  ;;  %v7381_v39 = vpack.c.bf16 %v491_v51, %v490_v2 }
 0x138   :  { %v6139_v21 = vpop.f32.mrf.mxu0 }
 0x139   :  { %552 = vmatpush1.bf16.msra.mxu1 %v7326_v20  ;;  %856 = vmatpush1.bf16.msra.mxu0 %v7326_v20  ;;  %v6140_v34 = vadd.f32 %v6139_v21, %v6138_v18  ;;  %v492_v63 = vmax.f32 %v451_v53, 0.0  ;;  %v6743_v18 = vld [vmem:[%s8811_s3 + $0x34] ss:$8 sps:$4 sm:$0xff]   ;;  %v6745_v21 = vld [vmem:[%s8811_s3 + $0x30] ss:$8 sps:$4 sm:$0xff]  }
 0x13a   :  { %v6141_v6 = vpop.f32.mrf.mxu0  ;;  %553 = vmatprep.subr.bf16.mxu1 %v7045_v43  ;;  %857 = vmatprep.subr.bf16.mxu0 %v7045_v43 }
 0x13b   :  { %v454_v46 = vadd.f32 %v6140_v34, %v7260_v49 }
 0x13c   :  { %v6142_v24 = vpop.f32.mrf.mxu0 }
 0x13d   :  { %554 = vmatpush1.bf16.msra.mxu1 %v7332_v23  ;;  %858 = vmatpush1.bf16.msra.mxu0 %v7332_v23  ;;  %v6143_v31 = vadd.f32 %v6142_v24, %v6141_v6  ;;  %v493_v58 = vmax.f32 %v454_v46, 0.0  ;;  %v6755_v6 = vld [vmem:[%s8812_s4 + $0x18] sm:$0xff]   ;;  %v6756_v24 = vld [vmem:[%s8812_s4 + $0x10] sm:$0xff]  }
 0x13e   :  { %v6144_v25 = vpop.f32.mrf.mxu0  ;;  %555 = vmatprep.subr.bf16.mxu1 %v7045_v43  ;;  %859 = vmatprep.subr.bf16.mxu0 %v7045_v43 }
 0x13f   :  { %v459_v41 = vadd.f32 %v6143_v31, %v7260_v49  ;;  %v7374_v0 = vpack.c.bf16 %v493_v58, %v492_v63 }
 0x140   :  { %v6145_v26 = vpop.f32.mrf.mxu0 }
 0x141   :  { %556 = vmatpush1.bf16.msra.mxu1 %v7272_v8  ;;  %860 = vmatpush1.bf16.msra.mxu0 %v7272_v8  ;;  %v6146_v28 = vadd.f32 %v6145_v26, %v6144_v25  ;;  %v494_v54 = vmax.f32 %v459_v41, 0.0  ;;  %v6757_v25 = vld [vmem:[%s8812_s4 + $0x8] sm:$0xff]  }
 0x142   :  { %v6147_v27 = vpop.f32.mrf.mxu0  ;;  %557 = vmatprep.subr.bf16.mxu1 %v7045_v43  ;;  %861 = vmatprep.subr.bf16.mxu0 %v7045_v43 }
 0x143   :  { %v462_v36 = vadd.f32 %v6146_v28, %v7260_v49 }
 0x144   :  { %v6148_v29 = vpop.f32.mrf.mxu0 }
 0x145   :  { %v6149_v30 = vadd.f32 %v6148_v29, %v6147_v27  ;;  %558 = vmatpush1.bf16.msra.mxu1 %v7264_v61  ;;  %862 = vmatpush1.bf16.msra.mxu0 %v7264_v61  ;;  %v495_v47 = vmax.f32 %v462_v36, 0.0 }
 0x146   :  { %565 = vmatprep.subr.bf16.mxu1 %v7045_v43  ;;  %869 = vmatprep.subr.bf16.mxu0 %v7045_v43  ;;  %v6150_v32 = vpop.f32.mrf.mxu0 }
 0x147   :  { %v467_v33 = vadd.f32 %v6149_v30, %v7260_v49  ;;  %v7364_v62 = vpack.c.bf16 %v495_v47, %v494_v54  ;;  %v7387_v49 = vpack.c.bf16 %v489_v35, %v488_v3 }
 0x148   :  { %v6151_v37 = vpop.f32.mrf.mxu0 }
 0x149   :  { %v496_v38 = vmax.f32 %v467_v33, 0.0 }
 0x14b   :  { %v509_v42 = vpack.c.bf16 %v496_v38, %v496_v38 }
 0x14d   :  { %v7352_v48 = vsel %vm539_vm1, %v509_v42, 0 }
 0x14e   :  { %566 = vmatpush2.bf16.msra.mxu1 %v7352_v48  ;;  %870 = vmatpush2.bf16.msra.mxu0 %v7352_v48 }
 0x14f   :  { %567 = vmatprep.subr.bf16.mxu1 %v7045_v43  ;;  %871 = vmatprep.subr.bf16.mxu0 %v7045_v43 }
 0x152   :  { %568 = vmatpush2.bf16.msra.mxu1 %v7364_v62  ;;  %872 = vmatpush2.bf16.msra.mxu0 %v7364_v62 }
 0x153   :  { %569 = vmatprep.subr.bf16.mxu1 %v7045_v43  ;;  %873 = vmatprep.subr.bf16.mxu0 %v7045_v43 }
 0x156   :  { %570 = vmatpush2.bf16.msra.mxu1 %v7374_v0  ;;  %874 = vmatpush2.bf16.msra.mxu0 %v7374_v0 }
 0x157   :  { %571 = vmatprep.subr.bf16.mxu1 %v7045_v43  ;;  %875 = vmatprep.subr.bf16.mxu0 %v7045_v43 }
 0x15a   :  { %572 = vmatpush2.bf16.msra.mxu1 %v7381_v39  ;;  %876 = vmatpush2.bf16.msra.mxu0 %v7381_v39 }
 0x15b   :  { %573 = vmatprep.subr.bf16.mxu1 %v7045_v43  ;;  %877 = vmatprep.subr.bf16.mxu0 %v7045_v43 }
 0x15e   :  { %574 = vmatpush2.bf16.msra.mxu1 %v7387_v49  ;;  %878 = vmatpush2.bf16.msra.mxu0 %v7387_v49 }
 0x15f   :  { %627 = vmatprep.subr.bf16.mxu1 %v7045_v43  ;;  %1003 = vmatprep.subr.bf16.mxu0 %v7045_v43 }
 0x161   :  { %576 = vmatmul.mubr.bf16.vlgmr.msra.gmra.mxu1 %v6731_v4  ;;  %880 = vmatmul.mubr.bf16.vlgmr.msra.gmra.mxu0 %v6734_v10  ;;  %v6758_v10 = vld [vmem:[%s8812_s4] sm:$0xff]  }
 0x162   :  { %628 = vmatpush1.bf16.msra.mxu1 %v7285_v50  ;;  %1004 = vmatpush1.bf16.msra.mxu0 %v7285_v50 }
 0x163   :  { %629 = vmatprep.subr.bf16.mxu1 %v7045_v43  ;;  %1005 = vmatprep.subr.bf16.mxu0 %v7045_v43 }
 0x164   :  { %5496 = vmatprep.mubr.msk.bf16.mxu1 %vm532_vm0, %v6737_v11  ;;  %5528 = vmatprep.mubr.msk.bf16.mxu0 %vm532_vm0, %v6746_v12 }
 0x166   :  { %630 = vmatpush1.bf16.msra.mxu1 %v7297_v59  ;;  %1006 = vmatpush1.bf16.msra.mxu0 %v7297_v59 }
 0x167   :  { %631 = vmatprep.subr.bf16.mxu1 %v7045_v43  ;;  %1007 = vmatprep.subr.bf16.mxu0 %v7045_v43 }
 0x169   :  { %584 = vmatmul.mubr.bf16.gmra.mxu1 %v6739_v13  ;;  %888 = vmatmul.mubr.bf16.gmra.mxu0 %v6748_v7  ;;  %v6759_v7 = vld [vmem:[%s8812_s4 + $0x28] sm:$0xff]  }
 0x16a   :  { %632 = vmatpush1.bf16.msra.mxu1 %v7310_v5  ;;  %1008 = vmatpush1.bf16.msra.mxu0 %v7310_v5 }
 0x16b   :  { %633 = vmatprep.subr.bf16.mxu1 %v7045_v43  ;;  %1009 = vmatprep.subr.bf16.mxu0 %v7045_v43 }
 0x16c   :  { %5505 = vmatprep.mubr.msk.bf16.mxu1 %vm532_vm0, %v6742_v9  ;;  %5545 = vmatprep.mubr.msk.bf16.mxu0 %vm532_vm0, %v6751_v15  ;;  %v6760_v15 = vld [vmem:[%s8812_s4 + $0x20] sm:$0xff]  }
 0x16e   :  { %634 = vmatpush1.bf16.msra.mxu1 %v7318_v14  ;;  %1010 = vmatpush1.bf16.msra.mxu0 %v7318_v14 }
 0x16f   :  { %635 = vmatprep.subr.bf16.mxu1 %v7045_v43  ;;  %1011 = vmatprep.subr.bf16.mxu0 %v7045_v43 }
 0x172   :  { %636 = vmatpush1.bf16.msra.mxu1 %v7326_v20  ;;  %1012 = vmatpush1.bf16.msra.mxu0 %v7326_v20 }
 0x173   :  { %637 = vmatprep.subr.bf16.mxu1 %v7045_v43  ;;  %1013 = vmatprep.subr.bf16.mxu0 %v7045_v43 }
 0x176   :  { %638 = vmatpush1.bf16.msra.mxu1 %v7332_v23  ;;  %1014 = vmatpush1.bf16.msra.mxu0 %v7332_v23 }
 0x177   :  { %639 = vmatprep.subr.bf16.mxu1 %v7045_v43  ;;  %1015 = vmatprep.subr.bf16.mxu0 %v7045_v43 }
 0x17a   :  { %640 = vmatpush1.bf16.msra.mxu1 %v7272_v8  ;;  %1016 = vmatpush1.bf16.msra.mxu0 %v7272_v8 }
 0x17b   :  { %641 = vmatprep.subr.bf16.mxu1 %v7045_v43  ;;  %1017 = vmatprep.subr.bf16.mxu0 %v7045_v43 }
 0x17e   :  { %642 = vmatpush1.bf16.msra.mxu1 %v7264_v61  ;;  %1018 = vmatpush1.bf16.msra.mxu0 %v7264_v61 }
 0x17f   :  { %649 = vmatprep.subr.bf16.mxu1 %v7045_v43  ;;  %1025 = vmatprep.subr.bf16.mxu0 %v7045_v43 }
 0x182   :  { %650 = vmatpush2.bf16.msra.mxu1 %v7352_v48  ;;  %1026 = vmatpush2.bf16.msra.mxu0 %v7352_v48 }
 0x183   :  { %651 = vmatprep.subr.bf16.mxu1 %v7045_v43  ;;  %1027 = vmatprep.subr.bf16.mxu0 %v7045_v43 }
 0x186   :  { %652 = vmatpush2.bf16.msra.mxu1 %v7364_v62  ;;  %1028 = vmatpush2.bf16.msra.mxu0 %v7364_v62 }
 0x187   :  { %653 = vmatprep.subr.bf16.mxu1 %v7045_v43  ;;  %1029 = vmatprep.subr.bf16.mxu0 %v7045_v43 }
 0x18a   :  { %654 = vmatpush2.bf16.msra.mxu1 %v7374_v0  ;;  %1030 = vmatpush2.bf16.msra.mxu0 %v7374_v0 }
 0x18b   :  { %655 = vmatprep.subr.bf16.mxu1 %v7045_v43  ;;  %1031 = vmatprep.subr.bf16.mxu0 %v7045_v43 }
 0x18e   :  { %656 = vmatpush2.bf16.msra.mxu1 %v7381_v39  ;;  %1032 = vmatpush2.bf16.msra.mxu0 %v7381_v39 }
 0x18f   :  { %657 = vmatprep.subr.bf16.mxu1 %v7045_v43  ;;  %1033 = vmatprep.subr.bf16.mxu0 %v7045_v43 }
 0x192   :  { %658 = vmatpush2.bf16.msra.mxu1 %v7387_v49  ;;  %1034 = vmatpush2.bf16.msra.mxu0 %v7387_v49 }
 0x193   :  { %6341 = vmatprep.subr.bf16.mxu1 %v6755_v6 }
 0x195   :  { %660 = vmatmul.mubr.bf16.vlgmr.msra.gmra.mxu1 %v6740_v16  ;;  %1036 = vmatmul.mubr.bf16.vlgmr.msra.gmra.mxu0 %v6749_v17  ;;  %v6761_v16 = vld [vmem:[%s8812_s4 + $0x38] sm:$0xff]   ;;  %v6762_v17 = vld [vmem:[%s8812_s4 + $0x30] sm:$0xff]  }
 0x196   :  { %5506 = vmatprep.mubr.msk.bf16.mxu1 %vm532_vm0, %v6743_v18  ;;  %5546 = vmatprep.mubr.msk.bf16.mxu0 %vm532_vm0, %v6752_v19  ;;  %v6763_v19 = vld [vmem:[%s8811_s3 + $0x84] ss:$8 sps:$4 sm:$0xff]  }
 0x197   :  { %6342 = vmatpush3.bf16.msra.mxu1 %v6755_v6  ;;  %v6766_v6 = vld [vmem:[%s8811_s3 + $0x94] ss:$8 sps:$4 sm:$0xff]  }
 0x198   :  { %6343 = vmatprep.subr.bf16.mxu1 %v6756_v24 }
 0x19b   :  { %6344 = vmatpush3.bf16.msra.mxu1 %v6756_v24  ;;  %v6768_v24 = vld [vmem:[%s8811_s3 + $0x90] ss:$8 sps:$4 sm:$0xff]  }
 0x19c   :  { %6349 = vmatprep.subr.bf16.mxu1 %v6757_v25 }
 0x19d   :  { %668 = vmatmul.mubr.bf16.gmra.mxu1 %v6745_v21  ;;  %1044 = vmatmul.mubr.bf16.gmra.mxu0 %v6754_v22  ;;  %v6765_v22 = vld [vmem:[%s8811_s3 + $0x80] ss:$8 sps:$4 sm:$0xff]  }
 0x221   :  { %v577_v26 = vpop.f32.mrf.mxu1  ;;  %v881_v27 = vpop.f32.mrf.mxu0 }
 0x223   :  { %v579_v28 = vpop.f32.mrf.mxu1  ;;  %v883_v29 = vpop.f32.mrf.mxu0 }
 0x224   :  { %v6774_v28 = vld [vmem:[%s8811_s3 + $0xb0] ss:$8 sps:$4 sm:$0xff]   ;;  %v6775_v29 = vld [vmem:[%s8812_s4 + $0x48] sm:$0xff]  }
 0x225   :  { %v580_v30 = vpop.f32.mrf.mxu1  ;;  %v884_v31 = vpop.f32.mrf.mxu0  ;;  %6373 = vmatprep.subr.bf16.mxu0 %v6775_v29 }
 0x226   :  { %v896_v32 = vpack.c.bf16 %v884_v31, %v881_v27  ;;  %v592_v11 = vpack.c.bf16 %v580_v30, %v577_v26  ;;  %v6769_v26 = vld [vmem:[%s8811_s3 + $0xa0] ss:$8 sps:$4 sm:$0xff]   ;;  %v6772_v27 = vld [vmem:[%s8811_s3 + $0xb4] ss:$8 sps:$4 sm:$0xff]   ;;  %6374 = vmatpush3.bf16.msra.mxu0 %v6775_v29 }
 0x227   :  { %v582_v33 = vpop.f32.mrf.mxu1  ;;  %v886_v34 = vpop.f32.mrf.mxu0  ;;  %v6776_v30 = vld [vmem:[%s8812_s4 + $0x40] sm:$0xff]  }
 0x228   :  { %6375 = vmatprep.subr.bf16.mxu0 %v6776_v30  ;;  %v6777_v34 = vld [vmem:[%s8812_s4 + $0x58] sm:$0xff]   ;;  %v6781_v29 = vld [vmem:[%s8811_s3 + $0xc0] ss:$8 sps:$4 sm:$0xff]  }
 0x229   :  { %v585_v36 = vpop.f32.mrf.mxu1  ;;  %v889_v37 = vpop.f32.mrf.mxu0 }
 0x22a   :  { %6376 = vmatpush3.bf16.msra.mxu0 %v6776_v30  ;;  %v6782_v30 = vld [vmem:[%s8811_s3 + $0xd4] ss:$8 sps:$4 sm:$0xff]  }
 0x22b   :  { %v587_v38 = vpop.f32.mrf.mxu1  ;;  %v891_v40 = vpop.f32.mrf.mxu0  ;;  %6381 = vmatprep.subr.bf16.mxu0 %v6777_v34 }
 0x22d   :  { %v588_v41 = vpop.f32.mrf.mxu1  ;;  %v892_v42 = vpop.f32.mrf.mxu0 }
 0x22e   :  { %v897_v44 = vpack.c.bf16 %v892_v42, %v889_v37  ;;  %v593_v9 = vpack.c.bf16 %v588_v41, %v585_v36 }
 0x22f   :  { %v590_v46 = vpop.f32.mrf.mxu1  ;;  %v894_v47 = vpop.f32.mrf.mxu0 }
 0x255   :  { %v661_v52 = vpop.f32.mrf.mxu1  ;;  %v1037_v53 = vpop.f32.mrf.mxu0 }
 0x257   :  { %v663_v54 = vpop.f32.mrf.mxu1  ;;  %v1039_v56 = vpop.f32.mrf.mxu0 }
 0x259   :  { %v664_v57 = vpop.f32.mrf.mxu1  ;;  %v1040_v58 = vpop.f32.mrf.mxu0 }
 0x25a   :  { %v676_v55 = vpack.c.bf16 %v664_v57, %v661_v52  ;;  %v1052_v18 = vpack.c.bf16 %v1040_v58, %v1037_v53 }
 0x25b   :  { %v666_v60 = vpop.f32.mrf.mxu1  ;;  %v1042_v63 = vpop.f32.mrf.mxu0 }
 0x25c   :  { %6345 = vmatprep.mubr.msk.bf16.mxu1 %vm695_vm2, %v676_v55 }
 0x25d   :  { %v669_v45 = vpop.f32.mrf.mxu1  ;;  %v1045_v51 = vpop.f32.mrf.mxu0 }
 0x25f   :  { %v671_v1 = vpop.f32.mrf.mxu1  ;;  %v1047_v2 = vpop.f32.mrf.mxu0 }
 0x261   :  { %v672_v35 = vpop.f32.mrf.mxu1  ;;  %v1048_v3 = vpop.f32.mrf.mxu0 }
 0x262   :  { %v677_v4 = vpack.c.bf16 %v672_v35, %v669_v45  ;;  %v1053_v21 = vpack.c.bf16 %v1048_v3, %v1045_v51 }
 0x263   :  { %v674_v12 = vpop.f32.mrf.mxu1  ;;  %v1050_v13 = vpop.f32.mrf.mxu0 }
 0x264   :  { %6346 = vmatmul.mubr.msk.bf16.vlgmr.msra.gmra.mxu1 %vm695_vm2, %v677_v4 }
 0x265   :  { %6350 = vmatpush3.bf16.msra.mxu1 %v6757_v25  ;;  %6353 = vmatprep.mubr.msk.bf16.mxu1 %vm695_vm2, %v592_v11  ;;  %v6771_v25 = vld [vmem:[%s8811_s3 + $0xa4] ss:$8 sps:$4 sm:$0xff]  }
 0x266   :  { %6351 = vmatprep.subr.bf16.mxu1 %v6758_v10 }
 0x269   :  { %6352 = vmatpush3.bf16.msra.mxu1 %v6758_v10 }
 0x26a   :  { %6357 = vmatprep.subr.bf16.mxu1 %v6759_v7 }
 0x26c   :  { %6354 = vmatmul.mubr.msk.bf16.vlgmr.msra.gmra.mxu1 %vm695_vm2, %v593_v9 }
 0x26d   :  { %6358 = vmatpush3.bf16.msra.mxu1 %v6759_v7  ;;  %6361 = vmatprep.mubr.msk.bf16.mxu1 %vm695_vm2, %v896_v32 }
 0x26e   :  { %6359 = vmatprep.subr.bf16.mxu1 %v6760_v15 }
 0x271   :  { %6360 = vmatpush3.bf16.msra.mxu1 %v6760_v15  ;;  %v6778_v15 = vld [vmem:[%s8812_s4 + $0x50] sm:$0xff]  }
 0x272   :  { %6365 = vmatprep.subr.bf16.mxu1 %v6761_v16 }
 0x274   :  { %6362 = vmatmul.mubr.msk.bf16.vlgmr.msra.gmra.mxu1 %vm695_vm2, %v897_v44 }
 0x275   :  { %6366 = vmatpush3.bf16.msra.mxu1 %v6761_v16  ;;  %6369 = vmatprep.mubr.msk.bf16.mxu1 %vm695_vm2, %v1052_v18 }
 0x276   :  { %6367 = vmatprep.subr.bf16.mxu1 %v6762_v17 }
 0x279   :  { %6368 = vmatpush3.bf16.msra.mxu1 %v6762_v17 }
 0x27a   :  { %1159 = vmatprep.subr.bf16.mxu1 %v7045_v43 }
 0x27c   :  { %6370 = vmatmul.mubr.msk.bf16.vlgmr.msra.gmra.mxu1 %vm695_vm2, %v1053_v21 }
 0x27d   :  { %1160 = vmatpush1.bf16.msra.mxu1 %v7285_v50  ;;  %5563 = vmatprep.mubr.msk.bf16.mxu1 %vm532_vm0, %v6763_v19 }
 0x27e   :  { %1161 = vmatprep.subr.bf16.mxu1 %v7045_v43 }
 0x281   :  { %1162 = vmatpush1.bf16.msra.mxu1 %v7297_v59 }
 0x282   :  { %1163 = vmatprep.subr.bf16.mxu1 %v7045_v43 }
 0x285   :  { %1164 = vmatpush1.bf16.msra.mxu1 %v7310_v5 }
 0x286   :  { %1165 = vmatprep.subr.bf16.mxu1 %v7045_v43 }
 0x289   :  { %1166 = vmatpush1.bf16.msra.mxu1 %v7318_v14 }
 0x28a   :  { %1167 = vmatprep.subr.bf16.mxu1 %v7045_v43 }
 0x28d   :  { %1168 = vmatpush1.bf16.msra.mxu1 %v7326_v20 }
 0x28e   :  { %1169 = vmatprep.subr.bf16.mxu1 %v7045_v43 }
 0x291   :  { %1170 = vmatpush1.bf16.msra.mxu1 %v7332_v23 }
 0x292   :  { %1171 = vmatprep.subr.bf16.mxu1 %v7045_v43 }
 0x295   :  { %1172 = vmatpush1.bf16.msra.mxu1 %v7272_v8 }
 0x296   :  { %1173 = vmatprep.subr.bf16.mxu1 %v7045_v43 }
 0x299   :  { %1174 = vmatpush1.bf16.msra.mxu1 %v7264_v61 }
 0x29a   :  { %1181 = vmatprep.subr.bf16.mxu1 %v7045_v43 }
 0x29d   :  { %1182 = vmatpush2.bf16.msra.mxu1 %v7352_v48 }
 0x29e   :  { %1183 = vmatprep.subr.bf16.mxu1 %v7045_v43 }
 0x2a1   :  { %1184 = vmatpush2.bf16.msra.mxu1 %v7364_v62 }
 0x2a2   :  { %1185 = vmatprep.subr.bf16.mxu1 %v7045_v43 }
 0x2a5   :  { %1186 = vmatpush2.bf16.msra.mxu1 %v7374_v0 }
 0x2a6   :  { %1187 = vmatprep.subr.bf16.mxu1 %v7045_v43 }
 0x2a9   :  { %1188 = vmatpush2.bf16.msra.mxu1 %v7381_v39 }
 0x2aa   :  { %1189 = vmatprep.subr.bf16.mxu1 %v7045_v43 }
 0x2ad   :  { %1190 = vmatpush2.bf16.msra.mxu1 %v7387_v49 }
 0x2ae   :  { %1315 = vmatprep.subr.bf16.mxu1 %v7045_v43 }
 0x2b0   :  { %1192 = vmatmul.mubr.bf16.vlgmr.msra.gmra.mxu1 %v6765_v22 }
 0x2b1   :  { %1316 = vmatpush1.bf16.msra.mxu1 %v7285_v50  ;;  %5564 = vmatprep.mubr.msk.bf16.mxu1 %vm532_vm0, %v6766_v6 }
 0x2b2   :  { %1317 = vmatprep.subr.bf16.mxu1 %v7045_v43 }
 0x2b5   :  { %1318 = vmatpush1.bf16.msra.mxu1 %v7297_v59 }
 0x2b6   :  { %1319 = vmatprep.subr.bf16.mxu1 %v7045_v43 }
 0x2b8   :  { %1200 = vmatmul.mubr.bf16.gmra.mxu1 %v6768_v24 }
 0x2b9   :  { %1320 = vmatpush1.bf16.msra.mxu1 %v7310_v5  ;;  %5581 = vmatprep.mubr.msk.bf16.mxu1 %vm532_vm0, %v6771_v25 }
 0x2ba   :  { %1321 = vmatprep.subr.bf16.mxu1 %v7045_v43 }
 0x2bd   :  { %1322 = vmatpush1.bf16.msra.mxu1 %v7318_v14 }
 0x2be   :  { %1323 = vmatprep.subr.bf16.mxu1 %v7045_v43 }
 0x2c1   :  { %1324 = vmatpush1.bf16.msra.mxu1 %v7326_v20 }
 0x2c2   :  { %1325 = vmatprep.subr.bf16.mxu1 %v7045_v43 }
 0x2c5   :  { %1326 = vmatpush1.bf16.msra.mxu1 %v7332_v23 }
 0x2c6   :  { %1327 = vmatprep.subr.bf16.mxu1 %v7045_v43 }
 0x2c9   :  { %1328 = vmatpush1.bf16.msra.mxu1 %v7272_v8 }
 0x2ca   :  { %1329 = vmatprep.subr.bf16.mxu1 %v7045_v43 }
 0x2cd   :  { %1330 = vmatpush1.bf16.msra.mxu1 %v7264_v61 }
 0x2ce   :  { %1337 = vmatprep.subr.bf16.mxu1 %v7045_v43 }
 0x2d1   :  { %1338 = vmatpush2.bf16.msra.mxu1 %v7352_v48 }
 0x2d2   :  { %1339 = vmatprep.subr.bf16.mxu1 %v7045_v43 }
 0x2d5   :  { %1340 = vmatpush2.bf16.msra.mxu1 %v7364_v62 }
 0x2d6   :  { %1341 = vmatprep.subr.bf16.mxu1 %v7045_v43 }
 0x2d9   :  { %1342 = vmatpush2.bf16.msra.mxu1 %v7374_v0 }
 0x2da   :  { %1343 = vmatprep.subr.bf16.mxu1 %v7045_v43 }
 0x2dd   :  { %1344 = vmatpush2.bf16.msra.mxu1 %v7381_v39 }
 0x2de   :  { %1345 = vmatprep.subr.bf16.mxu1 %v7045_v43 }
 0x2e1   :  { %1346 = vmatpush2.bf16.msra.mxu1 %v7387_v49 }
 0x2e4   :  { %1348 = vmatmul.mubr.bf16.vlgmr.msra.gmra.mxu1 %v6769_v26  ;;  %v6779_v26 = vld [vmem:[%s8811_s3 + $0xc4] ss:$8 sps:$4 sm:$0xff]  }
 0x2e5   :  { %5582 = vmatprep.mubr.msk.bf16.mxu1 %vm532_vm0, %v6772_v27 }
 0x2ec   :  { %1356 = vmatmul.mubr.bf16.gmra.mxu1 %v6774_v28 }
 0x324   :  { %v6347_v31 = vpop.f32.mrf.mxu1 }
 0x326   :  { %v736_v32 = vpop.f32.mrf.mxu1 }
 0x328   :  { %v6348_v33 = vpop.f32.mrf.mxu1 }
 0x32a   :  { %v7612_v36 = vpop.f32.mrf.mxu1 }
 0x32c   :  { %v6355_v37 = vpop.f32.mrf.mxu1 }
 0x32d   :  { %v812_v38 = vadd.f32 %v6355_v37, %v6347_v31  ;;  %v6784_v31 = vld [vmem:[%s8811_s3 + $0xd0] ss:$8 sps:$4 sm:$0xff]  }
 0x32e   :  { %v803_v40 = vpop.f32.mrf.mxu1  ;;  %v6790_v37 = vld [vmem:[%s8811_s3 + $0xf0] ss:$8 sps:$4 sm:$0xff]  }
 0x32f   :  { %v804_v41 = vadd.f32 %v803_v40, %v736_v32  ;;  %v6787_v32 = vld [vmem:[%s8811_s3 + $0xe4] ss:$8 sps:$4 sm:$0xff]  }
 0x330   :  { %v6356_v42 = vpop.f32.mrf.mxu1  ;;  %v6792_v40 = vld [vmem:[%s8812_s4 + $0x60] sm:$0xff]  }
 0x331   :  { %v815_v44 = vadd.f32 %v6356_v42, %v6348_v33  ;;  %v6785_v33 = vld [vmem:[%s8811_s3 + $0xe0] ss:$8 sps:$4 sm:$0xff]  }
 0x332   :  { %v7614_v46 = vpop.f32.mrf.mxu1 }
 0x334   :  { %v6363_v47 = vpop.f32.mrf.mxu1 }
 0x335   :  { %v972_v52 = vadd.f32 %v6363_v47, %v812_v38  ;;  %v6791_v38 = vld [vmem:[%s8812_s4 + $0x68] sm:$0xff]  }
 0x336   :  { %v955_v53 = vpop.f32.mrf.mxu1  ;;  %6389 = vmatprep.subr.bf16.mxu1 %v6791_v38 }
 0x337   :  { %v970_v54 = vadd.f32 %v955_v53, %v804_v41  ;;  %6390 = vmatpush3.bf16.msra.mxu1 %v6791_v38  ;;  %v6807_v38 = vld [vmem:[%s8812_s4 + $0x88] sm:$0xff]  }
 0x338   :  { %v6364_v56 = vpop.f32.mrf.mxu1  ;;  %6391 = vmatprep.subr.bf16.mxu1 %v6792_v40 }
 0x339   :  { %v973_v57 = vadd.f32 %v6364_v56, %v815_v44 }
 0x33a   :  { %v7616_v58 = vpop.f32.mrf.mxu1 }
 0x33b   :  { %6392 = vmatpush3.bf16.msra.mxu1 %v6792_v40  ;;  %v6808_v40 = vld [vmem:[%s8812_s4 + $0x80] sm:$0xff]  }
 0x33c   :  { %v6371_v55 = vpop.f32.mrf.mxu1 }
 0x33d   :  { %v7618_v60 = vadd.f32 %v6371_v55, %v972_v52 }
 0x33e   :  { %v1111_v63 = vpop.f32.mrf.mxu1 }
 0x33f   :  { %v7620_v45 = vadd.f32 %v1111_v63, %v970_v54  ;;  %v6793_v54 = vld [vmem:[%s8812_s4 + $0x78] sm:$0xff]  }
 0x340   :  { %v6372_v51 = vpop.f32.mrf.mxu1  ;;  %6397 = vmatprep.subr.bf16.mxu1 %v6793_v54 }
 0x341   :  { %v7622_v1 = vadd.f32 %v6372_v51, %v973_v57 }
 0x342   :  { %v7624_v2 = vpop.f32.mrf.mxu1 }
 0x370   :  { %v1193_v35 = vpop.f32.mrf.mxu1 }
 0x372   :  { %v1195_v3 = vpop.f32.mrf.mxu1 }
 0x374   :  { %v1196_v4 = vpop.f32.mrf.mxu1 }
 0x375   :  { %v1208_v10 = vpack.c.bf16 %v1196_v4, %v1193_v35 }
 0x376   :  { %v1198_v11 = vpop.f32.mrf.mxu1 }
 0x377   :  { %6377 = vmatprep.mubr.msk.bf16.mxu0 %vm695_vm2, %v1208_v10 }
 0x378   :  { %v1201_v12 = vpop.f32.mrf.mxu1 }
 0x37a   :  { %v1203_v13 = vpop.f32.mrf.mxu1 }
 0x37c   :  { %v1204_v7 = vpop.f32.mrf.mxu1 }
 0x37d   :  { %v1209_v9 = vpack.c.bf16 %v1204_v7, %v1201_v12 }
 0x37e   :  { %v1206_v16 = vpop.f32.mrf.mxu1 }
 0x37f   :  { %6378 = vmatmul.mubr.msk.bf16.vlgmr.msra.gmra.mxu0 %vm695_vm2, %v1209_v9 }
 0x380   :  { %6382 = vmatpush3.bf16.msra.mxu0 %v6777_v34  ;;  %v6788_v34 = vld [vmem:[%s8811_s3 + $0xf4] ss:$8 sps:$4 sm:$0xff]  }
 0x381   :  { %6383 = vmatprep.subr.bf16.mxu0 %v6778_v15 }
 0x384   :  { %6384 = vmatpush3.bf16.msra.mxu0 %v6778_v15  ;;  %v6794_v15 = vld [vmem:[%s8812_s4 + $0x70] sm:$0xff]  }
 0x385   :  { %1471 = vmatprep.subr.bf16.mxu0 %v7045_v43 }
 0x3a4   :  { %v1349_v17 = vpop.f32.mrf.mxu1 }
 0x3a6   :  { %v1351_v18 = vpop.f32.mrf.mxu1 }
 0x3a8   :  { %v1352_v19 = vpop.f32.mrf.mxu1 }
 0x3a9   :  { %v1364_v21 = vpack.c.bf16 %v1352_v19, %v1349_v17 }
 0x3aa   :  { %v1354_v22 = vpop.f32.mrf.mxu1 }
 0x3ab   :  { %6385 = vmatprep.mubr.msk.bf16.mxu0 %vm695_vm2, %v1364_v21 }
 0x3ac   :  { %v1357_v6 = vpop.f32.mrf.mxu1 }
 0x3ae   :  { %v1359_v24 = vpop.f32.mrf.mxu1 }
 0x3b0   :  { %v1360_v25 = vpop.f32.mrf.mxu1 }
 0x3b1   :  { %v1365_v27 = vpack.c.bf16 %v1360_v25, %v1357_v6 }
 0x3b2   :  { %v1362_v28 = vpop.f32.mrf.mxu1 }
 0x3b3   :  { %6386 = vmatmul.mubr.msk.bf16.vlgmr.msra.gmra.mxu0 %vm695_vm2, %v1365_v27 }
 0x3b4   :  { %1472 = vmatpush1.bf16.msra.mxu0 %v7285_v50  ;;  %5599 = vmatprep.mubr.msk.bf16.mxu0 %vm532_vm0, %v6779_v26  ;;  %v6795_v26 = vld [vmem:[%s8811_s3 + $0x104] ss:$8 sps:$4 sm:$0xff]  }
 0x3b5   :  { %1473 = vmatprep.subr.bf16.mxu0 %v7045_v43 }
 0x3b8   :  { %1474 = vmatpush1.bf16.msra.mxu0 %v7297_v59 }
 0x3b9   :  { %1475 = vmatprep.subr.bf16.mxu0 %v7045_v43 }
 0x3bc   :  { %1476 = vmatpush1.bf16.msra.mxu0 %v7310_v5 }
 0x3bd   :  { %1477 = vmatprep.subr.bf16.mxu0 %v7045_v43 }
 0x3c0   :  { %1478 = vmatpush1.bf16.msra.mxu0 %v7318_v14 }
 0x3c1   :  { %1479 = vmatprep.subr.bf16.mxu0 %v7045_v43 }
 0x3c4   :  { %1480 = vmatpush1.bf16.msra.mxu0 %v7326_v20 }
 0x3c5   :  { %1481 = vmatprep.subr.bf16.mxu0 %v7045_v43 }
 0x3c8   :  { %1482 = vmatpush1.bf16.msra.mxu0 %v7332_v23 }
 0x3c9   :  { %1483 = vmatprep.subr.bf16.mxu0 %v7045_v43 }
 0x3cc   :  { %1484 = vmatpush1.bf16.msra.mxu0 %v7272_v8 }
 0x3cd   :  { %1485 = vmatprep.subr.bf16.mxu0 %v7045_v43 }
 0x3d0   :  { %1486 = vmatpush1.bf16.msra.mxu0 %v7264_v61 }
 0x3d1   :  { %1493 = vmatprep.subr.bf16.mxu0 %v7045_v43 }
 0x3d4   :  { %1494 = vmatpush2.bf16.msra.mxu0 %v7352_v48 }
 0x3d5   :  { %1495 = vmatprep.subr.bf16.mxu0 %v7045_v43 }
 0x3d8   :  { %1496 = vmatpush2.bf16.msra.mxu0 %v7364_v62 }
 0x3d9   :  { %1497 = vmatprep.subr.bf16.mxu0 %v7045_v43 }
 0x3dc   :  { %1498 = vmatpush2.bf16.msra.mxu0 %v7374_v0 }
 0x3dd   :  { %1499 = vmatprep.subr.bf16.mxu0 %v7045_v43 }
 0x3e0   :  { %1500 = vmatpush2.bf16.msra.mxu0 %v7381_v39 }
 0x3e1   :  { %1501 = vmatprep.subr.bf16.mxu0 %v7045_v43 }
 0x3e4   :  { %1502 = vmatpush2.bf16.msra.mxu0 %v7387_v49 }
 0x3e5   :  { %1627 = vmatprep.subr.bf16.mxu0 %v7045_v43 }
 0x3e7   :  { %1504 = vmatmul.mubr.bf16.vlgmr.msra.gmra.mxu0 %v6781_v29  ;;  %v6797_v29 = vld [vmem:[%s8811_s3 + $0x100] ss:$8 sps:$4 sm:$0xff]  }
 0x3e8   :  { %1628 = vmatpush1.bf16.msra.mxu0 %v7285_v50  ;;  %5600 = vmatprep.mubr.msk.bf16.mxu0 %vm532_vm0, %v6782_v30  ;;  %v6798_v30 = vld [vmem:[%s8811_s3 + $0x114] ss:$8 sps:$4 sm:$0xff]  }
 0x3e9   :  { %1629 = vmatprep.subr.bf16.mxu0 %v7045_v43 }
 0x3ec   :  { %1630 = vmatpush1.bf16.msra.mxu0 %v7297_v59 }
 0x3ed   :  { %1631 = vmatprep.subr.bf16.mxu0 %v7045_v43 }
 0x3ef   :  { %1512 = vmatmul.mubr.bf16.gmra.mxu0 %v6784_v31  ;;  %v6800_v31 = vld [vmem:[%s8811_s3 + $0x110] ss:$8 sps:$4 sm:$0xff]  }
 0x3f0   :  { %1632 = vmatpush1.bf16.msra.mxu0 %v7310_v5  ;;  %5617 = vmatprep.mubr.msk.bf16.mxu0 %vm532_vm0, %v6787_v32  ;;  %v6803_v32 = vld [vmem:[%s8811_s3 + $0x124] ss:$8 sps:$4 sm:$0xff]  }
 0x3f1   :  { %1633 = vmatprep.subr.bf16.mxu0 %v7045_v43 }
 0x3f4   :  { %1634 = vmatpush1.bf16.msra.mxu0 %v7318_v14 }
 0x3f5   :  { %1635 = vmatprep.subr.bf16.mxu0 %v7045_v43 }
 0x3f8   :  { %1636 = vmatpush1.bf16.msra.mxu0 %v7326_v20 }
 0x3f9   :  { %1637 = vmatprep.subr.bf16.mxu0 %v7045_v43 }
 0x3fc   :  { %1638 = vmatpush1.bf16.msra.mxu0 %v7332_v23 }
 0x3fd   :  { %1639 = vmatprep.subr.bf16.mxu0 %v7045_v43 }
 0x400   :  { %1640 = vmatpush1.bf16.msra.mxu0 %v7272_v8 }
 0x401   :  { %1641 = vmatprep.subr.bf16.mxu0 %v7045_v43 }
 0x404   :  { %1642 = vmatpush1.bf16.msra.mxu0 %v7264_v61 }
 0x405   :  { %1649 = vmatprep.subr.bf16.mxu0 %v7045_v43 }
 0x408   :  { %1650 = vmatpush2.bf16.msra.mxu0 %v7352_v48 }
 0x409   :  { %1651 = vmatprep.subr.bf16.mxu0 %v7045_v43 }
 0x40c   :  { %1652 = vmatpush2.bf16.msra.mxu0 %v7364_v62 }
 0x40d   :  { %1653 = vmatprep.subr.bf16.mxu0 %v7045_v43 }
 0x410   :  { %1654 = vmatpush2.bf16.msra.mxu0 %v7374_v0 }
 0x411   :  { %1655 = vmatprep.subr.bf16.mxu0 %v7045_v43 }
 0x414   :  { %1656 = vmatpush2.bf16.msra.mxu0 %v7381_v39 }
 0x415   :  { %1657 = vmatprep.subr.bf16.mxu0 %v7045_v43 }
 0x418   :  { %1658 = vmatpush2.bf16.msra.mxu0 %v7387_v49 }
 0x419   :  { %6405 = vmatprep.subr.bf16.mxu0 %v6807_v38 }
 0x41b   :  { %1660 = vmatmul.mubr.bf16.vlgmr.msra.gmra.mxu0 %v6785_v33  ;;  %v6801_v33 = vld [vmem:[%s8811_s3 + $0x120] ss:$8 sps:$4 sm:$0xff]  }
 0x41c   :  { %5618 = vmatprep.mubr.msk.bf16.mxu0 %vm532_vm0, %v6788_v34  ;;  %v6804_v34 = vld [vmem:[%s8811_s3 + $0x134] ss:$8 sps:$4 sm:$0xff]   ;;  %6406 = vmatpush3.bf16.msra.mxu0 %v6807_v38 }
 0x41d   :  { %6407 = vmatprep.subr.bf16.mxu0 %v6808_v40  ;;  %v6820_v38 = vld [vmem:[%s8811_s3 + $0x174] ss:$8 sps:$4 sm:$0xff]  }
 0x420   :  { %6408 = vmatpush3.bf16.msra.mxu0 %v6808_v40  ;;  %v6822_v40 = vld [vmem:[%s8811_s3 + $0x170] ss:$8 sps:$4 sm:$0xff]  }
 0x423   :  { %1668 = vmatmul.mubr.bf16.gmra.mxu0 %v6790_v37  ;;  %v6806_v37 = vld [vmem:[%s8811_s3 + $0x130] ss:$8 sps:$4 sm:$0xff]  }
 0x43f   :  { %v6379_v41 = vpop.f32.mrf.mxu0 }
 0x440   :  { %v1284_v42 = vadd.f32 %v6379_v41, %v7618_v60 }
 0x441   :  { %v1267_v44 = vpop.f32.mrf.mxu0 }
 0x442   :  { %v1282_v47 = vadd.f32 %v1267_v44, %v7620_v45 }
 0x443   :  { %v6380_v52 = vpop.f32.mrf.mxu0 }
 0x444   :  { %v1285_v53 = vadd.f32 %v6380_v52, %v7622_v1 }
 0x445   :  { %v7725_v56 = vpop.f32.mrf.mxu0 }
 0x473   :  { %v6387_v57 = vpop.f32.mrf.mxu0 }
 0x474   :  { %v7727_v55 = vadd.f32 %v6387_v57, %v1284_v42 }
 0x475   :  { %v1423_v63 = vpop.f32.mrf.mxu0 }
 0x476   :  { %v7729_v51 = vadd.f32 %v1423_v63, %v1282_v47 }
 0x477   :  { %v6388_v60 = vpop.f32.mrf.mxu0 }
 0x478   :  { %v7731_v35 = vadd.f32 %v6388_v60, %v1285_v53 }
 0x479   :  { %v7733_v45 = vpop.f32.mrf.mxu0 }
 0x4a7   :  { %v1505_v3 = vpop.f32.mrf.mxu0 }
 0x4a9   :  { %v1507_v1 = vpop.f32.mrf.mxu0 }
 0x4ab   :  { %v1508_v4 = vpop.f32.mrf.mxu0 }
 0x4ac   :  { %v1520_v10 = vpack.c.bf16 %v1508_v4, %v1505_v3 }
 0x4ad   :  { %v1510_v11 = vpop.f32.mrf.mxu0 }
 0x4ae   :  { %6393 = vmatprep.mubr.msk.bf16.mxu1 %vm695_vm2, %v1520_v10 }
 0x4af   :  { %v1513_v12 = vpop.f32.mrf.mxu0 }
 0x4b1   :  { %v1515_v13 = vpop.f32.mrf.mxu0 }
 0x4b3   :  { %v1516_v7 = vpop.f32.mrf.mxu0 }
 0x4b4   :  { %v1521_v9 = vpack.c.bf16 %v1516_v7, %v1513_v12 }
 0x4b5   :  { %v1518_v16 = vpop.f32.mrf.mxu0 }
 0x4b6   :  { %6394 = vmatmul.mubr.msk.bf16.vlgmr.msra.gmra.mxu1 %vm695_vm2, %v1521_v9 }
 0x4b7   :  { %6398 = vmatpush3.bf16.msra.mxu1 %v6793_v54  ;;  %v6809_v54 = vld [vmem:[%s8812_s4 + $0x98] sm:$0xff]  }
 0x4b8   :  { %6399 = vmatprep.subr.bf16.mxu1 %v6794_v15  ;;  %6413 = vmatprep.subr.bf16.mxu0 %v6809_v54 }
 0x4bb   :  { %6400 = vmatpush3.bf16.msra.mxu1 %v6794_v15 }
 0x4bc   :  { %1783 = vmatprep.subr.bf16.mxu1 %v7045_v43 }
 0x4db   :  { %v1661_v17 = vpop.f32.mrf.mxu0 }
 0x4dd   :  { %v1663_v18 = vpop.f32.mrf.mxu0 }
 0x4df   :  { %v1664_v19 = vpop.f32.mrf.mxu0 }
 0x4e0   :  { %v1676_v21 = vpack.c.bf16 %v1664_v19, %v1661_v17  ;;  %v6810_v17 = vld [vmem:[%s8812_s4 + $0x90] sm:$0xff]  }
 0x4e1   :  { %v1666_v22 = vpop.f32.mrf.mxu0 }
 0x4e2   :  { %6401 = vmatprep.mubr.msk.bf16.mxu1 %vm695_vm2, %v1676_v21 }
 0x4e3   :  { %v1669_v6 = vpop.f32.mrf.mxu0 }
 0x4e5   :  { %v1671_v24 = vpop.f32.mrf.mxu0 }
 0x4e7   :  { %v1672_v25 = vpop.f32.mrf.mxu0 }
 0x4e8   :  { %v1677_v27 = vpack.c.bf16 %v1672_v25, %v1669_v6 }
 0x4e9   :  { %v1674_v28 = vpop.f32.mrf.mxu0 }
 0x4ea   :  { %6402 = vmatmul.mubr.msk.bf16.vlgmr.msra.gmra.mxu1 %vm695_vm2, %v1677_v27  ;;  %v6811_v28 = vld [vmem:[%s8811_s3 + $0x144] ss:$8 sps:$4 sm:$0xff]  }
 0x4eb   :  { %1784 = vmatpush1.bf16.msra.mxu1 %v7285_v50  ;;  %5635 = vmatprep.mubr.msk.bf16.mxu1 %vm532_vm0, %v6795_v26 }
 0x4ec   :  { %1785 = vmatprep.subr.bf16.mxu1 %v7045_v43 }
 0x4ef   :  { %1786 = vmatpush1.bf16.msra.mxu1 %v7297_v59 }
 0x4f0   :  { %1787 = vmatprep.subr.bf16.mxu1 %v7045_v43 }
 0x4f3   :  { %1788 = vmatpush1.bf16.msra.mxu1 %v7310_v5 }
 0x4f4   :  { %1789 = vmatprep.subr.bf16.mxu1 %v7045_v43 }
 0x4f7   :  { %1790 = vmatpush1.bf16.msra.mxu1 %v7318_v14 }
 0x4f8   :  { %1791 = vmatprep.subr.bf16.mxu1 %v7045_v43 }
 0x4fb   :  { %1792 = vmatpush1.bf16.msra.mxu1 %v7326_v20 }
 0x4fc   :  { %1793 = vmatprep.subr.bf16.mxu1 %v7045_v43 }
 0x4ff   :  { %1794 = vmatpush1.bf16.msra.mxu1 %v7332_v23 }
 0x500   :  { %1795 = vmatprep.subr.bf16.mxu1 %v7045_v43 }
 0x503   :  { %1796 = vmatpush1.bf16.msra.mxu1 %v7272_v8 }
 0x504   :  { %1797 = vmatprep.subr.bf16.mxu1 %v7045_v43 }
 0x507   :  { %1798 = vmatpush1.bf16.msra.mxu1 %v7264_v61 }
 0x508   :  { %1805 = vmatprep.subr.bf16.mxu1 %v7045_v43 }
 0x50b   :  { %1806 = vmatpush2.bf16.msra.mxu1 %v7352_v48 }
 0x50c   :  { %1807 = vmatprep.subr.bf16.mxu1 %v7045_v43 }
 0x50f   :  { %1808 = vmatpush2.bf16.msra.mxu1 %v7364_v62 }
 0x510   :  { %1809 = vmatprep.subr.bf16.mxu1 %v7045_v43 }
 0x513   :  { %1810 = vmatpush2.bf16.msra.mxu1 %v7374_v0 }
 0x514   :  { %1811 = vmatprep.subr.bf16.mxu1 %v7045_v43 }
 0x517   :  { %1812 = vmatpush2.bf16.msra.mxu1 %v7381_v39 }
 0x518   :  { %1813 = vmatprep.subr.bf16.mxu1 %v7045_v43 }
 0x51b   :  { %1814 = vmatpush2.bf16.msra.mxu1 %v7387_v49 }
 0x51c   :  { %1939 = vmatprep.subr.bf16.mxu1 %v7045_v43 }
 0x51e   :  { %1816 = vmatmul.mubr.bf16.vlgmr.msra.gmra.mxu1 %v6797_v29 }
 0x51f   :  { %1940 = vmatpush1.bf16.msra.mxu1 %v7285_v50  ;;  %5636 = vmatprep.mubr.msk.bf16.mxu1 %vm532_vm0, %v6798_v30 }
 0x520   :  { %1941 = vmatprep.subr.bf16.mxu1 %v7045_v43 }
 0x523   :  { %1942 = vmatpush1.bf16.msra.mxu1 %v7297_v59 }
 0x524   :  { %1943 = vmatprep.subr.bf16.mxu1 %v7045_v43 }
 0x526   :  { %1824 = vmatmul.mubr.bf16.gmra.mxu1 %v6800_v31  ;;  %v6813_v31 = vld [vmem:[%s8811_s3 + $0x140] ss:$8 sps:$4 sm:$0xff]  }
 0x527   :  { %1944 = vmatpush1.bf16.msra.mxu1 %v7310_v5  ;;  %5653 = vmatprep.mubr.msk.bf16.mxu1 %vm532_vm0, %v6803_v32  ;;  %v6814_v32 = vld [vmem:[%s8811_s3 + $0x154] ss:$8 sps:$4 sm:$0xff]  }
 0x528   :  { %1945 = vmatprep.subr.bf16.mxu1 %v7045_v43 }
 0x52b   :  { %1946 = vmatpush1.bf16.msra.mxu1 %v7318_v14 }
 0x52c   :  { %1947 = vmatprep.subr.bf16.mxu1 %v7045_v43 }
 0x52f   :  { %1948 = vmatpush1.bf16.msra.mxu1 %v7326_v20 }
 0x530   :  { %1949 = vmatprep.subr.bf16.mxu1 %v7045_v43 }
 0x533   :  { %1950 = vmatpush1.bf16.msra.mxu1 %v7332_v23 }
 0x534   :  { %1951 = vmatprep.subr.bf16.mxu1 %v7045_v43 }
 0x537   :  { %1952 = vmatpush1.bf16.msra.mxu1 %v7272_v8 }
 0x538   :  { %1953 = vmatprep.subr.bf16.mxu1 %v7045_v43 }
 0x53b   :  { %1954 = vmatpush1.bf16.msra.mxu1 %v7264_v61 }
 0x53c   :  { %1961 = vmatprep.subr.bf16.mxu1 %v7045_v43 }
 0x53f   :  { %1962 = vmatpush2.bf16.msra.mxu1 %v7352_v48 }
 0x540   :  { %1963 = vmatprep.subr.bf16.mxu1 %v7045_v43 }
 0x543   :  { %1964 = vmatpush2.bf16.msra.mxu1 %v7364_v62 }
 0x544   :  { %1965 = vmatprep.subr.bf16.mxu1 %v7045_v43 }
 0x547   :  { %1966 = vmatpush2.bf16.msra.mxu1 %v7374_v0 }
 0x548   :  { %1967 = vmatprep.subr.bf16.mxu1 %v7045_v43 }
 0x54b   :  { %1968 = vmatpush2.bf16.msra.mxu1 %v7381_v39 }
 0x54c   :  { %1969 = vmatprep.subr.bf16.mxu1 %v7045_v43 }
 0x54f   :  { %1970 = vmatpush2.bf16.msra.mxu1 %v7387_v49 }
 0x552   :  { %1972 = vmatmul.mubr.bf16.vlgmr.msra.gmra.mxu1 %v6801_v33  ;;  %v6816_v33 = vld [vmem:[%s8811_s3 + $0x150] ss:$8 sps:$4 sm:$0xff]  }
 0x553   :  { %5654 = vmatprep.mubr.msk.bf16.mxu1 %vm532_vm0, %v6804_v34  ;;  %v6819_v34 = vld [vmem:[%s8811_s3 + $0x164] ss:$8 sps:$4 sm:$0xff]  }
 0x55a   :  { %1980 = vmatmul.mubr.bf16.gmra.mxu1 %v6806_v37  ;;  %v6817_v37 = vld [vmem:[%s8811_s3 + $0x160] ss:$8 sps:$4 sm:$0xff]  }
 0x576   :  { %v6395_v41 = vpop.f32.mrf.mxu1 }
 0x577   :  { %v1596_v42 = vadd.f32 %v6395_v41, %v7727_v55  ;;  %v6823_v41 = vld [vmem:[%s8812_s4 + $0xa8] sm:$0xff]  }
 0x578   :  { %v1579_v44 = vpop.f32.mrf.mxu1  ;;  %6421 = vmatprep.subr.bf16.mxu1 %v6823_v41 }
 0x579   :  { %v1594_v47 = vadd.f32 %v1579_v44, %v7729_v51  ;;  %6422 = vmatpush3.bf16.msra.mxu1 %v6823_v41  ;;  %v6832_v41 = vld [vmem:[%s8811_s3 + $0x190] ss:$8 sps:$4 sm:$0xff]  }
 0x57a   :  { %v6396_v52 = vpop.f32.mrf.mxu1 }
 0x57b   :  { %v1597_v53 = vadd.f32 %v6396_v52, %v7731_v35 }
 0x57c   :  { %v7834_v57 = vpop.f32.mrf.mxu1 }
 0x5aa   :  { %v6403_v63 = vpop.f32.mrf.mxu1 }
 0x5ab   :  { %v7836_v60 = vadd.f32 %v6403_v63, %v1596_v42  ;;  %v6824_v42 = vld [vmem:[%s8812_s4 + $0xa0] sm:$0xff]  }
 0x5ac   :  { %v1735_v3 = vpop.f32.mrf.mxu1  ;;  %6423 = vmatprep.subr.bf16.mxu1 %v6824_v42 }
 0x5ad   :  { %v7838_v1 = vadd.f32 %v1735_v3, %v1594_v47  ;;  %6424 = vmatpush3.bf16.msra.mxu1 %v6824_v42  ;;  %v6825_v3 = vld [vmem:[%s8812_s4 + $0xb8] sm:$0xff]   ;;  %v6835_v42 = vld [vmem:[%s8811_s3 + $0x1a4] ss:$8 sps:$4 sm:$0xff]  }
 0x5ae   :  { %v6404_v55 = vpop.f32.mrf.mxu1  ;;  %6429 = vmatprep.subr.bf16.mxu1 %v6825_v3 }
 0x5af   :  { %v7840_v4 = vadd.f32 %v6404_v55, %v1597_v53  ;;  %v807_v55 = vadd.f32 %v7614_v46, %v7612_v36 }
 0x5b0   :  { %v7842_v51 = vpop.f32.mrf.mxu1 }
 0x5de   :  { %v1817_v10 = vpop.f32.mrf.mxu1 }
 0x5e0   :  { %v1819_v35 = vpop.f32.mrf.mxu1 }
 0x5e2   :  { %v1820_v11 = vpop.f32.mrf.mxu1 }
 0x5e3   :  { %v1832_v12 = vpack.c.bf16 %v1820_v11, %v1817_v10  ;;  %v971_v10 = vadd.f32 %v7616_v58, %v807_v55 }
 0x5e4   :  { %v1822_v13 = vpop.f32.mrf.mxu1 }
 0x5e5   :  { %6409 = vmatprep.mubr.msk.bf16.mxu0 %vm695_vm2, %v1832_v12  ;;  %v1127_v35 = vadd.f32 %v7624_v2, %v971_v10 }
 0x5e6   :  { %v1825_v7 = vpop.f32.mrf.mxu1 }
 0x5e8   :  { %v1827_v9 = vpop.f32.mrf.mxu1 }
 0x5ea   :  { %v1828_v15 = vpop.f32.mrf.mxu1 }
 0x5eb   :  { %v1833_v16 = vpack.c.bf16 %v1828_v15, %v1825_v7 }
 0x5ec   :  { %v1830_v18 = vpop.f32.mrf.mxu1 }
 0x5ed   :  { %6410 = vmatmul.mubr.msk.bf16.vlgmr.msra.gmra.mxu0 %vm695_vm2, %v1833_v16 }
 0x5ee   :  { %6414 = vmatpush3.bf16.msra.mxu0 %v6809_v54 }
 0x5ef   :  { %6415 = vmatprep.subr.bf16.mxu0 %v6810_v17 }
 0x5f2   :  { %6416 = vmatpush3.bf16.msra.mxu0 %v6810_v17 }
 0x5f3   :  { %2095 = vmatprep.subr.bf16.mxu0 %v7045_v43 }
 0x612   :  { %v1973_v19 = vpop.f32.mrf.mxu1 }
 0x614   :  { %v1975_v21 = vpop.f32.mrf.mxu1 }
 0x616   :  { %v1976_v22 = vpop.f32.mrf.mxu1 }
 0x617   :  { %v1988_v6 = vpack.c.bf16 %v1976_v22, %v1973_v19 }
 0x618   :  { %v1978_v24 = vpop.f32.mrf.mxu1 }
 0x619   :  { %6417 = vmatprep.mubr.msk.bf16.mxu0 %vm695_vm2, %v1988_v6  ;;  %v6826_v6 = vld [vmem:[%s8812_s4 + $0xb0] sm:$0xff]  }
 0x61a   :  { %v1981_v25 = vpop.f32.mrf.mxu1 }
 0x61c   :  { %v1983_v26 = vpop.f32.mrf.mxu1 }
 0x61e   :  { %v1984_v27 = vpop.f32.mrf.mxu1 }
 0x61f   :  { %v1989_v29 = vpack.c.bf16 %v1984_v27, %v1981_v25 }
 0x620   :  { %v1986_v30 = vpop.f32.mrf.mxu1 }
 0x621   :  { %6418 = vmatmul.mubr.msk.bf16.vlgmr.msra.gmra.mxu0 %vm695_vm2, %v1989_v29 }
 0x622   :  { %2096 = vmatpush1.bf16.msra.mxu0 %v7285_v50  ;;  %5671 = vmatprep.mubr.msk.bf16.mxu0 %vm532_vm0, %v6811_v28 }
 0x623   :  { %2097 = vmatprep.subr.bf16.mxu0 %v7045_v43 }
 0x626   :  { %2098 = vmatpush1.bf16.msra.mxu0 %v7297_v59 }
 0x627   :  { %2099 = vmatprep.subr.bf16.mxu0 %v7045_v43 }
 0x62a   :  { %2100 = vmatpush1.bf16.msra.mxu0 %v7310_v5 }
 0x62b   :  { %2101 = vmatprep.subr.bf16.mxu0 %v7045_v43 }
 0x62e   :  { %2102 = vmatpush1.bf16.msra.mxu0 %v7318_v14 }
 0x62f   :  { %2103 = vmatprep.subr.bf16.mxu0 %v7045_v43 }
 0x632   :  { %2104 = vmatpush1.bf16.msra.mxu0 %v7326_v20 }
 0x633   :  { %2105 = vmatprep.subr.bf16.mxu0 %v7045_v43 }
 0x636   :  { %2106 = vmatpush1.bf16.msra.mxu0 %v7332_v23 }
 0x637   :  { %2107 = vmatprep.subr.bf16.mxu0 %v7045_v43 }
 0x63a   :  { %2108 = vmatpush1.bf16.msra.mxu0 %v7272_v8 }
 0x63b   :  { %2109 = vmatprep.subr.bf16.mxu0 %v7045_v43 }
 0x63e   :  { %2110 = vmatpush1.bf16.msra.mxu0 %v7264_v61 }
 0x63f   :  { %2117 = vmatprep.subr.bf16.mxu0 %v7045_v43 }
 0x642   :  { %2118 = vmatpush2.bf16.msra.mxu0 %v7352_v48 }
 0x643   :  { %2119 = vmatprep.subr.bf16.mxu0 %v7045_v43 }
 0x646   :  { %2120 = vmatpush2.bf16.msra.mxu0 %v7364_v62 }
 0x647   :  { %2121 = vmatprep.subr.bf16.mxu0 %v7045_v43 }
 0x64a   :  { %2122 = vmatpush2.bf16.msra.mxu0 %v7374_v0 }
 0x64b   :  { %2123 = vmatprep.subr.bf16.mxu0 %v7045_v43 }
 0x64e   :  { %2124 = vmatpush2.bf16.msra.mxu0 %v7381_v39 }
 0x64f   :  { %2125 = vmatprep.subr.bf16.mxu0 %v7045_v43 }
 0x652   :  { %2126 = vmatpush2.bf16.msra.mxu0 %v7387_v49 }
 0x653   :  { %2251 = vmatprep.subr.bf16.mxu0 %v7045_v43 }
 0x655   :  { %2128 = vmatmul.mubr.bf16.vlgmr.msra.gmra.mxu0 %v6813_v31 }
 0x656   :  { %2252 = vmatpush1.bf16.msra.mxu0 %v7285_v50  ;;  %5672 = vmatprep.mubr.msk.bf16.mxu0 %vm532_vm0, %v6814_v32 }
 0x657   :  { %2253 = vmatprep.subr.bf16.mxu0 %v7045_v43 }
 0x65a   :  { %2254 = vmatpush1.bf16.msra.mxu0 %v7297_v59 }
 0x65b   :  { %2255 = vmatprep.subr.bf16.mxu0 %v7045_v43 }
 0x65d   :  { %2136 = vmatmul.mubr.bf16.gmra.mxu0 %v6816_v33  ;;  %v6827_v33 = vld [vmem:[%s8811_s3 + $0x184] ss:$8 sps:$4 sm:$0xff]  }
 0x65e   :  { %2256 = vmatpush1.bf16.msra.mxu0 %v7310_v5  ;;  %5689 = vmatprep.mubr.msk.bf16.mxu0 %vm532_vm0, %v6819_v34 }
 0x65f   :  { %2257 = vmatprep.subr.bf16.mxu0 %v7045_v43 }
 0x662   :  { %2258 = vmatpush1.bf16.msra.mxu0 %v7318_v14 }
 0x663   :  { %2259 = vmatprep.subr.bf16.mxu0 %v7045_v43 }
 0x666   :  { %2260 = vmatpush1.bf16.msra.mxu0 %v7326_v20 }
 0x667   :  { %2261 = vmatprep.subr.bf16.mxu0 %v7045_v43 }
 0x66a   :  { %2262 = vmatpush1.bf16.msra.mxu0 %v7332_v23 }
 0x66b   :  { %2263 = vmatprep.subr.bf16.mxu0 %v7045_v43 }
 0x66e   :  { %2264 = vmatpush1.bf16.msra.mxu0 %v7272_v8 }
 0x66f   :  { %2265 = vmatprep.subr.bf16.mxu0 %v7045_v43 }
 0x672   :  { %2266 = vmatpush1.bf16.msra.mxu0 %v7264_v61 }
 0x673   :  { %2273 = vmatprep.subr.bf16.mxu0 %v7045_v43 }
 0x676   :  { %2274 = vmatpush2.bf16.msra.mxu0 %v7352_v48 }
 0x677   :  { %2275 = vmatprep.subr.bf16.mxu0 %v7045_v43 }
 0x67a   :  { %2276 = vmatpush2.bf16.msra.mxu0 %v7364_v62 }
 0x67b   :  { %2277 = vmatprep.subr.bf16.mxu0 %v7045_v43 }
 0x67e   :  { %2278 = vmatpush2.bf16.msra.mxu0 %v7374_v0 }
 0x67f   :  { %2279 = vmatprep.subr.bf16.mxu0 %v7045_v43 }
 0x682   :  { %2280 = vmatpush2.bf16.msra.mxu0 %v7381_v39 }
 0x683   :  { %2281 = vmatprep.subr.bf16.mxu0 %v7045_v43 }
 0x686   :  { %2282 = vmatpush2.bf16.msra.mxu0 %v7387_v49 }
 0x689   :  { %2284 = vmatmul.mubr.bf16.vlgmr.msra.gmra.mxu0 %v6817_v37 }
 0x68a   :  { %5690 = vmatprep.mubr.msk.bf16.mxu0 %vm532_vm0, %v6820_v38  ;;  %v6829_v38 = vld [vmem:[%s8811_s3 + $0x180] ss:$8 sps:$4 sm:$0xff]  }
 0x691   :  { %2292 = vmatmul.mubr.bf16.gmra.mxu0 %v6822_v40  ;;  %v6830_v40 = vld [vmem:[%s8811_s3 + $0x194] ss:$8 sps:$4 sm:$0xff]  }
 0x6ad   :  { %v6411_v44 = vpop.f32.mrf.mxu0 }
 0x6ae   :  { %v1908_v47 = vadd.f32 %v6411_v44, %v7836_v60  ;;  %v1283_v60 = vadd.f32 %v7725_v56, %v1127_v35  ;;  %v6833_v44 = vld [vmem:[%s8811_s3 + $0x1a0] ss:$8 sps:$4 sm:$0xff]  }
 0x6af   :  { %v1891_v52 = vpop.f32.mrf.mxu0 }
 0x6b0   :  { %v1906_v53 = vadd.f32 %v1891_v52, %v7838_v1  ;;  %v1439_v1 = vadd.f32 %v7733_v45, %v1283_v60  ;;  %v6838_v52 = vld [vmem:[%s8811_s3 + $0x1b0] ss:$8 sps:$4 sm:$0xff]  }
 0x6b1   :  { %v6412_v54 = vpop.f32.mrf.mxu0 }
 0x6b2   :  { %v1909_v63 = vadd.f32 %v6412_v54, %v7840_v4  ;;  %v1595_v4 = vadd.f32 %v7834_v57, %v1439_v1  ;;  %v6840_v54 = vld [vmem:[%s8812_s4 + $0xc0] sm:$0xff]  }
 0x6b3   :  { %v1894_v11 = vpop.f32.mrf.mxu0 }
 0x6b4   :  { %v1751_v9 = vadd.f32 %v7842_v51, %v1595_v4 }
 0x6b6   :  { %v1907_v46 = vadd.f32 %v1894_v11, %v1751_v9 }
 0x6e1   :  { %v6419_v12 = vpop.f32.mrf.mxu0 }
 0x6e2   :  { %v7950_v13 = vadd.f32 %v6419_v12, %v1908_v47  ;;  %v6836_v47 = vld [vmem:[%s8811_s3 + $0x1b4] ss:$8 sps:$4 sm:$0xff]  }
 0x6e3   :  { %v2047_v7 = vpop.f32.mrf.mxu0  ;;  %v6841_v12 = vld [vmem:[%s8812_s4 + $0xd8] sm:$0xff]  }
 0x6e4   :  { %v7953_v15 = vadd.f32 %v2047_v7, %v1906_v53  ;;  %v6839_v53 = vld [vmem:[%s8812_s4 + $0xc8] sm:$0xff]  }
 0x6e5   :  { %v6420_v36 = vpop.f32.mrf.mxu0  ;;  %6437 = vmatprep.subr.bf16.mxu0 %v6839_v53 }
 0x6e6   :  { %v7955_v58 = vadd.f32 %v6420_v36, %v1909_v63  ;;  %6438 = vmatpush3.bf16.msra.mxu0 %v6839_v53 }
 0x6e7   :  { %v2050_v2 = vpop.f32.mrf.mxu0  ;;  %6439 = vmatprep.subr.bf16.mxu0 %v6840_v54 }
 0x6e8   :  { %v7957_v16 = vadd.f32 %v2050_v2, %v1907_v46 }
 0x6ea   :  { %6440 = vmatpush3.bf16.msra.mxu0 %v6840_v54 }
 0x6eb   :  { %6445 = vmatprep.subr.bf16.mxu0 %v6841_v12 }
 0x715   :  { %v2129_v56 = vpop.f32.mrf.mxu0 }
 0x717   :  { %v2131_v17 = vpop.f32.mrf.mxu0 }
 0x719   :  { %v2132_v45 = vpop.f32.mrf.mxu0 }
 0x71a   :  { %v2144_v18 = vpack.c.bf16 %v2132_v45, %v2129_v56 }
 0x71b   :  { %v2134_v19 = vpop.f32.mrf.mxu0 }
 0x71c   :  { %6425 = vmatprep.mubr.msk.bf16.mxu1 %vm695_vm2, %v2144_v18 }
 0x71d   :  { %v2137_v57 = vpop.f32.mrf.mxu0 }
 0x71f   :  { %v2139_v21 = vpop.f32.mrf.mxu0 }
 0x721   :  { %v2140_v22 = vpop.f32.mrf.mxu0 }
 0x722   :  { %v2145_v51 = vpack.c.bf16 %v2140_v22, %v2137_v57  ;;  %v6842_v22 = vld [vmem:[%s8812_s4 + $0xd0] sm:$0xff]  }
 0x723   :  { %v2142_v24 = vpop.f32.mrf.mxu0 }
 0x724   :  { %6426 = vmatmul.mubr.msk.bf16.vlgmr.msra.gmra.mxu1 %vm695_vm2, %v2145_v51 }
 0x725   :  { %6430 = vmatpush3.bf16.msra.mxu1 %v6825_v3 }
 0x726   :  { %6431 = vmatprep.subr.bf16.mxu1 %v6826_v6 }
 0x729   :  { %6432 = vmatpush3.bf16.msra.mxu1 %v6826_v6 }
 0x72a   :  { %2407 = vmatprep.subr.bf16.mxu1 %v7045_v43 }
 0x749   :  { %v2285_v25 = vpop.f32.mrf.mxu0 }
 0x74b   :  { %v2287_v26 = vpop.f32.mrf.mxu0 }
 0x74d   :  { %v2288_v27 = vpop.f32.mrf.mxu0 }
 0x74e   :  { %v2300_v28 = vpack.c.bf16 %v2288_v27, %v2285_v25 }
 0x74f   :  { %v2290_v29 = vpop.f32.mrf.mxu0 }
 0x750   :  { %6433 = vmatprep.mubr.msk.bf16.mxu1 %vm695_vm2, %v2300_v28 }
 0x751   :  { %v2293_v30 = vpop.f32.mrf.mxu0 }
 0x753   :  { %v2295_v31 = vpop.f32.mrf.mxu0 }
 0x754   :  { %v6845_v31 = vld [vmem:[%s8811_s3 + $0x1c4] ss:$8 sps:$4 sm:$0xff]  }
 0x755   :  { %v2296_v32 = vpop.f32.mrf.mxu0 }
 0x756   :  { %v2301_v34 = vpack.c.bf16 %v2296_v32, %v2293_v30 }
 0x757   :  { %v2298_v37 = vpop.f32.mrf.mxu0 }
 0x758   :  { %6434 = vmatmul.mubr.msk.bf16.vlgmr.msra.gmra.mxu1 %vm695_vm2, %v2301_v34  ;;  %v6843_v34 = vld [vmem:[%s8811_s3 + $0x1c0] ss:$8 sps:$4 sm:$0xff]   ;;  %v6846_v37 = vld [vmem:[%s8811_s3 + $0x1d4] ss:$8 sps:$4 sm:$0xff]  }
 0x759   :  { %2408 = vmatpush1.bf16.msra.mxu1 %v7285_v50  ;;  %5707 = vmatprep.mubr.msk.bf16.mxu1 %vm532_vm0, %v6827_v33 }
 0x75a   :  { %2409 = vmatprep.subr.bf16.mxu1 %v7045_v43 }
 0x75d   :  { %2410 = vmatpush1.bf16.msra.mxu1 %v7297_v59 }
 0x75e   :  { %2411 = vmatprep.subr.bf16.mxu1 %v7045_v43 }
 0x761   :  { %2412 = vmatpush1.bf16.msra.mxu1 %v7310_v5 }
 0x762   :  { %2413 = vmatprep.subr.bf16.mxu1 %v7045_v43 }
 0x765   :  { %2414 = vmatpush1.bf16.msra.mxu1 %v7318_v14 }
 0x766   :  { %2415 = vmatprep.subr.bf16.mxu1 %v7045_v43 }
 0x769   :  { %2416 = vmatpush1.bf16.msra.mxu1 %v7326_v20 }
 0x76a   :  { %2417 = vmatprep.subr.bf16.mxu1 %v7045_v43 }
 0x76d   :  { %2418 = vmatpush1.bf16.msra.mxu1 %v7332_v23 }
 0x76e   :  { %2419 = vmatprep.subr.bf16.mxu1 %v7045_v43 }
 0x771   :  { %2420 = vmatpush1.bf16.msra.mxu1 %v7272_v8 }
 0x772   :  { %2421 = vmatprep.subr.bf16.mxu1 %v7045_v43 }
 0x775   :  { %2422 = vmatpush1.bf16.msra.mxu1 %v7264_v61 }
 0x776   :  { %2429 = vmatprep.subr.bf16.mxu1 %v7045_v43 }
 0x779   :  { %2430 = vmatpush2.bf16.msra.mxu1 %v7352_v48 }
 0x77a   :  { %2431 = vmatprep.subr.bf16.mxu1 %v7045_v43 }
 0x77d   :  { %2432 = vmatpush2.bf16.msra.mxu1 %v7364_v62 }
 0x77e   :  { %2433 = vmatprep.subr.bf16.mxu1 %v7045_v43 }
 0x781   :  { %2434 = vmatpush2.bf16.msra.mxu1 %v7374_v0 }
 0x782   :  { %2435 = vmatprep.subr.bf16.mxu1 %v7045_v43 }
 0x785   :  { %2436 = vmatpush2.bf16.msra.mxu1 %v7381_v39 }
 0x786   :  { %2437 = vmatprep.subr.bf16.mxu1 %v7045_v43 }
 0x789   :  { %2438 = vmatpush2.bf16.msra.mxu1 %v7387_v49 }
 0x78a   :  { %2563 = vmatprep.subr.bf16.mxu1 %v7045_v43 }
 0x78c   :  { %2440 = vmatmul.mubr.bf16.vlgmr.msra.gmra.mxu1 %v6829_v38  ;;  %v6848_v38 = vld [vmem:[%s8811_s3 + $0x1d0] ss:$8 sps:$4 sm:$0xff]  }
 0x78d   :  { %2564 = vmatpush1.bf16.msra.mxu1 %v7285_v50  ;;  %5708 = vmatprep.mubr.msk.bf16.mxu1 %vm532_vm0, %v6830_v40  ;;  %v6851_v40 = vld [vmem:[%s8811_s3 + $0x1e4] ss:$8 sps:$4 sm:$0xff]  }
 0x78e   :  { %2565 = vmatprep.subr.bf16.mxu1 %v7045_v43 }
 0x791   :  { %2566 = vmatpush1.bf16.msra.mxu1 %v7297_v59 }
 0x792   :  { %2567 = vmatprep.subr.bf16.mxu1 %v7045_v43 }
 0x794   :  { %2448 = vmatmul.mubr.bf16.gmra.mxu1 %v6832_v41  ;;  %v6857_v41 = vld [vmem:[%s8812_s4 + $0xf8] sm:$0xff]  }
 0x795   :  { %2568 = vmatpush1.bf16.msra.mxu1 %v7310_v5  ;;  %5725 = vmatprep.mubr.msk.bf16.mxu1 %vm532_vm0, %v6835_v42 }
 0x796   :  { %2569 = vmatprep.subr.bf16.mxu1 %v7045_v43 }
 0x799   :  { %2570 = vmatpush1.bf16.msra.mxu1 %v7318_v14 }
 0x79a   :  { %2571 = vmatprep.subr.bf16.mxu1 %v7045_v43 }
 0x79d   :  { %2572 = vmatpush1.bf16.msra.mxu1 %v7326_v20 }
 0x79e   :  { %2573 = vmatprep.subr.bf16.mxu1 %v7045_v43 }
 0x7a1   :  { %2574 = vmatpush1.bf16.msra.mxu1 %v7332_v23 }
 0x7a2   :  { %2575 = vmatprep.subr.bf16.mxu1 %v7045_v43 }
 0x7a5   :  { %2576 = vmatpush1.bf16.msra.mxu1 %v7272_v8 }
 0x7a6   :  { %2577 = vmatprep.subr.bf16.mxu1 %v7045_v43 }
 0x7a9   :  { %2578 = vmatpush1.bf16.msra.mxu1 %v7264_v61 }
 0x7aa   :  { %2585 = vmatprep.subr.bf16.mxu1 %v7045_v43 }
 0x7ad   :  { %2586 = vmatpush2.bf16.msra.mxu1 %v7352_v48 }
 0x7ae   :  { %2587 = vmatprep.subr.bf16.mxu1 %v7045_v43 }
 0x7b1   :  { %2588 = vmatpush2.bf16.msra.mxu1 %v7364_v62 }
 0x7b2   :  { %2589 = vmatprep.subr.bf16.mxu1 %v7045_v43 }
 0x7b5   :  { %2590 = vmatpush2.bf16.msra.mxu1 %v7374_v0 }
 0x7b6   :  { %2591 = vmatprep.subr.bf16.mxu1 %v7045_v43 }
 0x7b9   :  { %2592 = vmatpush2.bf16.msra.mxu1 %v7381_v39 }
 0x7ba   :  { %2593 = vmatprep.subr.bf16.mxu1 %v7045_v43 }
 0x7bd   :  { %2594 = vmatpush2.bf16.msra.mxu1 %v7387_v49 }
 0x7c0   :  { %2596 = vmatmul.mubr.bf16.vlgmr.msra.gmra.mxu1 %v6833_v44 }
 0x7c1   :  { %5726 = vmatprep.mubr.msk.bf16.mxu1 %vm532_vm0, %v6836_v47 }
 0x7c8   :  { %2604 = vmatmul.mubr.bf16.gmra.mxu1 %v6838_v52 }
 0x7e4   :  { %v6427_v63 = vpop.f32.mrf.mxu1 }
 0x7e5   :  { %v2220_v3 = vadd.f32 %v6427_v63, %v7950_v13 }
 0x7e6   :  { %v2203_v55 = vpop.f32.mrf.mxu1 }
 0x7e7   :  { %v2218_v10 = vadd.f32 %v2203_v55, %v7953_v15 }
 0x7e8   :  { %v6428_v35 = vpop.f32.mrf.mxu1 }
 0x7e9   :  { %v2221_v60 = vadd.f32 %v6428_v35, %v7955_v58 }
 0x7ea   :  { %v2206_v11 = vpop.f32.mrf.mxu1 }
 0x7eb   :  { %v2219_v1 = vadd.f32 %v2206_v11, %v7957_v16 }
 0x818   :  { %v6435_v4 = vpop.f32.mrf.mxu1 }
 0x819   :  { %v8059_v7 = vadd.f32 %v6435_v4, %v2220_v3 }
 0x81a   :  { %v2359_v9 = vpop.f32.mrf.mxu1 }
 0x81b   :  { %v8061_v36 = vadd.f32 %v2359_v9, %v2218_v10  ;;  %v6858_v9 = vld [vmem:[%s8812_s4 + $0xf0] sm:$0xff]  }
 0x81c   :  { %v6436_v13 = vpop.f32.mrf.mxu1 }
 0x81d   :  { %v8063_v46 = vadd.f32 %v6436_v13, %v2221_v60 }
 0x81e   :  { %v2362_v15 = vpop.f32.mrf.mxu1 }
 0x81f   :  { %v8065_v2 = vadd.f32 %v2362_v15, %v2219_v1 }
 0x84c   :  { %v2441_v58 = vpop.f32.mrf.mxu1 }
 0x84e   :  { %v2443_v56 = vpop.f32.mrf.mxu1 }
 0x850   :  { %v2444_v16 = vpop.f32.mrf.mxu1 }
 0x851   :  { %v2456_v17 = vpack.c.bf16 %v2444_v16, %v2441_v58 }
 0x852   :  { %v2446_v45 = vpop.f32.mrf.mxu1 }
 0x853   :  { %6441 = vmatprep.mubr.msk.bf16.mxu0 %vm695_vm2, %v2456_v17 }
 0x854   :  { %v2449_v18 = vpop.f32.mrf.mxu1 }
 0x856   :  { %v2451_v19 = vpop.f32.mrf.mxu1 }
 0x857   :  { %v7046_v19 = vmov 0.0  }
 0x858   :  { %v2452_v57 = vpop.f32.mrf.mxu1 }
 0x859   :  { %v2457_v21 = vpack.c.bf16 %v2452_v57, %v2449_v18 }
 0x85a   :  { %v2454_v51 = vpop.f32.mrf.mxu1 }
 0x85b   :  { %6442 = vmatmul.mubr.msk.bf16.vlgmr.msra.gmra.mxu0 %vm695_vm2, %v2457_v21 }
 0x85c   :  { %6446 = vmatpush3.bf16.msra.mxu0 %v6841_v12 }
 0x85d   :  { %6447 = vmatprep.subr.bf16.mxu0 %v6842_v22 }
 0x860   :  { %6448 = vmatpush3.bf16.msra.mxu0 %v6842_v22 }
 0x861   :  { %2719 = vmatprep.subr.bf16.mxu0 %v7045_v43 }
 0x880   :  { %v2597_v6 = vpop.f32.mrf.mxu1 }
 0x882   :  { %v2599_v24 = vpop.f32.mrf.mxu1 }
 0x884   :  { %v2600_v25 = vpop.f32.mrf.mxu1 }
 0x885   :  { %v2612_v26 = vpack.c.bf16 %v2600_v25, %v2597_v6 }
 0x886   :  { %v2602_v27 = vpop.f32.mrf.mxu1 }
 0x887   :  { %6449 = vmatprep.mubr.msk.bf16.mxu0 %vm695_vm2, %v2612_v26  ;;  %v5771_v27 = vld [vmem:[%s8813_s5] ss:$0 sm:$0xff] }
 0x888   :  { %v2605_v28 = vpop.f32.mrf.mxu1 }
 0x88a   :  { %v2607_v29 = vpop.f32.mrf.mxu1 }
 0x88c   :  { %v2608_v30 = vpop.f32.mrf.mxu1 }
 0x88d   :  { %v2613_v32 = vpack.c.bf16 %v2608_v30, %v2605_v28 }
 0x88e   :  { %v2610_v33 = vpop.f32.mrf.mxu1 }
 0x88f   :  { %6450 = vmatmul.mubr.msk.bf16.vlgmr.msra.gmra.mxu0 %vm695_vm2, %v2613_v32 }
 0x890   :  { %2720 = vmatpush1.bf16.msra.mxu0 %v7285_v50  ;;  %5743 = vmatprep.mubr.msk.bf16.mxu0 %vm532_vm0, %v6845_v31 }
 0x891   :  { %2721 = vmatprep.subr.bf16.mxu0 %v7045_v43 }
 0x894   :  { %2722 = vmatpush1.bf16.msra.mxu0 %v7297_v59 }
 0x895   :  { %2723 = vmatprep.subr.bf16.mxu0 %v7045_v43 }
 0x898   :  { %2724 = vmatpush1.bf16.msra.mxu0 %v7310_v5 }
 0x899   :  { %2725 = vmatprep.subr.bf16.mxu0 %v7045_v43 }
 0x89c   :  { %2726 = vmatpush1.bf16.msra.mxu0 %v7318_v14 }
 0x89d   :  { %2727 = vmatprep.subr.bf16.mxu0 %v7045_v43 }
 0x8a0   :  { %2728 = vmatpush1.bf16.msra.mxu0 %v7326_v20 }
 0x8a1   :  { %2729 = vmatprep.subr.bf16.mxu0 %v7045_v43 }
 0x8a4   :  { %2730 = vmatpush1.bf16.msra.mxu0 %v7332_v23 }
 0x8a5   :  { %2731 = vmatprep.subr.bf16.mxu0 %v7045_v43 }
 0x8a8   :  { %2732 = vmatpush1.bf16.msra.mxu0 %v7272_v8 }
 0x8a9   :  { %2733 = vmatprep.subr.bf16.mxu0 %v7045_v43 }
 0x8ac   :  { %2734 = vmatpush1.bf16.msra.mxu0 %v7264_v61 }
 0x8ad   :  { %2741 = vmatprep.subr.bf16.mxu0 %v7045_v43 }
 0x8b0   :  { %2742 = vmatpush2.bf16.msra.mxu0 %v7352_v48 }
 0x8b1   :  { %2743 = vmatprep.subr.bf16.mxu0 %v7045_v43 }
 0x8b4   :  { %2744 = vmatpush2.bf16.msra.mxu0 %v7364_v62 }
 0x8b5   :  { %2745 = vmatprep.subr.bf16.mxu0 %v7045_v43 }
 0x8b8   :  { %2746 = vmatpush2.bf16.msra.mxu0 %v7374_v0 }
 0x8b9   :  { %2747 = vmatprep.subr.bf16.mxu0 %v7045_v43 }
 0x8bc   :  { %2748 = vmatpush2.bf16.msra.mxu0 %v7381_v39 }
 0x8bd   :  { %2749 = vmatprep.subr.bf16.mxu0 %v7045_v43 }
 0x8c0   :  { %2750 = vmatpush2.bf16.msra.mxu0 %v7387_v49 }
 0x8c1   :  { %2875 = vmatprep.subr.bf16.mxu0 %v7045_v43 }
 0x8c3   :  { %2752 = vmatmul.mubr.bf16.vlgmr.msra.gmra.mxu0 %v6843_v34 }
 0x8c4   :  { %2876 = vmatpush1.bf16.msra.mxu0 %v7285_v50  ;;  %5744 = vmatprep.mubr.msk.bf16.mxu0 %vm532_vm0, %v6846_v37  ;;  %v6854_v50 = vld [vmem:[%s8811_s3 + $0x1f0] ss:$8 sps:$4 sm:$0xff]  }
 0x8c5   :  { %2877 = vmatprep.subr.bf16.mxu0 %v7045_v43 }
 0x8c8   :  { %2878 = vmatpush1.bf16.msra.mxu0 %v7297_v59  ;;  %v6855_v59 = vld [vmem:[%s8812_s4 + $0xe8] sm:$0xff]  }
 0x8c9   :  { %2879 = vmatprep.subr.bf16.mxu0 %v7045_v43  ;;  %6453 = vmatprep.subr.bf16.mxu1 %v6855_v59 }
 0x8ca   :  { %6454 = vmatpush3.bf16.msra.mxu1 %v6855_v59 }
 0x8cb   :  { %2760 = vmatmul.mubr.bf16.gmra.mxu0 %v6848_v38 }
 0x8cc   :  { %2880 = vmatpush1.bf16.msra.mxu0 %v7310_v5  ;;  %5761 = vmatprep.mubr.msk.bf16.mxu0 %vm532_vm0, %v6851_v40  ;;  %v6856_v5 = vld [vmem:[%s8812_s4 + $0xe0] sm:$0xff]   ;;  %s7048_s4 = smov [#allocation2]  }
 0x8cd   :  { %2881 = vmatprep.subr.bf16.mxu0 %v7045_v43  ;;  %6455 = vmatprep.subr.bf16.mxu1 %v6856_v5  ;;  %s5440_s15 = sshll.u32 %s7048_s4, 4  ;;  %s5441_s15 = int_to_ptr.vmem [resolvable:$true] %s5440_s15 }
 0x8ce   :  { %6456 = vmatpush3.bf16.msra.mxu1 %v6856_v5  ;;  %s7023_s5 = scalar_lea.vmem %s5441_s15, 32  ;;  %p7028_p1 = scmp.lt.s32.totalorder %s5441_s15, %s5441_s15 }
 0x8cf   :  { %6461 = vmatprep.subr.bf16.mxu1 %v6857_v41  ;;  %p7024_p0 = scmp.ne.s32.totalorder %s5441_s15, %s7023_s5  ;;  %p7029_p2 = scmp.lt.s32.totalorder %s7023_s5, %s7023_s5 }
 0x8d0   :  { %2882 = vmatpush1.bf16.msra.mxu0 %v7318_v14 }
 0x8d1   :  { %2883 = vmatprep.subr.bf16.mxu0 %v7045_v43  ;;  %p7030_p3 = por %p7029_p2, %p7028_p1 }
 0x8d3   :  { %p7031_p4 = pnand %p7030_p3, %p7024_p0 }
 0x8d4   :  { %2884 = vmatpush1.bf16.msra.mxu0 %v7326_v20 }
 0x8d5   :  { %2885 = vmatprep.subr.bf16.mxu0 %v7045_v43 }
 0x8d8   :  { %2886 = vmatpush1.bf16.msra.mxu0 %v7332_v23 }
 0x8d9   :  { %2887 = vmatprep.subr.bf16.mxu0 %v7045_v43 }
 0x8dc   :  { %2888 = vmatpush1.bf16.msra.mxu0 %v7272_v8  ;;  %v6852_v8 = vld [vmem:[%s8811_s3 + $0x1f4] ss:$8 sps:$4 sm:$0xff]  }
 0x8dd   :  { %2889 = vmatprep.subr.bf16.mxu0 %v7045_v43 }
 0x8e0   :  { %2890 = vmatpush1.bf16.msra.mxu0 %v7264_v61  ;;  %v6849_v61 = vld [vmem:[%s8811_s3 + $0x1e0] ss:$8 sps:$4 sm:$0xff]  }
 0x8e1   :  { %2897 = vmatprep.subr.bf16.mxu0 %v7045_v43 }
 0x8e4   :  { %2898 = vmatpush2.bf16.msra.mxu0 %v7352_v48 }
 0x8e5   :  { %2899 = vmatprep.subr.bf16.mxu0 %v7045_v43 }
 0x8e8   :  { %2900 = vmatpush2.bf16.msra.mxu0 %v7364_v62 }
 0x8e9   :  { %2901 = vmatprep.subr.bf16.mxu0 %v7045_v43 }
 0x8ec   :  { %2902 = vmatpush2.bf16.msra.mxu0 %v7374_v0 }
 0x8ed   :  { %2903 = vmatprep.subr.bf16.mxu0 %v7045_v43 }
 0x8f0   :  { %2904 = vmatpush2.bf16.msra.mxu0 %v7381_v39 }
 0x8f1   :  { %2905 = vmatprep.subr.bf16.mxu0 %v7045_v43 }
 0x8f4   :  { %2906 = vmatpush2.bf16.msra.mxu0 %v7387_v49 }
 0x8f5   :  { %6517 = vmatprep.subr.bf16.mxu0 %v7046_v19 }
 0x8f7   :  { %2908 = vmatmul.mubr.bf16.vlgmr.msra.gmra.mxu0 %v6849_v61 }
 0x8f8   :  { %5762 = vmatprep.mubr.msk.bf16.mxu0 %vm532_vm0, %v6852_v8 }
 0x8ff   :  { %2916 = vmatmul.mubr.bf16.gmra.mxu0 %v6854_v50 }
 0x900   :  { %6525 = vmatprep.mubr.msk.bf16.mxu0 %vm7047_vm3, %v7046_v19 }
 0x91b   :  { %v6443_v14 = vpop.f32.mrf.mxu0 }
 0x91c   :  { %v2532_v20 = vadd.f32 %v6443_v14, %v8059_v7 }
 0x91d   :  { %v2515_v23 = vpop.f32.mrf.mxu0 }
 0x91e   :  { %v2530_v48 = vadd.f32 %v2515_v23, %v8061_v36 }
 0x91f   :  { %v6444_v62 = vpop.f32.mrf.mxu0 }
 0x920   :  { %v2533_v0 = vadd.f32 %v6444_v62, %v8063_v46  ;;  %v5773_v62 = vld [vmem:[%s8814_s6 + $0x4] sm:$0xf] }
 0x921   :  { %v2518_v39 = vpop.f32.mrf.mxu0 }
 0x922   :  { %v2531_v49 = vadd.f32 %v2518_v39, %v8065_v2  ;;  %v6860_v39 = vld [vmem:[%s8815_s7 + $0x30] sm:$0xff]  }
 0x94f   :  { %v6451_v42 = vpop.f32.mrf.mxu0 }
 0x950   :  { %v2688_v44 = vadd.f32 %v6451_v42, %v2532_v20 }
 0x951   :  { %v2671_v47 = vpop.f32.mrf.mxu0 }
 0x952   :  { %v2686_v52 = vadd.f32 %v2671_v47, %v2530_v48  ;;  %v3019_v48 = vld [vmem:[%s8814_s6] sm:$0xf] }
 0x953   :  { %v6452_v53 = vpop.f32.mrf.mxu0 }
 0x954   :  { %v2689_v54 = vadd.f32 %v6452_v53, %v2533_v0  ;;  %v6859_v0 = vld [vmem:[%s8815_s7 + $0x38] sm:$0xff]  }
 0x955   :  { %v2674_v63 = vpop.f32.mrf.mxu0 }
 0x956   :  { %v2687_v3 = vadd.f32 %v2674_v63, %v2531_v49  ;;  %v6861_v49 = vld [vmem:[%s8815_s7 + $0x28] sm:$0xff]  }
 0x983   :  { %v2753_v55 = vpop.f32.mrf.mxu0 }
 0x985   :  { %v2755_v10 = vpop.f32.mrf.mxu0 }
 0x987   :  { %v2756_v35 = vpop.f32.mrf.mxu0 }
 0x988   :  { %v2768_v60 = vpack.c.bf16 %v2756_v35, %v2753_v55  ;;  %v6864_v55 = vld [vmem:[%s8815_s7 + $0x10] sm:$0xff]  }
 0x989   :  { %v2758_v11 = vpop.f32.mrf.mxu0 }
 0x98a   :  { %6457 = vmatprep.mubr.msk.bf16.mxu1 %vm695_vm2, %v2768_v60  ;;  %v6865_v60 = vld [vmem:[%s8815_s7 + $0x8] sm:$0xff]   ;;  %v6866_v11 = vld [vmem:[%s8815_s7] sm:$0xff]  }
 0x98b   :  { %v2761_v1 = vpop.f32.mrf.mxu0 }
 0x98d   :  { %v2763_v12 = vpop.f32.mrf.mxu0 }
 0x98e   :  { %v5793_v12 = vld [vmem:[%s8814_s6 + $0x8] sm:$0xf] }
 0x98f   :  { %v2764_v4 = vpop.f32.mrf.mxu0 }
 0x990   :  { %v2769_v7 = vpack.c.bf16 %v2764_v4, %v2761_v1  ;;  %v5808_v4 = vld [vmem:[%s8814_s6 + $0xc] sm:$0xf] }
 0x991   :  { %v2766_v36 = vpop.f32.mrf.mxu0 }
 0x992   :  { %6458 = vmatmul.mubr.msk.bf16.vlgmr.msra.gmra.mxu1 %vm695_vm2, %v2769_v7  ;;  %v5823_v7 = vld [vmem:[%s8814_s6 + $0x10] sm:$0xf] }
 0x993   :  { %6462 = vmatpush3.bf16.msra.mxu1 %v6857_v41  ;;  %v6862_v41 = vld [vmem:[%s8815_s7 + $0x20] sm:$0xff]   ;;  %v6868_v36 = vld [vmem:[%s8815_s7 + $0x50] sm:$0xff]  }
 0x994   :  { %6463 = vmatprep.subr.bf16.mxu1 %v6858_v9 }
 0x997   :  { %6464 = vmatpush3.bf16.msra.mxu1 %v6858_v9  ;;  %v6867_v9 = vld [vmem:[%s8815_s7 + $0x58] sm:$0xff]  }
 0x998   :  { %6469 = vmatprep.subr.bf16.mxu1 %v7046_v19  ;;  %6518 = vmatpush3.bf16.msra.mxu0 %v6867_v9 }
 0x999   :  { %6519 = vmatprep.subr.bf16.mxu0 %v7046_v19 }
 0x99c   :  { %6520 = vmatpush3.bf16.msra.mxu0 %v6868_v36 }
 0x99d   :  { %6521 = vmatprep.subr.bf16.mxu0 %v7046_v19 }
 0x9b7   :  { %v2909_v13 = vpop.f32.mrf.mxu0 }
 0x9b9   :  { %v2911_v46 = vpop.f32.mrf.mxu0 }
 0x9ba   :  { %v6870_v46 = vld [vmem:[%s8815_s7 + $0x40] sm:$0xff]  }
 0x9bb   :  { %v2912_v15 = vpop.f32.mrf.mxu0 }
 0x9bc   :  { %v2924_v2 = vpack.c.bf16 %v2912_v15, %v2909_v13  ;;  %v6869_v13 = vld [vmem:[%s8815_s7 + $0x48] sm:$0xff]   ;;  %v6872_v15 = vld [vmem:[%s8815_s7 + $0x98] sm:$0xff]  }
 0x9bd   :  { %v2914_v58 = vpop.f32.mrf.mxu0  ;;  %6522 = vmatpush3.bf16.msra.mxu0 %v6869_v13 }
 0x9be   :  { %6465 = vmatprep.mubr.msk.bf16.mxu1 %vm695_vm2, %v2924_v2  ;;  %6523 = vmatprep.subr.bf16.mxu0 %v7046_v19  ;;  %v6874_v2 = vld [vmem:[%s8815_s7 + $0x90] sm:$0xff]   ;;  %v6876_v58 = vld [vmem:[%s8815_s7 + $0x88] sm:$0xff]  }
 0x9bf   :  { %v2917_v56 = vpop.f32.mrf.mxu0 }
 0x9c1   :  { %v2919_v16 = vpop.f32.mrf.mxu0  ;;  %6524 = vmatpush3.bf16.msra.mxu0 %v6870_v46 }
 0x9c2   :  { %6537 = vmatprep.subr.bf16.mxu0 %v7046_v19 }
 0x9c3   :  { %v2920_v17 = vpop.f32.mrf.mxu0 }
 0x9c4   :  { %v2925_v45 = vpack.c.bf16 %v2920_v17, %v2917_v56  ;;  %v6878_v56 = vld [vmem:[%s8815_s7 + $0x80] sm:$0xff]  }
 0x9c5   :  { %v2922_v18 = vpop.f32.mrf.mxu0 }
 0x9c6   :  { %6466 = vmatmul.mubr.msk.bf16.vlgmr.msra.gmra.mxu1 %vm695_vm2, %v2925_v45 }
 0x9c7   :  { %6473 = vmatprep.mubr.msk.bf16.mxu1 %vm7047_vm3, %v7046_v19 }
 0xa52   :  { %v6459_v57 = vpop.f32.mrf.mxu1 }
 0xa53   :  { %v2844_v6 = vadd.f32 %v6459_v57, %v2688_v44 }
 0xa54   :  { %v2827_v21 = vpop.f32.mrf.mxu1 }
 0xa55   :  { %v2842_v25 = vadd.f32 %v2827_v21, %v2686_v52 }
 0xa56   :  { %v6460_v22 = vpop.f32.mrf.mxu1 }
 0xa57   :  { %v2845_v29 = vadd.f32 %v6460_v22, %v2689_v54  ;;  %v6863_v54 = vld [vmem:[%s8815_s7 + $0x18] sm:$0xff]  }
 0xa58   :  { %v2830_v51 = vpop.f32.mrf.mxu1 }
 0xa59   :  { %v2843_v32 = vadd.f32 %v2830_v51, %v2687_v3 }
 0xa86   :  { %v6467_v24 = vpop.f32.mrf.mxu1 }
 0xa87   :  { %v3000_v26 = vadd.f32 %v6467_v24, %v2844_v6 }
 0xa88   :  { %v2983_v28 = vpop.f32.mrf.mxu1 }
 0xa89   :  { %v2998_v30 = vadd.f32 %v2983_v28, %v2842_v25  ;;  %v3011_v33 = vadd.f32 %v5771_v27, %v3000_v26  ;;  %v6871_v25 = vld [vmem:[%s8815_s7 + $0x78] sm:$0xff]  }
 0xa8a   :  { %v6468_v31 = vpop.f32.mrf.mxu1 }
 0xa8b   :  { %v3001_v34 = vadd.f32 %v6468_v31, %v2845_v29  ;;  %v3009_v38 = vadd.f32 %v5771_v27, %v2998_v30  ;;  %v3015_v8 = vmax.f32 %v3011_v33, 0.0  ;;  %v6873_v29 = vld [vmem:[%s8815_s7 + $0x70] sm:$0xff]  }
 0xa8c   :  { %v2986_v37 = vpop.f32.mrf.mxu1 }
 0xa8d   :  { %v3012_v40 = vadd.f32 %v5771_v27, %v3001_v34  ;;  %v2999_v61 = vadd.f32 %v2986_v37, %v2843_v32  ;;  %v3013_v5 = vmax.f32 %v3009_v38, 0.0  ;;  %v6875_v32 = vld [vmem:[%s8815_s7 + $0x68] sm:$0xff]   ;;  %v6877_v37 = vld [vmem:[%s8815_s7 + $0x60] sm:$0xff]  }
 0xa8f   :  { %v3016_v50 = vmax.f32 %v3012_v40, 0.0  ;;  %v3010_v59 = vadd.f32 %v5771_v27, %v2999_v61 }
 0xa91   :  { %v8183_v14 = vpack.c.bf16 %v3016_v50, %v3015_v8  ;;  %v3014_v20 = vmax.f32 %v3010_v59, 0.0 }
 0xa93   :  { %v8185_v23 = vpack.c.bf16 %v3014_v20, %v3013_v5  ;;  %6470 = vmatpush3.bf16.msra.mxu1 %v8183_v14  ;;  %v5838_v20 = vld [vmem:[%s8814_s6 + $0x14] sm:$0xf] }
 0xa94   :  { %6471 = vmatprep.subr.bf16.mxu1 %v7046_v19 }
 0xa97   :  { %6472 = vmatpush3.bf16.msra.mxu1 %v8185_v23 }
 0xa98   :  { %6477 = vmatprep.subr.bf16.mxu1 %v7046_v19 }
 0xa9a   :  { %6474 = vmatmul.mubr.msk.bf16.vlgmr.msra.gmra.mxu1 %vm695_vm2, %v3019_v48  ;;  %v5853_v48 = vld [vmem:[%s8814_s6 + $0x18] sm:$0xf] }
 0xa9b   :  { %6478 = vmatpush3.bf16.msra.mxu1 %v8183_v14  ;;  %6481 = vmatprep.mubr.msk.bf16.mxu1 %vm7047_vm3, %v7046_v19 }
 0xa9c   :  { %6479 = vmatprep.subr.bf16.mxu1 %v7046_v19 }
 0xa9f   :  { %6480 = vmatpush3.bf16.msra.mxu1 %v8185_v23 }
 0xaa0   :  { %6485 = vmatprep.subr.bf16.mxu1 %v7046_v19 }
 0xaa2   :  { %6482 = vmatmul.mubr.msk.bf16.vlgmr.msra.gmra.mxu1 %vm695_vm2, %v5773_v62  ;;  %v6879_v62 = vld [vmem:[%s8815_s7 + $0xb8] sm:$0xff]  }
 0xaa3   :  { %6486 = vmatpush3.bf16.msra.mxu1 %v6859_v0  ;;  %6493 = vmatprep.mubr.msk.bf16.mxu1 %vm7047_vm3, %v7046_v19  ;;  %v6880_v0 = vld [vmem:[%s8815_s7 + $0xd8] sm:$0xff]  }
 0xaa4   :  { %6487 = vmatprep.subr.bf16.mxu1 %v7046_v19 }
 0xaa7   :  { %6488 = vmatpush3.bf16.msra.mxu1 %v6860_v39  ;;  %v6881_v39 = vld [vmem:[%s8815_s7 + $0xb0] sm:$0xff]  }
 0xaa8   :  { %6489 = vmatprep.subr.bf16.mxu1 %v7046_v19 }
 0xaab   :  { %6490 = vmatpush3.bf16.msra.mxu1 %v6861_v49  ;;  %v6882_v49 = vld [vmem:[%s8815_s7 + $0xd0] sm:$0xff]  }
 0xaac   :  { %6491 = vmatprep.subr.bf16.mxu1 %v7046_v19 }
 0xaaf   :  { %6492 = vmatpush3.bf16.msra.mxu1 %v6862_v41  ;;  %v6883_v41 = vld [vmem:[%s8815_s7 + $0xa8] sm:$0xff]  }
 0xab0   :  { %6497 = vmatprep.subr.bf16.mxu1 %v7046_v19 }
 0xb5a   :  { %v3057_v42 = vpop.f32.mrf.mxu1 }
 0xb5b   :  { %v3063_v1 = vpack.c.bf16 %v3057_v42, %v3057_v42  ;;  %v6884_v42 = vld [vmem:[%s8815_s7 + $0xc8] sm:$0xff]  }
 0xb5c   :  { %v6475_v44 = vpop.f32.mrf.mxu1 }
 0xb5d   :  { %v6885_v44 = vld [vmem:[%s8815_s7 + $0xa0] sm:$0xff]  }
 0xb5e   :  { %v3060_v47 = vpop.f32.mrf.mxu1 }
 0xb5f   :  { %v6886_v47 = vld [vmem:[%s8815_s7 + $0xc0] sm:$0xff]  }
 0xb60   :  { %v6476_v52 = vpop.f32.mrf.mxu1 }
 0xb62   :  { %v3111_v53 = vpop.f32.mrf.mxu1 }
 0xb63   :  { %v3117_v63 = vpack.c.bf16 %v3111_v53, %v3111_v53 }
 0xb64   :  { %v6483_v3 = vpop.f32.mrf.mxu1 }
 0xb65   :  { %6494 = vmatmul.mubr.msk.bf16.vlgmr.msra.gmra.mxu1 %vm3151_vm4, %v3117_v63 }
 0xb66   :  { %6498 = vmatpush3.bf16.msra.mxu1 %v6863_v54  ;;  %v3114_v10 = vpop.f32.mrf.mxu1  ;;  %6505 = vmatprep.mubr.msk.bf16.mxu1 %vm7047_vm3, %v7046_v19 }
 0xb67   :  { %6499 = vmatprep.subr.bf16.mxu1 %v7046_v19 }
 0xb68   :  { %v6484_v35 = vpop.f32.mrf.mxu1 }
 0xb6a   :  { %6500 = vmatpush3.bf16.msra.mxu1 %v6864_v55 }
 0xb6b   :  { %6501 = vmatprep.subr.bf16.mxu1 %v7046_v19 }
 0xb6e   :  { %6502 = vmatpush3.bf16.msra.mxu1 %v6865_v60 }
 0xb6f   :  { %6503 = vmatprep.subr.bf16.mxu1 %v7046_v19 }
 0xb72   :  { %6504 = vmatpush3.bf16.msra.mxu1 %v6866_v11 }
 0xb73   :  { %6509 = vmatprep.subr.bf16.mxu1 %v7046_v19 }
 0xb75   :  { %6506 = vmatmul.mubr.msk.bf16.vlgmr.msra.gmra.mxu1 %vm3151_vm4, %v3063_v1 }
 0xb76   :  { %6510 = vmatpush3.bf16.msra.mxu1 %v8183_v14  ;;  %6513 = vmatprep.mubr.msk.bf16.mxu1 %vm7047_vm3, %v7046_v19 }
 0xb77   :  { %6511 = vmatprep.subr.bf16.mxu1 %v7046_v19 }
 0xb7a   :  { %6512 = vmatpush3.bf16.msra.mxu1 %v8185_v23 }
 0xb7b   :  { %6529 = vmatprep.subr.bf16.mxu1 %v7046_v19 }
 0xb7d   :  { %6514 = vmatmul.mubr.msk.bf16.vlgmr.msra.gmra.mxu1 %vm695_vm2, %v5793_v12 }
 0xb7e   :  { %6530 = vmatpush3.bf16.msra.mxu1 %v8183_v14  ;;  %6533 = vmatprep.mubr.msk.bf16.mxu1 %vm7047_vm3, %v7046_v19 }
 0xb7f   :  { %6531 = vmatprep.subr.bf16.mxu1 %v7046_v19 }
 0xb82   :  { %6532 = vmatpush3.bf16.msra.mxu1 %v8185_v23 }
 0xb83   :  { %6549 = vmatprep.subr.bf16.mxu1 %v7046_v19 }
 0xb85   :  { %6534 = vmatmul.mubr.msk.bf16.vlgmr.msra.gmra.mxu1 %vm695_vm2, %v5808_v4 }
 0xb86   :  { %6550 = vmatpush3.bf16.msra.mxu1 %v8183_v14  ;;  %6553 = vmatprep.mubr.msk.bf16.mxu1 %vm7047_vm3, %v7046_v19 }
 0xb87   :  { %6551 = vmatprep.subr.bf16.mxu1 %v7046_v19 }
 0xb8a   :  { %6552 = vmatpush3.bf16.msra.mxu1 %v8185_v23 }
 0xb8b   :  { %6557 = vmatprep.subr.bf16.mxu1 %v7046_v19 }
 0xb8d   :  { %6554 = vmatmul.mubr.msk.bf16.vlgmr.msra.gmra.mxu1 %vm695_vm2, %v5823_v7 }
 0xb8e   :  { %6565 = vmatprep.mubr.msk.bf16.mxu1 %vm7047_vm3, %v7046_v19  ;;  %6558 = vmatpush3.bf16.msra.mxu1 %v6872_v15 }
 0xb8f   :  { %6559 = vmatprep.subr.bf16.mxu1 %v7046_v19 }
 0xb92   :  { %6560 = vmatpush3.bf16.msra.mxu1 %v6874_v2 }
 0xb93   :  { %6561 = vmatprep.subr.bf16.mxu1 %v7046_v19 }
 0xb96   :  { %6562 = vmatpush3.bf16.msra.mxu1 %v6876_v58 }
 0xb97   :  { %6563 = vmatprep.subr.bf16.mxu1 %v7046_v19 }
 0xb9a   :  { %6564 = vmatpush3.bf16.msra.mxu1 %v6878_v56 }
 0xb9b   :  { %6589 = vmatprep.subr.bf16.mxu1 %v7046_v19 }
 0xc25   :  { %v3189_v16 = vpop.f32.mrf.mxu1 }
 0xc27   :  { %v6495_v17 = vpop.f32.mrf.mxu1 }
 0xc29   :  { %v3192_v45 = vpop.f32.mrf.mxu1 }
 0xc2b   :  { %v6496_v18 = vpop.f32.mrf.mxu1 }
 0xc2c   :  { %v5868_v18 = vld [vmem:[%s8814_s6 + $0x1c] sm:$0xf] }
 0xc35   :  { %v3256_v57 = vpop.f32.mrf.mxu1 }
 0xc36   :  { %v8307_v21 = vadd.f32 %v3256_v57, %v3189_v16  ;;  %v6887_v57 = vld [vmem:[%s8815_s7 + $0xf8] sm:$0xff]  }
 0xc37   :  { %v6507_v22 = vpop.f32.mrf.mxu1 }
 0xc38   :  { %v6890_v22 = vld [vmem:[%s8815_s7 + $0x110] sm:$0xff]  }
 0xc39   :  { %v3259_v51 = vpop.f32.mrf.mxu1 }
 0xc3a   :  { %v6891_v51 = vld [vmem:[%s8815_s7 + $0xe8] sm:$0xff]  }
 0xc3b   :  { %v6508_v6 = vpop.f32.mrf.mxu1 }
 0xc3c   :  { %v6892_v6 = vld [vmem:[%s8815_s7 + $0x108] sm:$0xff]  }
 0xc3d   :  { %v3301_v24 = vpop.f32.mrf.mxu1 }
 0xc3e   :  { %v3307_v26 = vpack.c.bf16 %v3301_v24, %v3301_v24  ;;  %v6893_v24 = vld [vmem:[%s8815_s7 + $0xe0] sm:$0xff]  }
 0xc3f   :  { %v6515_v27 = vpop.f32.mrf.mxu1 }
 0xc40   :  { %6526 = vmatmul.mubr.msk.bf16.vlgmr.msra.gmra.mxu0 %vm3151_vm4, %v3307_v26 }
 0xc41   :  { %6538 = vmatpush3.bf16.msra.mxu0 %v6871_v25  ;;  %v3304_v28 = vpop.f32.mrf.mxu1  ;;  %6545 = vmatprep.mubr.msk.bf16.mxu0 %vm7047_vm3, %v7046_v19  ;;  %v6894_v25 = vld [vmem:[%s8815_s7 + $0x100] sm:$0xff]  }
 0xc42   :  { %6539 = vmatprep.subr.bf16.mxu0 %v7046_v19 }
 0xc43   :  { %v6516_v30 = vpop.f32.mrf.mxu1 }
 0xc45   :  { %6540 = vmatpush3.bf16.msra.mxu0 %v6873_v29  ;;  %v3424_v31 = vpop.f32.mrf.mxu1 }
 0xc46   :  { %6541 = vmatprep.subr.bf16.mxu0 %v7046_v19  ;;  %v3430_v61 = vpack.c.bf16 %v3424_v31, %v3424_v31 }
 0xc47   :  { %v6535_v33 = vpop.f32.mrf.mxu1 }
 0xc49   :  { %6542 = vmatpush3.bf16.msra.mxu0 %v6875_v32  ;;  %v3427_v34 = vpop.f32.mrf.mxu1 }
 0xc4a   :  { %6543 = vmatprep.subr.bf16.mxu0 %v7046_v19 }
 0xc4b   :  { %v6536_v38 = vpop.f32.mrf.mxu1 }
 0xc4d   :  { %6544 = vmatpush3.bf16.msra.mxu0 %v6877_v37  ;;  %v3547_v40 = vpop.f32.mrf.mxu1 }
 0xc4e   :  { %v3553_v8 = vpack.c.bf16 %v3547_v40, %v3547_v40  ;;  %6569 = vmatprep.subr.bf16.mxu0 %v7046_v19 }
 0xc4f   :  { %v6555_v50 = vpop.f32.mrf.mxu1 }
 0xc50   :  { %6546 = vmatmul.mubr.msk.bf16.vlgmr.msra.gmra.mxu0 %vm3151_vm4, %v3430_v61  ;;  %6566 = vmatmul.mubr.msk.bf16.vlgmr.msra.gmra.mxu1 %vm3151_vm4, %v3553_v8 }
 0xc51   :  { %6570 = vmatpush3.bf16.msra.mxu0 %v8183_v14  ;;  %6590 = vmatpush3.bf16.msra.mxu1 %v8183_v14  ;;  %v3550_v59 = vpop.f32.mrf.mxu1 }
 0xc52   :  { %6571 = vmatprep.subr.bf16.mxu0 %v7046_v19  ;;  %6591 = vmatprep.subr.bf16.mxu1 %v7046_v19 }
 0xc53   :  { %6573 = vmatprep.mubr.msk.bf16.mxu0 %vm7047_vm3, %v7046_v19  ;;  %6593 = vmatprep.mubr.msk.bf16.mxu1 %vm7047_vm3, %v7046_v19  ;;  %v6556_v5 = vpop.f32.mrf.mxu1 }
 0xc55   :  { %6572 = vmatpush3.bf16.msra.mxu0 %v8185_v23  ;;  %6592 = vmatpush3.bf16.msra.mxu1 %v8185_v23 }
 0xc56   :  { %6577 = vmatprep.subr.bf16.mxu0 %v7046_v19  ;;  %6597 = vmatprep.subr.bf16.mxu1 %v7046_v19 }
 0xc58   :  { %6574 = vmatmul.mubr.msk.bf16.vlgmr.msra.gmra.mxu0 %vm695_vm2, %v5838_v20  ;;  %6594 = vmatmul.mubr.msk.bf16.vlgmr.msra.gmra.mxu1 %vm695_vm2, %v5853_v48 }
 0xc59   :  { %6585 = vmatprep.mubr.msk.bf16.mxu0 %vm7047_vm3, %v7046_v19  ;;  %6605 = vmatprep.mubr.msk.bf16.mxu1 %vm7047_vm3, %v7046_v19 }
 0xc5a   :  { %6578 = vmatpush3.bf16.msra.mxu0 %v6879_v62  ;;  %6598 = vmatpush3.bf16.msra.mxu1 %v6880_v0  ;;  %v6895_v0 = vld [vmem:[%s8818_s10 + $0xe0] ss:$16 sps:$4 sm:$0xff]  }
 0xc5b   :  { %6579 = vmatprep.subr.bf16.mxu0 %v7046_v19  ;;  %6599 = vmatprep.subr.bf16.mxu1 %v7046_v19 }
 0xc5e   :  { %6580 = vmatpush3.bf16.msra.mxu0 %v6881_v39  ;;  %6600 = vmatpush3.bf16.msra.mxu1 %v6882_v49  ;;  %v6897_v39 = vld [vmem:[%s8818_s10 + $0xe4] ss:$16 sps:$4 sm:$0xff]  }
 0xc5f   :  { %6581 = vmatprep.subr.bf16.mxu0 %v7046_v19  ;;  %6601 = vmatprep.subr.bf16.mxu1 %v7046_v19  ;;  %v6903_v49 = vld [vmem:[%s8818_s10 + $0xc4] ss:$16 sps:$4 sm:$0xff]  }
 0xc62   :  { %6582 = vmatpush3.bf16.msra.mxu0 %v6883_v41  ;;  %6602 = vmatpush3.bf16.msra.mxu1 %v6884_v42  ;;  %v6901_v41 = vld [vmem:[%s8818_s10 + $0xc0] ss:$16 sps:$4 sm:$0xff]  }
 0xc63   :  { %6583 = vmatprep.subr.bf16.mxu0 %v7046_v19  ;;  %6603 = vmatprep.subr.bf16.mxu1 %v7046_v19 }
 0xc66   :  { %6584 = vmatpush3.bf16.msra.mxu0 %v6885_v44  ;;  %6604 = vmatpush3.bf16.msra.mxu1 %v6886_v47 }
 0xc67   :  { %6609 = vmatprep.subr.bf16.mxu0 %v7046_v19  ;;  %6629 = vmatprep.subr.bf16.mxu1 %v7046_v19 }
 0xd00   :  { %v3378_v52 = vpop.f32.mrf.mxu0 }
 0xd01   :  { %v3384_v53 = vadd.f32 %v3378_v52, %v8307_v21  ;;  %v6888_v21 = vld [vmem:[%s8815_s7 + $0x118] sm:$0xff]   ;;  %v5898_v52 = vld [vmem:[%s8816_s8] ss:$0 sm:$0xff] }
 0xd02   :  { %v6527_v54 = vpop.f32.mrf.mxu0 }
 0xd04   :  { %v3381_v63 = vpop.f32.mrf.mxu0 }
 0xd06   :  { %v6528_v3 = vpop.f32.mrf.mxu0 }
 0xd10   :  { %v3501_v55 = vpop.f32.mrf.mxu0  ;;  %v3624_v10 = vpop.f32.mrf.mxu1 }
 0xd11   :  { %v3507_v35 = vadd.f32 %v3501_v55, %v3384_v53 }
 0xd12   :  { %v6547_v60 = vpop.f32.mrf.mxu0  ;;  %v6567_v11 = vpop.f32.mrf.mxu1 }
 0xd13   :  { %v3630_v1 = vadd.f32 %v3624_v10, %v3507_v35 }
 0xd14   :  { %v3504_v12 = vpop.f32.mrf.mxu0  ;;  %v3627_v4 = vpop.f32.mrf.mxu1 }
 0xd15   :  { %v4133_v4 = vld [vmem:[%s8817_s9] sm:$0x1] }
 0xd16   :  { %v6548_v7 = vpop.f32.mrf.mxu0  ;;  %v6568_v9 = vpop.f32.mrf.mxu1 }
 0xd17   :  { %v6900_v7 = vld [vmem:[%s8818_s10 + $0xec] ss:$16 sps:$4 sm:$0xff]   ;;  %v5900_v9 = vld [vmem:[%s8817_s9 + $0x1] sm:$0x1] }
 0xd18   :  { %v3670_v36 = vpop.f32.mrf.mxu0  ;;  %v3793_v13 = vpop.f32.mrf.mxu1 }
 0xd19   :  { %v3676_v46 = vpack.c.bf16 %v3670_v36, %v3670_v36  ;;  %v3799_v15 = vpack.c.bf16 %v3793_v13, %v3793_v13  ;;  %v6898_v36 = vld [vmem:[%s8818_s10 + $0xe8] ss:$16 sps:$4 sm:$0xff]   ;;  %v6906_v13 = vld [vmem:[%s8818_s10 + $0xcc] ss:$16 sps:$4 sm:$0xff]  }
 0xd1a   :  { %v6575_v2 = vpop.f32.mrf.mxu0  ;;  %v6595_v58 = vpop.f32.mrf.mxu1 }
 0xd1b   :  { %6586 = vmatmul.mubr.msk.bf16.vlgmr.msra.gmra.mxu0 %vm3151_vm4, %v3676_v46  ;;  %6606 = vmatmul.mubr.msk.bf16.vlgmr.msra.gmra.mxu1 %vm3151_vm4, %v3799_v15  ;;  %v6904_v46 = vld [vmem:[%s8818_s10 + $0xc8] ss:$16 sps:$4 sm:$0xff]   ;;  %v6909_v15 = vld [vmem:[%s8818_s10 + $0xa4] ss:$16 sps:$4 sm:$0xff]   ;;  %v6912_v2 = vld [vmem:[%s8818_s10 + $0xac] ss:$16 sps:$4 sm:$0xff]  }
 0xd1c   :  { %6610 = vmatpush3.bf16.msra.mxu0 %v8183_v14  ;;  %6630 = vmatpush3.bf16.msra.mxu1 %v8183_v14  ;;  %v3673_v56 = vpop.f32.mrf.mxu0  ;;  %v3796_v16 = vpop.f32.mrf.mxu1  ;;  %v5883_v14 = vld [vmem:[%s8814_s6 + $0x20] sm:$0xf] }
 0xd1d   :  { %6611 = vmatprep.subr.bf16.mxu0 %v7046_v19  ;;  %6631 = vmatprep.subr.bf16.mxu1 %v7046_v19  ;;  %v6907_v58 = vld [vmem:[%s8818_s10 + $0xa0] ss:$16 sps:$4 sm:$0xff]   ;;  %v6910_v56 = vld [vmem:[%s8818_s10 + $0xa8] ss:$16 sps:$4 sm:$0xff]   ;;  %v6915_v16 = vld [vmem:[%s8818_s10 + $0x84] ss:$16 sps:$4 sm:$0xff]  }
 0xd1e   :  { %6613 = vmatprep.mubr.msk.bf16.mxu0 %vm7047_vm3, %v7046_v19  ;;  %6633 = vmatprep.mubr.msk.bf16.mxu1 %vm7047_vm3, %v7046_v19  ;;  %v6576_v17 = vpop.f32.mrf.mxu0  ;;  %v6596_v45 = vpop.f32.mrf.mxu1 }
 0xd1f   :  { %v6918_v17 = vld [vmem:[%s8818_s10 + $0x8c] ss:$16 sps:$4 sm:$0xff]   ;;  %v6913_v45 = vld [vmem:[%s8818_s10 + $0x80] ss:$16 sps:$4 sm:$0xff]  }
 0xd20   :  { %6612 = vmatpush3.bf16.msra.mxu0 %v8185_v23  ;;  %6632 = vmatpush3.bf16.msra.mxu1 %v8185_v23  ;;  %v6889_v23 = vld [vmem:[%s8815_s7 + $0xf0] sm:$0xff]  }
 0xd21   :  { %6617 = vmatprep.subr.bf16.mxu0 %v7046_v19  ;;  %6637 = vmatprep.subr.bf16.mxu1 %v7046_v19 }
 0xd23   :  { %6614 = vmatmul.mubr.msk.bf16.vlgmr.msra.gmra.mxu0 %vm695_vm2, %v5868_v18  ;;  %6634 = vmatmul.mubr.msk.bf16.vlgmr.msra.gmra.mxu1 %vm695_vm2, %v5883_v14  ;;  %v6916_v18 = vld [vmem:[%s8818_s10 + $0x88] ss:$16 sps:$4 sm:$0xff]   ;;  %v6921_v14 = vld [vmem:[%s8818_s10 + $0x64] ss:$16 sps:$4 sm:$0xff]  }
 0xd24   :  { %6618 = vmatpush3.bf16.msra.mxu0 %v6887_v57  ;;  %6638 = vmatpush3.bf16.msra.mxu1 %v6888_v21  ;;  %v6924_v57 = vld [vmem:[%s8818_s10 + $0x6c] ss:$16 sps:$4 sm:$0xff]  }
 0xd25   :  { %6619 = vmatprep.subr.bf16.mxu0 %v7046_v19  ;;  %6639 = vmatprep.subr.bf16.mxu1 %v7046_v19 }
 0xd26   :  { %6625 = vmatprep.mubr.msk.bf16.mxu0 %vm7047_vm3, %v7046_v19  ;;  %6645 = vmatprep.mubr.msk.bf16.mxu1 %vm7047_vm3, %v7046_v19 }
 0xd28   :  { %6620 = vmatpush3.bf16.msra.mxu0 %v6889_v23  ;;  %6640 = vmatpush3.bf16.msra.mxu1 %v6890_v22 }
 0xd29   :  { %6621 = vmatprep.subr.bf16.mxu0 %v7046_v19  ;;  %6641 = vmatprep.subr.bf16.mxu1 %v7046_v19 }
 0xd2c   :  { %6622 = vmatpush3.bf16.msra.mxu0 %v6891_v51  ;;  %6642 = vmatpush3.bf16.msra.mxu1 %v6892_v6 }
 0xd2d   :  { %6623 = vmatprep.subr.bf16.mxu0 %v7046_v19  ;;  %6643 = vmatprep.subr.bf16.mxu1 %v7046_v19 }
 0xd30   :  { %6624 = vmatpush3.bf16.msra.mxu0 %v6893_v24  ;;  %6644 = vmatpush3.bf16.msra.mxu1 %v6894_v25  ;;  %v6919_v24 = vld [vmem:[%s8818_s10 + $0x60] ss:$16 sps:$4 sm:$0xff]   ;;  %v6922_v25 = vld [vmem:[%s8818_s10 + $0x68] ss:$16 sps:$4 sm:$0xff]  }
 0xd31   :  { %6649 = vmatprep.subr.bf16.mxu0 %v7046_v19  ;;  %4352 = vmatprep.subr.bf16.mxu1 %v6897_v39  ;;  %v6948_v39 = vld [vmem:[%s8818_s10 + $0x16c] ss:$16 sps:$4 sm:$0xff]  }
 0xddb   :  { %v3747_v26 = vpop.f32.mrf.mxu0  ;;  %v3870_v27 = vpop.f32.mrf.mxu1 }
 0xddc   :  { %v3753_v28 = vadd.f32 %v3747_v26, %v3630_v1 }
 0xddd   :  { %v6587_v29 = vpop.f32.mrf.mxu0  ;;  %v6607_v30 = vpop.f32.mrf.mxu1 }
 0xdde   :  { %v3876_v31 = vadd.f32 %v3870_v27, %v3753_v28  ;;  %v6927_v27 = vld [vmem:[%s8818_s10 + $0x44] ss:$16 sps:$4 sm:$0xff]   ;;  %v6930_v28 = vld [vmem:[%s8818_s10 + $0x4c] ss:$16 sps:$4 sm:$0xff]   ;;  %v6925_v30 = vld [vmem:[%s8818_s10 + $0x40] ss:$16 sps:$4 sm:$0xff]  }
 0xddf   :  { %v3750_v32 = vpop.f32.mrf.mxu0  ;;  %v3873_v33 = vpop.f32.mrf.mxu1 }
 0xde0   :  { %v6933_v33 = vld [vmem:[%s8818_s10 + $0x24] ss:$16 sps:$4 sm:$0xff]  }
 0xde1   :  { %v6588_v34 = vpop.f32.mrf.mxu0  ;;  %v6608_v37 = vpop.f32.mrf.mxu1 }
 0xde2   :  { %v6936_v34 = vld [vmem:[%s8818_s10 + $0x2c] ss:$16 sps:$4 sm:$0xff]  }
 0xde3   :  { %v3916_v38 = vpop.f32.mrf.mxu0  ;;  %v4039_v40 = vpop.f32.mrf.mxu1 }
 0xde4   :  { %v3922_v61 = vpack.c.bf16 %v3916_v38, %v3916_v38  ;;  %v4045_v8 = vpack.c.bf16 %v4039_v40, %v4039_v40  ;;  %v6931_v38 = vld [vmem:[%s8818_s10 + $0x20] ss:$16 sps:$4 sm:$0xff]   ;;  %v6934_v40 = vld [vmem:[%s8818_s10 + $0x28] ss:$16 sps:$4 sm:$0xff]  }
 0xde5   :  { %v6615_v50 = vpop.f32.mrf.mxu0  ;;  %v6635_v59 = vpop.f32.mrf.mxu1 }
 0xde6   :  { %6626 = vmatmul.mubr.msk.bf16.vlgmr.msra.gmra.mxu0 %vm3151_vm4, %v3922_v61  ;;  %6646 = vmatmul.mubr.msk.bf16.vlgmr.msra.gmra.mxu1 %vm3151_vm4, %v4045_v8  ;;  %v6939_v61 = vld [vmem:[%s8818_s10 + $0x4] ss:$16 sps:$4 sm:$0xff]   ;;  %v6942_v8 = vld [vmem:[%s8818_s10 + $0xc] ss:$16 sps:$4 sm:$0xff]   ;;  %v6937_v50 = vld [vmem:[%s8818_s10] ss:$16 sps:$4 sm:$0xff]  }
 0xde7   :  { %v3919_v5 = vpop.f32.mrf.mxu0  ;;  %v4042_v20 = vpop.f32.mrf.mxu1  ;;  %6651 = vmatprep.mubr.msk.bf16.mxu0 %vm7047_vm3, %v7046_v19  ;;  %4376 = vmatprep.mubr.bf16.mxu1 %v7045_v43  ;;  %v6940_v59 = vld [vmem:[%s8818_s10 + $0x8] ss:$16 sps:$4 sm:$0xff]  }
 0xde8   :  { %4353 = vmatpush1.bf16.msra.mxu1 %v6895_v0  ;;  %v5954_v20 = vld [vmem:[%s8817_s9 + $0x2] sm:$0x1]  ;;  %v6946_v0 = vld [vmem:[%s8818_s10 + $0x168] ss:$16 sps:$4 sm:$0xff]  }
 0xde9   :  { %v6616_v48 = vpop.f32.mrf.mxu0  ;;  %v6636_v62 = vpop.f32.mrf.mxu1  ;;  %4354 = vmatprep.subr.bf16.mxu1 %v6903_v49  ;;  %v6949_v49 = vld [vmem:[%s8818_s10 + $0x140] ss:$16 sps:$4 sm:$0xff]  }
 0xdea   :  { %v6943_v48 = vld [vmem:[%s8818_s10 + $0x160] ss:$16 sps:$4 sm:$0xff]   ;;  %v6945_v62 = vld [vmem:[%s8818_s10 + $0x164] ss:$16 sps:$4 sm:$0xff]  }
 0xdec   :  { %4355 = vmatpush1.bf16.msra.mxu1 %v6901_v41  ;;  %v6951_v41 = vld [vmem:[%s8818_s10 + $0x144] ss:$16 sps:$4 sm:$0xff]  }
 0xded   :  { %4356 = vmatprep.subr.bf16.mxu1 %v6909_v15 }
 0xdf0   :  { %4357 = vmatpush1.bf16.msra.mxu1 %v6907_v58 }
 0xdf1   :  { %4358 = vmatprep.subr.bf16.mxu1 %v6915_v16 }
 0xdf4   :  { %4359 = vmatpush1.bf16.msra.mxu1 %v6913_v45 }
 0xdf5   :  { %4517 = vmatprep.subr.bf16.mxu1 %v6921_v14 }
 0xea6   :  { %v3993_v42 = vpop.f32.mrf.mxu0  ;;  %v4116_v44 = vpop.f32.mrf.mxu1 }
 0xea7   :  { %v3999_v47 = vadd.f32 %v3993_v42, %v3876_v31  ;;  %v6928_v31 = vld [vmem:[%s8818_s10 + $0x48] ss:$16 sps:$4 sm:$0xff]  }
 0xea8   :  { %v6627_v53 = vpop.f32.mrf.mxu0  ;;  %v6647_v54 = vpop.f32.mrf.mxu1  ;;  %v6952_v42 = vld [vmem:[%s8818_s10 + $0x148] ss:$16 sps:$4 sm:$0xff]  }
 0xea9   :  { %v4122_v63 = vadd.f32 %v4116_v44, %v3999_v47  ;;  %v6954_v44 = vld [vmem:[%s8818_s10 + $0x14c] ss:$16 sps:$4 sm:$0xff]   ;;  %v6957_v47 = vld [vmem:[%s8818_s10 + $0x124] ss:$16 sps:$4 sm:$0xff]   ;;  %v6958_v54 = vld [vmem:[%s8818_s10 + $0x128] ss:$16 sps:$4 sm:$0xff]  }
 0xeaa   :  { %v3996_v3 = vpop.f32.mrf.mxu0  ;;  %v4119_v55 = vpop.f32.mrf.mxu1  ;;  %v6960_v53 = vld [vmem:[%s8818_s10 + $0x12c] ss:$16 sps:$4 sm:$0xff]  }
 0xeab   :  { %v4130_v10 = vadd.f32 %v5898_v52, %v4122_v63  ;;  %v6955_v52 = vld [vmem:[%s8818_s10 + $0x120] ss:$16 sps:$4 sm:$0xff]   ;;  %v6963_v63 = vld [vmem:[%s8818_s10 + $0x104] ss:$16 sps:$4 sm:$0xff]   ;;  %v6966_v55 = vld [vmem:[%s8818_s10 + $0x10c] ss:$16 sps:$4 sm:$0xff]  }
 0xeac   :  { %v6628_v35 = vpop.f32.mrf.mxu0  ;;  %v6648_v60 = vpop.f32.mrf.mxu1  ;;  %v6961_v3 = vld [vmem:[%s8818_s10 + $0x100] ss:$16 sps:$4 sm:$0xff]  }
 0xead   :  { %v4131_v11 = vmax.f32 %v4130_v10, 0.0  ;;  %v6964_v10 = vld [vmem:[%s8818_s10 + $0x108] ss:$16 sps:$4 sm:$0xff]   ;;  %v6969_v35 = vld [vmem:[%s8818_s10 + $0x1e4] ss:$16 sps:$4 sm:$0xff]  }
 0xeaf   :  { %v4132_v1 = vpack.c.bf16 %v4131_v11, %v4131_v11 }
 0xeb1   :  { %v8465_v12 = vsel %vm539_vm1, %v4132_v1, 0 }
 0xeb2   :  { %6650 = vmatpush3.bf16.msra.mxu0 %v8465_v12 }
 0xeb3   :  { %6655 = vmatprep.subr.bf16.mxu0 %v7046_v19 }
 0xeb5   :  { %6652 = vmatmul.mubr.msk.bf16.vlgmr.msra.gmra.mxu0 %vm4134_vm5, %v4133_v4 }
 0xeb6   :  { %6656 = vmatpush3.bf16.msra.mxu0 %v8465_v12  ;;  %6657 = vmatprep.mubr.msk.bf16.mxu0 %vm7047_vm3, %v7046_v19 }
 0xeb7   :  { %4393 = vmatprep.subr.bf16.mxu0 %v6900_v7 }
 0xebd   :  { %6658 = vmatmul.mubr.msk.bf16.vlgmr.msra.gmra.mxu0 %vm4134_vm5, %v5900_v9 }
 0xebe   :  { %4394 = vmatpush1.bf16.msra.mxu0 %v6898_v36  ;;  %4417 = vmatprep.mubr.bf16.mxu0 %v7045_v43 }
 0xebf   :  { %4395 = vmatprep.subr.bf16.mxu0 %v6906_v13 }
 0xec2   :  { %4396 = vmatpush1.bf16.msra.mxu0 %v6904_v46 }
 0xec3   :  { %4397 = vmatprep.subr.bf16.mxu0 %v6912_v2 }
 0xec6   :  { %4398 = vmatpush1.bf16.msra.mxu0 %v6910_v56 }
 0xec7   :  { %4399 = vmatprep.subr.bf16.mxu0 %v6918_v17 }
 0xeca   :  { %4400 = vmatpush1.bf16.msra.mxu0 %v6916_v18 }
 0xecb   :  { %4558 = vmatprep.subr.bf16.mxu0 %v6924_v57 }
 0xf75   :  { %v4175_v21 = vpop.f32.mrf.mxu0 }
 0xf76   :  { %v4181_v5 = vpack.c.bf16 %v4175_v21, %v4175_v21 }
 0xf77   :  { %v6653_v23 = vpop.f32.mrf.mxu0 }
 0xf79   :  { %v4178_v22 = vpop.f32.mrf.mxu0 }
 0xf7b   :  { %v6654_v51 = vpop.f32.mrf.mxu0 }
 0xf7c   :  { %v6967_v51 = vld [vmem:[%s8818_s10 + $0x1e0] ss:$16 sps:$4 sm:$0xff]  }
 0xf7d   :  { %v4237_v6 = vpop.f32.mrf.mxu0 }
 0xf7e   :  { %v4243_v26 = vpack.c.bf16 %v4237_v6, %v4237_v6  ;;  %v6972_v6 = vld [vmem:[%s8818_s10 + $0x1ec] ss:$16 sps:$4 sm:$0xff]  }
 0xf7f   :  { %v6659_v29 = vpop.f32.mrf.mxu0 }
 0xf80   :  { %5934 = vmatmul.mubr.msk.bf16.vlgmr.msra.gmra.mxu1 %vm3151_vm4, %v4243_v26  ;;  %5935 = vmatmul.mubr.msk.bf16.vlgmr.msra.gmra.mxu0 %vm3151_vm4, %v4243_v26  ;;  %v5990_v29 = vld [vmem:[%s8817_s9 + $0x3] sm:$0x1] }
 0xf81   :  { %4518 = vmatpush1.bf16.msra.mxu1 %v6919_v24  ;;  %4559 = vmatpush1.bf16.msra.mxu0 %v6922_v25  ;;  %v4240_v32 = vpop.f32.mrf.mxu0  ;;  %v6975_v25 = vld [vmem:[%s8818_s10 + $0x1c4] ss:$16 sps:$4 sm:$0xff]  }
 0xf82   :  { %4519 = vmatprep.subr.bf16.mxu1 %v6927_v27  ;;  %4560 = vmatprep.subr.bf16.mxu0 %v6930_v28  ;;  %v6973_v27 = vld [vmem:[%s8818_s10 + $0x1c0] ss:$16 sps:$4 sm:$0xff]   ;;  %v6984_v32 = vld [vmem:[%s8818_s10 + $0x1ac] ss:$16 sps:$4 sm:$0xff]  }
 0xf83   :  { %4541 = vmatprep.mubr.bf16.mxu1 %v7045_v43  ;;  %4582 = vmatprep.mubr.bf16.mxu0 %v7045_v43  ;;  %v6660_v37 = vpop.f32.mrf.mxu0 }
 0xf84   :  { %v6987_v37 = vld [vmem:[%s8818_s10 + $0x184] ss:$16 sps:$4 sm:$0xff]  }
 0xf85   :  { %4520 = vmatpush1.bf16.msra.mxu1 %v6925_v30  ;;  %4561 = vmatpush1.bf16.msra.mxu0 %v6928_v31  ;;  %v6976_v30 = vld [vmem:[%s8818_s10 + $0x1c8] ss:$16 sps:$4 sm:$0xff]   ;;  %v6981_v31 = vld [vmem:[%s8818_s10 + $0x1a4] ss:$16 sps:$4 sm:$0xff]  }
 0xf86   :  { %4521 = vmatprep.subr.bf16.mxu1 %v6933_v33  ;;  %4562 = vmatprep.subr.bf16.mxu0 %v6936_v34  ;;  %v6979_v33 = vld [vmem:[%s8818_s10 + $0x1a0] ss:$16 sps:$4 sm:$0xff]   ;;  %v6982_v34 = vld [vmem:[%s8818_s10 + $0x1a8] ss:$16 sps:$4 sm:$0xff]  }
 0xf89   :  { %4522 = vmatpush1.bf16.msra.mxu1 %v6931_v38  ;;  %4563 = vmatpush1.bf16.msra.mxu0 %v6934_v40  ;;  %v6988_v38 = vld [vmem:[%s8818_s10 + $0x188] ss:$16 sps:$4 sm:$0xff]   ;;  %v6990_v40 = vld [vmem:[%s8818_s10 + $0x18c] ss:$16 sps:$4 sm:$0xff]  }
 0xf8a   :  { %4523 = vmatprep.subr.bf16.mxu1 %v6939_v61  ;;  %4564 = vmatprep.subr.bf16.mxu0 %v6942_v8  ;;  %v6991_v61 = vld [vmem:[%s8820_s12 + $0x78] sm:$0xff]  }
 0xf8b   :  { %v6992_v8 = vld [vmem:[%s8820_s12 + $0xf8] sm:$0xff]  }
 0xf8d   :  { %4524 = vmatpush1.bf16.msra.mxu1 %v6937_v50  ;;  %4565 = vmatpush1.bf16.msra.mxu0 %v6940_v59 }
 0xf8e   :  { %6661 = vmatprep.subr.bf16.mxu1 %v7046_v19  ;;  %4745 = vmatprep.subr.bf16.mxu0 %v6945_v62 }
 0xf90   :  { %5952 = vmatmul.mubr.msk.bf16.vlgmr.msra.gmra.mxu1 %vm3151_vm4, %v4181_v5  ;;  %5953 = vmatmul.mubr.msk.bf16.vlgmr.msra.gmra.mxu0 %vm3151_vm4, %v4181_v5 }
 0xf91   :  { %6662 = vmatpush3.bf16.msra.mxu1 %v8465_v12  ;;  %6663 = vmatprep.mubr.msk.bf16.mxu1 %vm7047_vm3, %v7046_v19 }
 0xf92   :  { %4769 = vmatprep.mubr.bf16.mxu0 %v7045_v43  ;;  %4746 = vmatpush1.bf16.msra.mxu0 %v6943_v48 }
 0xf93   :  { %4786 = vmatprep.subr.bf16.mxu1 %v6948_v39  ;;  %4747 = vmatprep.subr.bf16.mxu0 %v6951_v41 }
 0xf96   :  { %4748 = vmatpush1.bf16.msra.mxu0 %v6949_v49 }
 0xf97   :  { %4749 = vmatprep.subr.bf16.mxu0 %v6957_v47 }
 0xf98   :  { %6664 = vmatmul.mubr.msk.bf16.vlgmr.msra.gmra.mxu1 %vm4134_vm5, %v5954_v20 }
 0xf99   :  { %4810 = vmatprep.mubr.bf16.mxu1 %v7045_v43  ;;  %4787 = vmatpush1.bf16.msra.mxu1 %v6946_v0 }
 0xf9a   :  { %4788 = vmatprep.subr.bf16.mxu1 %v6954_v44  ;;  %4750 = vmatpush1.bf16.msra.mxu0 %v6955_v52  ;;  %v6993_v52 = vld [vmem:[%s8820_s12 + $0x38] sm:$0xff]  }
 0xf9b   :  { %4751 = vmatprep.subr.bf16.mxu0 %v6963_v63  ;;  %v6995_v63 = vld [vmem:[%s8820_s12 + $0x70] sm:$0xff]  }
 0xf9d   :  { %4789 = vmatpush1.bf16.msra.mxu1 %v6952_v42 }
 0xf9e   :  { %4790 = vmatprep.subr.bf16.mxu1 %v6960_v53  ;;  %4752 = vmatpush1.bf16.msra.mxu0 %v6961_v3  ;;  %v6994_v53 = vld [vmem:[%s8820_s12 + $0xb8] sm:$0xff]   ;;  %v6996_v3 = vld [vmem:[%s8820_s12 + $0xf0] sm:$0xff]  }
 0xf9f   :  { %6667 = vmatprep.subr.bf16.mxu0 %v7046_v19 }
 0xfa1   :  { %4791 = vmatpush1.bf16.msra.mxu1 %v6958_v54 }
 0xfa2   :  { %4792 = vmatprep.subr.bf16.mxu1 %v6966_v55 }
 0xfa5   :  { %4793 = vmatpush1.bf16.msra.mxu1 %v6964_v10 }
 0xfa6   :  { %4977 = vmatprep.subr.bf16.mxu1 %v6969_v35  ;;  %v6997_v35 = vld [vmem:[%s8820_s12 + $0x30] sm:$0xff]  }
0x1040   :  { %v4378_v60 = vpop.f32.mrf.mxu1  ;;  %v4419_v11 = vpop.f32.mrf.mxu0 }
0x1042   :  { %v4380_v1 = vpop.f32.mrf.mxu1  ;;  %v4421_v4 = vpop.f32.mrf.mxu0 }
0x1044   :  { %v4382_v7 = vpop.f32.mrf.mxu1  ;;  %v4423_v9 = vpop.f32.mrf.mxu0 }
0x1045   :  { %v7001_v7 = vld [vmem:[%s8820_s12 + $0x28] sm:$0xff]  }
0x1046   :  { %v4383_v36 = vpop.f32.mrf.mxu1  ;;  %v4424_v13 = vpop.f32.mrf.mxu0  ;;  %v7002_v9 = vld [vmem:[%s8820_s12 + $0xa8] sm:$0xff]  }
0x1047   :  { %v7003_v36 = vld [vmem:[%s8820_s12 + $0x60] sm:$0xff]  }
0x1048   :  { %v7004_v13 = vld [vmem:[%s8820_s12 + $0xe0] sm:$0xff]  }
0x1050   :  { %v4543_v46 = vpop.f32.mrf.mxu1  ;;  %v4584_v15 = vpop.f32.mrf.mxu0 }
0x1051   :  { %v4544_v2 = vadd.f32 %v4543_v46, %v4378_v60  ;;  %v4585_v58 = vadd.f32 %v4584_v15, %v4419_v11  ;;  %v6998_v60 = vld [vmem:[%s8820_s12 + $0xb0] sm:$0xff]   ;;  %v6999_v11 = vld [vmem:[%s8820_s12 + $0x68] sm:$0xff]   ;;  %v7005_v46 = vld [vmem:[%s8820_s12 + $0x20] sm:$0xff]  }
0x1052   :  { %v4545_v56 = vpop.f32.mrf.mxu1  ;;  %v4586_v16 = vpop.f32.mrf.mxu0  ;;  %v7006_v15 = vld [vmem:[%s8820_s12 + $0xa0] sm:$0xff]  }
0x1053   :  { %v4546_v17 = vadd.f32 %v4545_v56, %v4380_v1  ;;  %v4587_v45 = vadd.f32 %v4586_v16, %v4421_v4  ;;  %v7000_v1 = vld [vmem:[%s8820_s12 + $0xe8] sm:$0xff]   ;;  %v7009_v56 = vld [vmem:[%s8820_s12 + $0x18] sm:$0xff]  }
0x1054   :  { %v4547_v18 = vpop.f32.mrf.mxu1  ;;  %v4588_v14 = vpop.f32.mrf.mxu0  ;;  %v7010_v16 = vld [vmem:[%s8820_s12 + $0x98] sm:$0xff]  }
0x1055   :  { %v7013_v18 = vld [vmem:[%s8820_s12 + $0x10] sm:$0xff]  }
0x1056   :  { %v4548_v57 = vpop.f32.mrf.mxu1  ;;  %v4589_v21 = vpop.f32.mrf.mxu0  ;;  %v7014_v14 = vld [vmem:[%s8820_s12 + $0x90] sm:$0xff]  }
0x1057   :  { %v7015_v57 = vld [vmem:[%s8820_s12 + $0x48] sm:$0xff]  }
0x1058   :  { %v4630_v23 = vpop.f32.mrf.mxu1  ;;  %v7016_v21 = vld [vmem:[%s8820_s12 + $0xc8] sm:$0xff]  }
0x1059   :  { %v4636_v22 = vpack.c.bf16 %v4630_v23, %v4630_v23  ;;  %v7017_v23 = vld [vmem:[%s8820_s12 + $0x8] sm:$0xff]  }
0x105a   :  { %v6665_v24 = vpop.f32.mrf.mxu1 }
0x105b   :  { %5988 = vmatmul.mubr.msk.bf16.vlgmr.msra.gmra.mxu0 %vm3151_vm4, %v4636_v22  ;;  %5989 = vmatmul.mubr.msk.bf16.vlgmr.msra.gmra.mxu1 %vm3151_vm4, %v4636_v22  ;;  %v7018_v22 = vld [vmem:[%s8820_s12 + $0x88] sm:$0xff]   ;;  %v7021_v24 = vld [vmem:[%s8820_s12] sm:$0xff]  }
0x105c   :  { %6668 = vmatpush3.bf16.msra.mxu0 %v8465_v12  ;;  %6669 = vmatprep.mubr.msk.bf16.mxu0 %vm7047_vm3, %v7046_v19  ;;  %v4633_v26 = vpop.f32.mrf.mxu1  ;;  %v6970_v12 = vld [vmem:[%s8818_s10 + $0x1e8] ss:$16 sps:$4 sm:$0xff]   ;;  %v6978_v19 = vld [vmem:[%s8818_s10 + $0x1cc] ss:$16 sps:$4 sm:$0xff]  }
0x105d   :  { %5018 = vmatprep.subr.bf16.mxu0 %v6972_v6  ;;  %4978 = vmatpush1.bf16.msra.mxu1 %v6967_v51  ;;  %v7019_v51 = vld [vmem:[%s8820_s12 + $0x40] sm:$0xff]   ;;  %v5057_v26 = vlaneseq }
0x105e   :  { %v6666_v28 = vpop.f32.mrf.mxu1  ;;  %4979 = vmatprep.subr.bf16.mxu1 %v6975_v25  ;;  %5001 = vmatprep.mubr.bf16.mxu1 %v7045_v43  ;;  %v7020_v6 = vld [vmem:[%s8820_s12 + $0xc0] sm:$0xff]  }
0x105f   :  { %v7022_v25 = vld [vmem:[%s8820_s12 + $0x80] sm:$0xff]  }
0x1061   :  { %4980 = vmatpush1.bf16.msra.mxu1 %v6973_v27  ;;  %v5058_v27 = vshrl.u32 %v5057_v26, 7 }
0x1062   :  { %4981 = vmatprep.subr.bf16.mxu1 %v6981_v31 }
0x1063   :  { %6670 = vmatmul.mubr.msk.bf16.vlgmr.msra.gmra.mxu0 %vm4134_vm5, %v5990_v29  ;;  %v5059_v28 = vsub.s32 0, %v5058_v27  ;;  %v5067_v29 = vsub.s32 2, %v5058_v27 }
0x1064   :  { %5019 = vmatpush1.bf16.msra.mxu0 %v6970_v12  ;;  %5042 = vmatprep.mubr.bf16.mxu0 %v7045_v43  ;;  %v6985_v43 = vld [vmem:[%s8818_s10 + $0x180] ss:$16 sps:$4 sm:$0xff]  }
0x1065   :  { %5020 = vmatprep.subr.bf16.mxu0 %v6978_v19  ;;  %4982 = vmatpush1.bf16.msra.mxu1 %v6979_v33  ;;  %v5055_v12 = vld [vmem:[%s8819_s11] sm:$0xf]  ;;  %v5063_v19 = vsub.s32 1, %v5058_v27 }
0x1066   :  { %4983 = vmatprep.subr.bf16.mxu1 %v6987_v37  ;;  %v5060_v31 = vrot.slane %v5055_v12, %v5059_v28 }
0x1068   :  { %5021 = vmatpush1.bf16.msra.mxu0 %v6976_v30  ;;  %v5071_v30 = vsub.s32 3, %v5058_v27 }
0x1069   :  { %5022 = vmatprep.subr.bf16.mxu0 %v6984_v32  ;;  %4984 = vmatpush1.bf16.msra.mxu1 %v6985_v43  ;;  %v5068_v32 = vrot.slane %v5055_v12, %v5067_v29 }
0x106a   :  { %6297 = vmatprep.subr.bf16.mxu1 %v6991_v61 }
0x106c   :  { %5023 = vmatpush1.bf16.msra.mxu0 %v6982_v34 }
0x106d   :  { %5024 = vmatprep.subr.bf16.mxu0 %v6990_v40  ;;  %v5072_v40 = vrot.slane %v5055_v12, %v5071_v30 }
0x1070   :  { %5025 = vmatpush1.bf16.msra.mxu0 %v6988_v38  ;;  %v5064_v38 = vrot.slane %v5055_v12, %v5063_v19 }
0x1071   :  { %6319 = vmatprep.subr.bf16.mxu0 %v6992_v8 }
0x111b   :  { %v4771_v50 = vpop.f32.mrf.mxu0  ;;  %v4812_v59 = vpop.f32.mrf.mxu1 }
0x111c   :  { %v8695_v5 = vadd.f32 %v4771_v50, %v4544_v2  ;;  %v8697_v20 = vadd.f32 %v4812_v59, %v4585_v58  ;;  %v7007_v2 = vld [vmem:[%s8820_s12 + $0x58] sm:$0xff]  }
0x111d   :  { %v4773_v48 = vpop.f32.mrf.mxu0  ;;  %v4814_v62 = vpop.f32.mrf.mxu1  ;;  %v7008_v58 = vld [vmem:[%s8820_s12 + $0xd8] sm:$0xff]  }
0x111e   :  { %v8699_v0 = vadd.f32 %v4773_v48, %v4546_v17  ;;  %v8701_v39 = vadd.f32 %v4814_v62, %v4587_v45  ;;  %v7011_v17 = vld [vmem:[%s8820_s12 + $0x50] sm:$0xff]  }
0x111f   :  { %v4775_v49 = vpop.f32.mrf.mxu0  ;;  %v4816_v41 = vpop.f32.mrf.mxu1  ;;  %v7012_v45 = vld [vmem:[%s8820_s12 + $0xd0] sm:$0xff]  }
0x1121   :  { %v4776_v42 = vpop.f32.mrf.mxu0  ;;  %v4817_v44 = vpop.f32.mrf.mxu1 }
0x1123   :  { %v4862_v47 = vpop.f32.mrf.mxu0 }
0x1124   :  { %v4868_v54 = vpack.c.bf16 %v4862_v47, %v4862_v47 }
0x1125   :  { %v6671_v55 = vpop.f32.mrf.mxu0 }
0x1126   :  { %6024 = vmatmul.mubr.msk.bf16.vlgmr.msra.gmra.mxu1 %vm3151_vm4, %v4868_v54  ;;  %6025 = vmatmul.mubr.msk.bf16.vlgmr.msra.gmra.mxu0 %vm3151_vm4, %v4868_v54 }
0x1127   :  { %v4865_v10 = vpop.f32.mrf.mxu0  ;;  %6298 = vmatpush3.bf16.msra.mxu1 %v6993_v52  ;;  %6320 = vmatpush3.bf16.msra.mxu0 %v6994_v53 }
0x1128   :  { %6299 = vmatprep.subr.bf16.mxu1 %v6995_v63  ;;  %6321 = vmatprep.subr.bf16.mxu0 %v6996_v3 }
0x1129   :  { %v6672_v4 = vpop.f32.mrf.mxu0 }
0x112b   :  { %6300 = vmatpush3.bf16.msra.mxu1 %v6997_v35  ;;  %6322 = vmatpush3.bf16.msra.mxu0 %v6998_v60  ;;  %v6026_v35 = vld [vmem:[%s8821_s13] ss:$0 sm:$0xff] }
0x112c   :  { %6301 = vmatprep.subr.bf16.mxu1 %v6999_v11  ;;  %6323 = vmatprep.subr.bf16.mxu0 %v7000_v1 }
0x112f   :  { %6302 = vmatpush3.bf16.msra.mxu1 %v7001_v7  ;;  %6324 = vmatpush3.bf16.msra.mxu0 %v7002_v9 }
0x1130   :  { %6303 = vmatprep.subr.bf16.mxu1 %v7003_v36  ;;  %6325 = vmatprep.subr.bf16.mxu0 %v7004_v13 }
0x1133   :  { %6304 = vmatpush3.bf16.msra.mxu1 %v7005_v46  ;;  %6326 = vmatpush3.bf16.msra.mxu0 %v7006_v15 }
0x1134   :  { %6305 = vmatprep.subr.bf16.mxu1 %v7007_v2  ;;  %6327 = vmatprep.subr.bf16.mxu0 %v7008_v58 }
0x1137   :  { %6306 = vmatpush3.bf16.msra.mxu1 %v7009_v56  ;;  %6328 = vmatpush3.bf16.msra.mxu0 %v7010_v16 }
0x1138   :  { %6307 = vmatprep.subr.bf16.mxu1 %v7011_v17  ;;  %6329 = vmatprep.subr.bf16.mxu0 %v7012_v45 }
0x113b   :  { %6308 = vmatpush3.bf16.msra.mxu1 %v7013_v18  ;;  %6330 = vmatpush3.bf16.msra.mxu0 %v7014_v14 }
0x113c   :  { %6309 = vmatprep.subr.bf16.mxu1 %v7015_v57  ;;  %6331 = vmatprep.subr.bf16.mxu0 %v7016_v21 }
0x113f   :  { %6310 = vmatpush3.bf16.msra.mxu1 %v7017_v23  ;;  %6332 = vmatpush3.bf16.msra.mxu0 %v7018_v22 }
0x1140   :  { %6311 = vmatprep.subr.bf16.mxu1 %v7019_v51  ;;  %6333 = vmatprep.subr.bf16.mxu0 %v7020_v6 }
0x1143   :  { %6312 = vmatpush3.bf16.msra.mxu1 %v7021_v24  ;;  %6334 = vmatpush3.bf16.msra.mxu0 %v7022_v25 }
0x11e6   :  { %v5003_v33 = vpop.f32.mrf.mxu1  ;;  %v5044_v34 = vpop.f32.mrf.mxu0 }
0x11e7   :  { %v5051_v43 = vadd.f32 %v5003_v33, %v8695_v5  ;;  %v5053_v37 = vadd.f32 %v5044_v34, %v8697_v20 }
0x11e8   :  { %v5005_v61 = vpop.f32.mrf.mxu1  ;;  %v5046_v8 = vpop.f32.mrf.mxu0 }
0x11e9   :  { %v5077_v50 = vadd.f32 %v5060_v31, %v5051_v43  ;;  %v5079_v59 = vadd.f32 %v5068_v32, %v5053_v37  ;;  %v5052_v48 = vadd.f32 %v5005_v61, %v8699_v0  ;;  %v5054_v62 = vadd.f32 %v5046_v8, %v8701_v39 }
0x11ea   :  { %v5007_v49 = vpop.f32.mrf.mxu1  ;;  %v5048_v41 = vpop.f32.mrf.mxu0 }
0x11eb   :  { %v5078_v42 = vadd.f32 %v5064_v38, %v5052_v48  ;;  %v5080_v44 = vadd.f32 %v5072_v40, %v5054_v62  ;;  %v5081_v47 = vmax.f32 %v5077_v50, 0.0  ;;  %v5083_v52 = vmax.f32 %v5079_v59, 0.0 }
0x11ec   :  { %v5008_v53 = vpop.f32.mrf.mxu1  ;;  %v5049_v5 = vpop.f32.mrf.mxu0 }
0x11ed   :  { %v5082_v54 = vmax.f32 %v5078_v42, 0.0  ;;  %v5084_v20 = vmax.f32 %v5080_v44, 0.0  ;;  %v5085_v55 = vpack.c.bf16 %v5081_v47, %v5081_v47  ;;  %v5087_v10 = vpack.c.bf16 %v5083_v52, %v5083_v52 }
0x11ef   :  { %v5086_v63 = vpack.c.bf16 %v5082_v54, %v5082_v54  ;;  %v5088_v3 = vpack.c.bf16 %v5084_v20, %v5084_v20 }
0x11f1   :  { %5384 = vmatprep.mubr.bf16.mxu1 %v5086_v63  ;;  %5424 = vmatprep.mubr.bf16.mxu0 %v5088_v3 }
0x11f2   :  { %5385 = vmatmul.mubr.bf16.vlgmr.msra.gmra.mxu1 %v5085_v55  ;;  %5425 = vmatmul.mubr.bf16.vlgmr.msra.gmra.mxu0 %v5087_v10 }
0x12b2   :  { %v6313_v0 = vpop.f32.mrf.mxu1  ;;  %v6335_v39 = vpop.f32.mrf.mxu0 }
0x12b4   :  { %v6314_v60 = vpop.f32.mrf.mxu1  ;;  %v6336_v11 = vpop.f32.mrf.mxu0 }
0x12b5   :  { %v6315_v1 = vadd.f32 %v6314_v60, %v6313_v0  ;;  %v6337_v36 = vadd.f32 %v6336_v11, %v6335_v39 }
0x12b6   :  { %v6316_v4 = vpop.f32.mrf.mxu1  ;;  %v6338_v7 = vpop.f32.mrf.mxu0 }
0x12b7   :  { %v5387_v9 = vadd.f32 %v6315_v1, %v6026_v35 }
0x12b8   :  { %v6317_v13 = vpop.f32.mrf.mxu1  ;;  %v6339_v46 = vpop.f32.mrf.mxu0 }
0x12b9   :  { %v5427_v15 = vadd.f32 %v6337_v36, %v5387_v9 }
0x12bb   :  { %5433 = vst.msk [vmem:[#allocation2] sm:$0x3] %vm5432_vm6, %v5427_v15 }
0x12bc   :  { %7034 = shalt.err (!%p7031_p4)
}
0x12bd   :  { %5443 = dma.vmem_to_hbm [thread:$0]  %s5441_s15, 32, %s8822_s14, [#allocation3]  }
0x12be   :  { %7043 = dma.done.wait [#allocation3], 32  }
0x12bf   :  { %7044 = vsyncadd [#allocation3], 4294967264 }
0x12c0   :  { %5447 = vsyncpa [#allocation3], 1 }

</bundles_post_ra>
